<compile_context>
chip_gen: v7x
topology: tpu7x:2x2x1
jax: 0.10.0
libtpu: 0.0.40
codegen_flags: <defaults>
</compile_context>

<pallas_src>
import functools

import jax
import jax.numpy as jnp
from jax import lax
from jax.experimental import pallas as pl
from jax.experimental.pallas import tpu as pltpu


def _round_up(x, m):
    return ((x + m - 1) // m) * m


_VMEM_LIMIT = 48 * 1024 * 1024


# ----------------------------------------------------------------------------
# Kernel 1: 3x3 stride-2 conv + bias + ReLU, im2col-free.
#
# The wrapper splits the zero-padded input into the 4 stride-2 phase planes
# (a 1x relayout, NOT a 9x patch matrix) and flattens their spatial dims.
# Inside the kernel, tap (i, j) is a contiguous statically-shifted row window
# of phase plane (i%2, j%2); every tap is one MXU matmul into an f32
# accumulator.  Flattened rows whose column index equals ow are junk (they
# straddle two image rows) and are dropped by the wrapper.
# ----------------------------------------------------------------------------
def _conv3x3s2_kernel(x_ref, w_ref, b_ref, o_ref, *, oh, ow):
    # x_ref: (4, (oh+1)*(ow+1)+1, Cin)   phase planes, spatially flattened
    # w_ref: (9, Cin, Coutp)             tap-major weights
    # b_ref: (1, Coutp)
    # o_ref: (oh*(ow+1), Coutp)
    owp1 = ow + 1
    m = oh * owp1
    acc = jnp.zeros((m, o_ref.shape[-1]), jnp.float32)
    for i in range(3):
        for j in range(3):
            ph = (i % 2) * 2 + (j % 2)
            s = (i // 2) * owp1 + (j // 2)
            acc = acc + jnp.dot(x_ref[ph, s:s + m, :], w_ref[i * 3 + j],
                                preferred_element_type=jnp.float32)
    out = jnp.maximum(acc + b_ref[...].astype(jnp.float32), 0.0)  # f32 epilogue
    o_ref[...] = out.astype(o_ref.dtype)


def conv3x3s2_relu(x, w_oihw, bias, *, compute_dtype=jnp.bfloat16):
    """PyTorch Conv2d(Cin->Cout, 3, stride=2, padding=1) + ReLU.

    x: [B, H, W, Cin] (H, W even).  Returns [B, H//2, W//2, Coutp] with
    Coutp = round_up(Cout, 128); channels >= Cout are exactly zero.
    """
    B, H, W, Cin = x.shape
    Cout = w_oihw.shape[0]
    assert H % 2 == 0 and W % 2 == 0, "even spatial dims expected"
    oh, ow = H // 2, W // 2
    Cp = _round_up(Cout, 128)

    # zero-pad spatially, split into the 4 stride-2 phase planes, flatten.
    xp = jnp.pad(x.astype(compute_dtype), ((0, 0), (1, 1), (1, 1), (0, 0)))
    xp = xp.reshape(B, oh + 1, 2, ow + 1, 2, Cin)
    xp = jnp.transpose(xp, (0, 2, 4, 1, 3, 5)).reshape(B, 4, (oh + 1) * (ow + 1), Cin)
    xp = jnp.pad(xp, ((0, 0), (0, 0), (0, 1), (0, 0)))  # +1 row: tap (2,2) window
    sp = xp.shape[2]

    # taps: w_taps[i*3+j] = W[:, :, i, j].T  -> (Cin, Cp)
    w_taps = jnp.transpose(w_oihw, (2, 3, 1, 0)).reshape(9, Cin, Cout)
    w_taps = jnp.pad(w_taps, ((0, 0), (0, 0), (0, Cp - Cout))).astype(compute_dtype)
    b2 = jnp.pad(bias, (0, Cp - Cout)).reshape(1, Cp).astype(jnp.float32)

    m = oh * (ow + 1)
    # TODO(synk): add a row-tile grid axis (pl.Element halo windows) for large
    # spatial inputs; for this model's sizes a full image fits in VMEM.
    out = pl.pallas_call(
        functools.partial(_conv3x3s2_kernel, oh=oh, ow=ow),
        out_shape=jax.ShapeDtypeStruct((B, m, Cp), compute_dtype),
        grid=(B,),  # >= 2 grid steps -> megacore sharding on v7x
        in_specs=[
            pl.BlockSpec((None, 4, sp, Cin), lambda b: (b, 0, 0, 0)),
            pl.BlockSpec((9, Cin, Cp), lambda b: (0, 0, 0)),
            pl.BlockSpec((1, Cp), lambda b: (0, 0)),
        ],
        out_specs=pl.BlockSpec((None, m, Cp), lambda b: (b, 0, 0)),
        compiler_params=pltpu.CompilerParams(
            dimension_semantics=("parallel",),
            vmem_limit_bytes=_VMEM_LIMIT,
        ),
    )(xp, w_taps, b2)
    # drop the junk column of each flattened row group.
    return out.reshape(B, oh, ow + 1, Cp)[:, :, :ow, :]


# ----------------------------------------------------------------------------
# Kernel 2: fused ConvTranspose2d(k=4, s=2, p=1) + ReLU + 1x1 head conv.
#
# Sub-pixel decomposition: output phase (py, px) in {0,1}^2 is a stride-1 2x2
# conv with taps ky = 3 - py - 2*di, kx = 3 - px - 2*dj on the (un-dilated)
# padded input.  Each tap is a statically-shifted row window of the same
# flattened input block; the (M, F) hidden activation stays on-chip and feeds
# the 1x1 head matmul directly.
# ----------------------------------------------------------------------------
def _deconv_head_kernel(x_ref, w1_ref, b1_ref, w2_ref, b2_ref, o_ref, *, h, w):
    # x_ref : ((h+2)*(w+2)+2, Cp)   padded input, spatially flattened
    # w1_ref: (4, 4, Cp, Fp)        [phase, tap(di*2+dj), Cin, F]
    # w2_ref: (Fp, Nkp)             1x1 head
    # o_ref : (h*(w+2), 4*Nkp)      4 phase heatmaps concatenated on lanes
    wp = w + 2
    m = h * wp
    fp = w1_ref.shape[-1]
    nkp = w2_ref.shape[-1]
    b1 = b1_ref[...].astype(jnp.float32)
    b2 = b2_ref[...].astype(jnp.float32)
    w2 = w2_ref[...]
    # the 9 distinct shifted windows, shared between the 4 phases
    win = {}
    for r in range(3):
        for c in range(3):
            win[(r, c)] = x_ref[r * wp + c: r * wp + c + m, :]
    for p, (py, px) in enumerate(((0, 0), (0, 1), (1, 0), (1, 1))):
        acc = jnp.zeros((m, fp), jnp.float32)
        for di in (0, 1):
            for dj in (0, 1):
                acc = acc + jnp.dot(win[(py + di, px + dj)],
                                    w1_ref[p, di * 2 + dj],
                                    preferred_element_type=jnp.float32)
        hid = jnp.maximum(acc + b1, 0.0)                       # f32 epilogue
        out = jnp.dot(hid.astype(w2.dtype), w2,
                      preferred_element_type=jnp.float32) + b2
        o_ref[:, p * nkp:(p + 1) * nkp] = out.astype(o_ref.dtype)


def deconv4x4s2_relu_head(x, w_t, b_up, head_w, head_b, *,
                          compute_dtype=jnp.bfloat16):
    """relu(ConvTranspose2d(Cb->F, 4, stride=2, padding=1)(x)) -> 1x1 head.

    x: [B, h, w, Cp] features (channel-padded: channels >= Cb are zero).
    w_t: [Cb, F, 4, 4], head_w: [Nk, F, 1, 1].  Returns [B, 2h, 2w, Nk] f32.
    """
    B, h, w, Cp = x.shape
    Cb, F = w_t.shape[0], w_t.shape[1]
    Nk = head_w.shape[0]
    Fp = _round_up(F, 128)
    Nkp = _round_up(Nk, 128)

    # spatial halo pad, flatten, +2 rows so the max-offset (r=2,c=2) window
    # stays in bounds.
    xp = jnp.pad(x.astype(compute_dtype), ((0, 0), (1, 1), (1, 1), (0, 0)))
    xp = xp.reshape(B, (h + 2) * (w + 2), Cp)
    xp = jnp.pad(xp, ((0, 0), (0, 2), (0, 0)))
    sp = xp.shape[1]

    # per-phase 2x2 sub-kernels: w1[p, di*2+dj] = W_t[:, :, 3-py-2di, 3-px-2dj]
    w1 = []
    for (py, px) in ((0, 0), (0, 1), (1, 0), (1, 1)):
        w_sel = w_t[:, :, 3 - py::-2, 3 - px::-2]               # (Cb, F, 2, 2)
        w1.append(jnp.transpose(w_sel, (2, 3, 0, 1)).reshape(4, Cb, F))
    w1 = jnp.stack(w1, axis=0)                                  # (4, 4, Cb, F)
    w1 = jnp.pad(w1, ((0, 0), (0, 0), (0, Cp - Cb), (0, Fp - F))).astype(compute_dtype)
    b1 = jnp.pad(b_up, (0, Fp - F)).reshape(1, Fp).astype(jnp.float32)
    w2 = jnp.pad(head_w.reshape(Nk, F).T,
                 ((0, Fp - F), (0, Nkp - Nk))).astype(compute_dtype)
    b2 = jnp.pad(head_b, (0, Nkp - Nk)).reshape(1, Nkp).astype(jnp.float32)

    m = h * (w + 2)
    heat = pl.pallas_call(
        functools.partial(_deconv_head_kernel, h=h, w=w),
        out_shape=jax.ShapeDtypeStruct((B, m, 4 * Nkp), jnp.float32),
        grid=(B,),
        in_specs=[
            pl.BlockSpec((None, sp, Cp), lambda b: (b, 0, 0)),
            pl.BlockSpec((4, 4, Cp, Fp), lambda b: (0, 0, 0, 0)),
            pl.BlockSpec((1, Fp), lambda b: (0, 0)),
            pl.BlockSpec((Fp, Nkp), lambda b: (0, 0)),
            pl.BlockSpec((1, Nkp), lambda b: (0, 0)),
        ],
        out_specs=pl.BlockSpec((None, m, 4 * Nkp), lambda b: (b, 0, 0)),
        compiler_params=pltpu.CompilerParams(
            dimension_semantics=("parallel",),
            vmem_limit_bytes=_VMEM_LIMIT,
        ),
    )(xp, w1, b1, w2, b2)

    # lane-dense phase interleave (Nkp stays 128-aligned through the
    # reshape/transpose); slice to Nk only at the very end.
    heat = heat.reshape(B, h, w + 2, 2, 2, Nkp)[:, :, :w]       # drop junk cols
    heat = jnp.transpose(heat, (0, 1, 3, 2, 4, 5)).reshape(B, 2 * h, 2 * w, Nkp)
    return heat[..., :Nk]


# ----------------------------------------------------------------------------
# PoseResNet forward
# ----------------------------------------------------------------------------
def init_pose_resnet_params(key, in_channels, backbone_dim, feature_dim, num_keypoints):
    k1, k2, k3 = jax.random.split(key, 3)
    return {
        # backbone (representative): Conv2d(in, backbone_dim, 3, stride=2, pad=1) + ReLU
        "bb_w": 0.05 * jax.random.normal(k1, (backbone_dim, in_channels, 3, 3), jnp.float32),
        "bb_b": jnp.zeros((backbone_dim,), jnp.float32),
        # upsampling (representative): ConvTranspose2d(backbone_dim, feature_dim, 4, 2, 1) + ReLU
        "up_w": 0.05 * jax.random.normal(k2, (backbone_dim, feature_dim, 4, 4), jnp.float32),
        "up_b": jnp.zeros((feature_dim,), jnp.float32),
        # head: Conv2d(feature_dim, num_keypoints, 1); weight ~ N(0, 0.001), bias = 0
        "head_w": 0.001 * jax.random.normal(k3, (num_keypoints, feature_dim, 1, 1), jnp.float32),
        "head_b": jnp.zeros((num_keypoints,), jnp.float32),
    }


def pose_resnet_forward(params, x_nchw, *, compute_dtype=jnp.bfloat16):
    """PoseResNet.forward: backbone -> upsampling -> head.  NCHW in / NCHW out.

    MXU operands use `compute_dtype` (bf16 default); accumulation, bias, ReLU
    and the heatmap output stay float32.
    """
    x = jnp.transpose(x_nchw, (0, 2, 3, 1))                        # NCHW -> NHWC
    feat = conv3x3s2_relu(x, params["bb_w"], params["bb_b"],
                          compute_dtype=compute_dtype)             # backbone
    heat = deconv4x4s2_relu_head(feat, params["up_w"], params["up_b"],
                                 params["head_w"], params["head_b"],
                                 compute_dtype=compute_dtype)      # upsample + head (fused)
    return jnp.transpose(heat, (0, 3, 1, 2))                       # NHWC -> NCHW


def pose_resnet_reference(params, x_nchw):
    """Independent pure-JAX reference (lax convs, no im2col / sub-pixel trick)."""
    x = jnp.transpose(x_nchw, (0, 2, 3, 1))
    # backbone conv
    w_hwio = jnp.transpose(params["bb_w"], (2, 3, 1, 0))
    y = lax.conv_general_dilated(x, w_hwio, (2, 2), [(1, 1), (1, 1)],
                                 dimension_numbers=("NHWC", "HWIO", "NHWC"))
    y = jnp.maximum(y + params["bb_b"], 0.0)
    # ConvTranspose2d (PyTorch semantics) via lhs dilation + flipped/swapped kernel
    w_t = params["up_w"]                                           # (Cin, F, 4, 4)
    w_eq = jnp.transpose(jnp.flip(w_t, (2, 3)), (1, 0, 2, 3))      # (F, Cin, 4, 4)
    w_eq_hwio = jnp.transpose(w_eq, (2, 3, 1, 0))
    z = lax.conv_general_dilated(y, w_eq_hwio, (1, 1), [(2, 2), (2, 2)],
                                 lhs_dilation=(2, 2),
                                 dimension_numbers=("NHWC", "HWIO", "NHWC"))
    z = jnp.maximum(z + params["up_b"], 0.0)
    # 1x1 head
    hw = params["head_w"].reshape(params["head_w"].shape[0], -1)   # (Nk, F)
    out = jnp.einsum("bhwf,kf->bhwk", z, hw) + params["head_b"]
    return jnp.transpose(out, (0, 3, 1, 2))


if __name__ == "__main__":
    key = jax.random.PRNGKey(0)
    kx, kp = jax.random.split(key)

    B, Cin, H, W = 2, 4, 16, 16
    backbone_dim, feature_dim, num_keypoints = 32, 32, 8

    x = jax.random.normal(kx, (B, Cin, H, W), jnp.float32)
    params = init_pose_resnet_params(kp, Cin, backbone_dim, feature_dim, num_keypoints)

    ref = jax.block_until_ready(pose_resnet_reference(params, x))

    # f32 operands: tight numerical check against the lax reference.
    fwd_f32 = jax.jit(functools.partial(pose_resnet_forward, compute_dtype=jnp.float32))
    out_f32 = jax.block_until_ready(fwd_f32(params, x))
    assert out_f32.shape == (B, num_keypoints, H, W), out_f32.shape
    assert bool(jnp.all(jnp.isfinite(out_f32)))
    assert jnp.allclose(out_f32, ref, atol=5e-4, rtol=1e-2), \
        float(jnp.max(jnp.abs(out_f32 - ref)))

    # default path (bf16 MXU operands, f32 accumulation): looser check.
    fwd_bf16 = jax.jit(pose_resnet_forward)
    out_bf16 = jax.block_until_ready(fwd_bf16(params, x))
    assert out_bf16.shape == (B, num_keypoints, H, W), out_bf16.shape
    assert bool(jnp.all(jnp.isfinite(out_bf16)))
    assert jnp.allclose(out_bf16, ref, atol=2e-4, rtol=5e-2), \
        float(jnp.max(jnp.abs(out_bf16 - ref)))

    print("KERNEL_OK")
</pallas_src>

<mosaic_0001>
module attributes {stable_mosaic.version = 11 : i64} {
  func.func @_conv3x3s2_kernel(%arg0: i32, %arg1: memref<1x4x82x4xf32, #tpu.memory_space<vmem>>, %arg2: memref<9x4x128xf32, #tpu.memory_space<vmem>>, %arg3: memref<1x128xf32, #tpu.memory_space<vmem>>, %arg4: memref<1x72x128xf32, #tpu.memory_space<vmem>>) attributes {dimension_semantics = [#tpu.dimension_semantics<parallel>], iteration_bounds = array<i64: 2>, scalar_prefetch = 0 : i64, scratch_operands = 0 : i64, tpu.core_type = #tpu.core_type<tc>, window_params = [{transform_indices = @transform_0, window_bounds = array<i64: 1, 4, 82, 4>}, {pipeline_mode = #tpu.pipeline_mode<synchronous>, transform_indices = @transform_1, window_bounds = array<i64: 9, 4, 128>}, {pipeline_mode = #tpu.pipeline_mode<synchronous>, transform_indices = @transform_2, window_bounds = array<i64: 1, 128>}, {transform_indices = @transform_3, window_bounds = array<i64: 1, 72, 128>}]} {
    %cst = arith.constant 0.000000e+00 : f32
    %0 = vector.broadcast %cst : f32 to vector<72x128xf32>
    %c0 = arith.constant 0 : index
    %c0_0 = arith.constant 0 : index
    %c0_1 = arith.constant 0 : index
    %c0_2 = arith.constant 0 : index
    %1 = vector.load %arg1[%c0, %c0_0, %c0_1, %c0_2] : memref<1x4x82x4xf32, #tpu.memory_space<vmem>>, vector<1x1x72x4xf32>
    %2 = vector.shape_cast %1 : vector<1x1x72x4xf32> to vector<72x4xf32>
    %c0_3 = arith.constant 0 : index
    %c0_4 = arith.constant 0 : index
    %c0_5 = arith.constant 0 : index
    %3 = vector.load %arg2[%c0_3, %c0_4, %c0_5] : memref<9x4x128xf32, #tpu.memory_space<vmem>>, vector<1x4x128xf32>
    %4 = vector.shape_cast %3 : vector<1x4x128xf32> to vector<4x128xf32>
    %cst_6 = arith.constant dense<0.000000e+00> : vector<72x128xf32>
    %5 = tpu.matmul %2, %4, %cst_6 {dimension_numbers = #tpu.dot_dimension_numbers<[1], [0], [0], [1], [0, 0, 1, 1], [], []>} : vector<72x4xf32>, vector<4x128xf32>, vector<72x128xf32> -> vector<72x128xf32>
    %6 = arith.addf %0, %5 : vector<72x128xf32>
    %c0_7 = arith.constant 0 : index
    %c1 = arith.constant 1 : index
    %c0_8 = arith.constant 0 : index
    %c0_9 = arith.constant 0 : index
    %7 = vector.load %arg1[%c0_7, %c1, %c0_8, %c0_9] : memref<1x4x82x4xf32, #tpu.memory_space<vmem>>, vector<1x1x72x4xf32>
    %8 = vector.shape_cast %7 : vector<1x1x72x4xf32> to vector<72x4xf32>
    %c1_10 = arith.constant 1 : index
    %c0_11 = arith.constant 0 : index
    %c0_12 = arith.constant 0 : index
    %9 = vector.load %arg2[%c1_10, %c0_11, %c0_12] : memref<9x4x128xf32, #tpu.memory_space<vmem>>, vector<1x4x128xf32>
    %10 = vector.shape_cast %9 : vector<1x4x128xf32> to vector<4x128xf32>
    %cst_13 = arith.constant dense<0.000000e+00> : vector<72x128xf32>
    %11 = tpu.matmul %8, %10, %cst_13 {dimension_numbers = #tpu.dot_dimension_numbers<[1], [0], [0], [1], [0, 0, 1, 1], [], []>} : vector<72x4xf32>, vector<4x128xf32>, vector<72x128xf32> -> vector<72x128xf32>
    %12 = arith.addf %6, %11 : vector<72x128xf32>
    %c0_14 = arith.constant 0 : index
    %c0_15 = arith.constant 0 : index
    %c1_16 = arith.constant 1 : index
    %c0_17 = arith.constant 0 : index
    %13 = vector.load %arg1[%c0_14, %c0_15, %c1_16, %c0_17] : memref<1x4x82x4xf32, #tpu.memory_space<vmem>>, vector<1x1x72x4xf32>
    %14 = vector.shape_cast %13 : vector<1x1x72x4xf32> to vector<72x4xf32>
    %c2 = arith.constant 2 : index
    %c0_18 = arith.constant 0 : index
    %c0_19 = arith.constant 0 : index
    %15 = vector.load %arg2[%c2, %c0_18, %c0_19] : memref<9x4x128xf32, #tpu.memory_space<vmem>>, vector<1x4x128xf32>
    %16 = vector.shape_cast %15 : vector<1x4x128xf32> to vector<4x128xf32>
    %cst_20 = arith.constant dense<0.000000e+00> : vector<72x128xf32>
    %17 = tpu.matmul %14, %16, %cst_20 {dimension_numbers = #tpu.dot_dimension_numbers<[1], [0], [0], [1], [0, 0, 1, 1], [], []>} : vector<72x4xf32>, vector<4x128xf32>, vector<72x128xf32> -> vector<72x128xf32>
    %18 = arith.addf %12, %17 : vector<72x128xf32>
    %c0_21 = arith.constant 0 : index
    %c2_22 = arith.constant 2 : index
    %c0_23 = arith.constant 0 : index
    %c0_24 = arith.constant 0 : index
    %19 = vector.load %arg1[%c0_21, %c2_22, %c0_23, %c0_24] : memref<1x4x82x4xf32, #tpu.memory_space<vmem>>, vector<1x1x72x4xf32>
    %20 = vector.shape_cast %19 : vector<1x1x72x4xf32> to vector<72x4xf32>
    %c3 = arith.constant 3 : index
    %c0_25 = arith.constant 0 : index
    %c0_26 = arith.constant 0 : index
    %21 = vector.load %arg2[%c3, %c0_25, %c0_26] : memref<9x4x128xf32, #tpu.memory_space<vmem>>, vector<1x4x128xf32>
    %22 = vector.shape_cast %21 : vector<1x4x128xf32> to vector<4x128xf32>
    %cst_27 = arith.constant dense<0.000000e+00> : vector<72x128xf32>
    %23 = tpu.matmul %20, %22, %cst_27 {dimension_numbers = #tpu.dot_dimension_numbers<[1], [0], [0], [1], [0, 0, 1, 1], [], []>} : vector<72x4xf32>, vector<4x128xf32>, vector<72x128xf32> -> vector<72x128xf32>
    %24 = arith.addf %18, %23 : vector<72x128xf32>
    %c0_28 = arith.constant 0 : index
    %c3_29 = arith.constant 3 : index
    %c0_30 = arith.constant 0 : index
    %c0_31 = arith.constant 0 : index
    %25 = vector.load %arg1[%c0_28, %c3_29, %c0_30, %c0_31] : memref<1x4x82x4xf32, #tpu.memory_space<vmem>>, vector<1x1x72x4xf32>
    %26 = vector.shape_cast %25 : vector<1x1x72x4xf32> to vector<72x4xf32>
    %c4 = arith.constant 4 : index
    %c0_32 = arith.constant 0 : index
    %c0_33 = arith.constant 0 : index
    %27 = vector.load %arg2[%c4, %c0_32, %c0_33] : memref<9x4x128xf32, #tpu.memory_space<vmem>>, vector<1x4x128xf32>
    %28 = vector.shape_cast %27 : vector<1x4x128xf32> to vector<4x128xf32>
    %cst_34 = arith.constant dense<0.000000e+00> : vector<72x128xf32>
    %29 = tpu.matmul %26, %28, %cst_34 {dimension_numbers = #tpu.dot_dimension_numbers<[1], [0], [0], [1], [0, 0, 1, 1], [], []>} : vector<72x4xf32>, vector<4x128xf32>, vector<72x128xf32> -> vector<72x128xf32>
    %30 = arith.addf %24, %29 : vector<72x128xf32>
    %c0_35 = arith.constant 0 : index
    %c2_36 = arith.constant 2 : index
    %c1_37 = arith.constant 1 : index
    %c0_38 = arith.constant 0 : index
    %31 = vector.load %arg1[%c0_35, %c2_36, %c1_37, %c0_38] : memref<1x4x82x4xf32, #tpu.memory_space<vmem>>, vector<1x1x72x4xf32>
    %32 = vector.shape_cast %31 : vector<1x1x72x4xf32> to vector<72x4xf32>
    %c5 = arith.constant 5 : index
    %c0_39 = arith.constant 0 : index
    %c0_40 = arith.constant 0 : index
    %33 = vector.load %arg2[%c5, %c0_39, %c0_40] : memref<9x4x128xf32, #tpu.memory_space<vmem>>, vector<1x4x128xf32>
    %34 = vector.shape_cast %33 : vector<1x4x128xf32> to vector<4x128xf32>
    %cst_41 = arith.constant dense<0.000000e+00> : vector<72x128xf32>
    %35 = tpu.matmul %32, %34, %cst_41 {dimension_numbers = #tpu.dot_dimension_numbers<[1], [0], [0], [1], [0, 0, 1, 1], [], []>} : vector<72x4xf32>, vector<4x128xf32>, vector<72x128xf32> -> vector<72x128xf32>
    %36 = arith.addf %30, %35 : vector<72x128xf32>
    %c0_42 = arith.constant 0 : index
    %c0_43 = arith.constant 0 : index
    %c9 = arith.constant 9 : index
    %c0_44 = arith.constant 0 : index
    %37 = vector.load %arg1[%c0_42, %c0_43, %c9, %c0_44] : memref<1x4x82x4xf32, #tpu.memory_space<vmem>>, vector<1x1x72x4xf32>
    %38 = vector.shape_cast %37 : vector<1x1x72x4xf32> to vector<72x4xf32>
    %c6 = arith.constant 6 : index
    %c0_45 = arith.constant 0 : index
    %c0_46 = arith.constant 0 : index
    %39 = vector.load %arg2[%c6, %c0_45, %c0_46] : memref<9x4x128xf32, #tpu.memory_space<vmem>>, vector<1x4x128xf32>
    %40 = vector.shape_cast %39 : vector<1x4x128xf32> to vector<4x128xf32>
    %cst_47 = arith.constant dense<0.000000e+00> : vector<72x128xf32>
    %41 = tpu.matmul %38, %40, %cst_47 {dimension_numbers = #tpu.dot_dimension_numbers<[1], [0], [0], [1], [0, 0, 1, 1], [], []>} : vector<72x4xf32>, vector<4x128xf32>, vector<72x128xf32> -> vector<72x128xf32>
    %42 = arith.addf %36, %41 : vector<72x128xf32>
    %c0_48 = arith.constant 0 : index
    %c1_49 = arith.constant 1 : index
    %c9_50 = arith.constant 9 : index
    %c0_51 = arith.constant 0 : index
    %43 = vector.load %arg1[%c0_48, %c1_49, %c9_50, %c0_51] : memref<1x4x82x4xf32, #tpu.memory_space<vmem>>, vector<1x1x72x4xf32>
    %44 = vector.shape_cast %43 : vector<1x1x72x4xf32> to vector<72x4xf32>
    %c7 = arith.constant 7 : index
    %c0_52 = arith.constant 0 : index
    %c0_53 = arith.constant 0 : index
    %45 = vector.load %arg2[%c7, %c0_52, %c0_53] : memref<9x4x128xf32, #tpu.memory_space<vmem>>, vector<1x4x128xf32>
    %46 = vector.shape_cast %45 : vector<1x4x128xf32> to vector<4x128xf32>
    %cst_54 = arith.constant dense<0.000000e+00> : vector<72x128xf32>
    %47 = tpu.matmul %44, %46, %cst_54 {dimension_numbers = #tpu.dot_dimension_numbers<[1], [0], [0], [1], [0, 0, 1, 1], [], []>} : vector<72x4xf32>, vector<4x128xf32>, vector<72x128xf32> -> vector<72x128xf32>
    %48 = arith.addf %42, %47 : vector<72x128xf32>
    %c0_55 = arith.constant 0 : index
    %c0_56 = arith.constant 0 : index
    %c10 = arith.constant 10 : index
    %c0_57 = arith.constant 0 : index
    %49 = vector.load %arg1[%c0_55, %c0_56, %c10, %c0_57] : memref<1x4x82x4xf32, #tpu.memory_space<vmem>>, vector<1x1x72x4xf32>
    %50 = vector.shape_cast %49 : vector<1x1x72x4xf32> to vector<72x4xf32>
    %c8 = arith.constant 8 : index
    %c0_58 = arith.constant 0 : index
    %c0_59 = arith.constant 0 : index
    %51 = vector.load %arg2[%c8, %c0_58, %c0_59] : memref<9x4x128xf32, #tpu.memory_space<vmem>>, vector<1x4x128xf32>
    %52 = vector.shape_cast %51 : vector<1x4x128xf32> to vector<4x128xf32>
    %cst_60 = arith.constant dense<0.000000e+00> : vector<72x128xf32>
    %53 = tpu.matmul %50, %52, %cst_60 {dimension_numbers = #tpu.dot_dimension_numbers<[1], [0], [0], [1], [0, 0, 1, 1], [], []>} : vector<72x4xf32>, vector<4x128xf32>, vector<72x128xf32> -> vector<72x128xf32>
    %54 = arith.addf %48, %53 : vector<72x128xf32>
    %c0_61 = arith.constant 0 : index
    %c0_62 = arith.constant 0 : index
    %55 = vector.load %arg3[%c0_61, %c0_62] : memref<1x128xf32, #tpu.memory_space<vmem>>, vector<1x128xf32>
    %56 = vector.broadcast %55 : vector<1x128xf32> to vector<72x128xf32>
    %57 = arith.addf %54, %56 : vector<72x128xf32>
    %cst_63 = arith.constant 0.000000e+00 : f32
    %58 = vector.broadcast %cst_63 : f32 to vector<72x128xf32>
    %59 = arith.maximumf %57, %58 : vector<72x128xf32>
    %c0_64 = arith.constant 0 : index
    %c0_65 = arith.constant 0 : index
    %c0_66 = arith.constant 0 : index
    %60 = vector.load %arg4[%c0_64, %c0_65, %c0_66] : memref<1x72x128xf32, #tpu.memory_space<vmem>>, vector<1x72x128xf32>
    %61 = vector.shape_cast %60 : vector<1x72x128xf32> to vector<72x128xf32>
    %62 = vector.shape_cast %59 : vector<72x128xf32> to vector<1x72x128xf32>
    tpu.vector_store %arg4[%c0_64, %c0_65, %c0_66], %62 {strides = array<i32>} : memref<1x72x128xf32, #tpu.memory_space<vmem>>, vector<1x72x128xf32>,
    return
  }
  func.func @transform_0(%arg0: i32) -> (i32, i32, i32, i32) {
    %c0_i32 = arith.constant 0 : i32
    %c0_i32_0 = arith.constant 0 : i32
    %c0_i32_1 = arith.constant 0 : i32
    %c0_i32_2 = arith.constant 0 : i32
    return %arg0, %c0_i32, %c0_i32_0, %c0_i32_1 : i32, i32, i32, i32
  }
  func.func @transform_1(%arg0: i32) -> (i32, i32, i32) {
    %c0_i32 = arith.constant 0 : i32
    %c0_i32_0 = arith.constant 0 : i32
    %c0_i32_1 = arith.constant 0 : i32
    %c0_i32_2 = arith.constant 0 : i32
    return %c0_i32, %c0_i32_0, %c0_i32_1 : i32, i32, i32
  }
  func.func @transform_2(%arg0: i32) -> (i32, i32) {
    %c0_i32 = arith.constant 0 : i32
    %c0_i32_0 = arith.constant 0 : i32
    %c0_i32_1 = arith.constant 0 : i32
    return %c0_i32, %c0_i32_0 : i32, i32
  }
  func.func @transform_3(%arg0: i32) -> (i32, i32, i32) {
    %c0_i32 = arith.constant 0 : i32
    %c0_i32_0 = arith.constant 0 : i32
    %c0_i32_1 = arith.constant 0 : i32
    return %arg0, %c0_i32, %c0_i32_0 : i32, i32, i32
  }
}

module attributes {stable_mosaic.version = 11 : i64} {
  func.func @_deconv_head_kernel(%arg0: i32, %arg1: memref<1x102x128xf32, #tpu.memory_space<vmem>>, %arg2: memref<4x4x128x128xf32, #tpu.memory_space<vmem>>, %arg3: memref<1x128xf32, #tpu.memory_space<vmem>>, %arg4: memref<128x128xf32, #tpu.memory_space<vmem>>, %arg5: memref<1x128xf32, #tpu.memory_space<vmem>>, %arg6: memref<1x80x512xf32, #tpu.memory_space<vmem>>) attributes {dimension_semantics = [#tpu.dimension_semantics<parallel>], iteration_bounds = array<i64: 2>, scalar_prefetch = 0 : i64, scratch_operands = 0 : i64, tpu.core_type = #tpu.core_type<tc>, window_params = [{transform_indices = @transform_0, window_bounds = array<i64: 1, 102, 128>}, {pipeline_mode = #tpu.pipeline_mode<synchronous>, transform_indices = @transform_1, window_bounds = array<i64: 4, 4, 128, 128>}, {pipeline_mode = #tpu.pipeline_mode<synchronous>, transform_indices = @transform_2, window_bounds = array<i64: 1, 128>}, {pipeline_mode = #tpu.pipeline_mode<synchronous>, transform_indices = @transform_3, window_bounds = array<i64: 128, 128>}, {pipeline_mode = #tpu.pipeline_mode<synchronous>, transform_indices = @transform_4, window_bounds = array<i64: 1, 128>}, {transform_indices = @transform_5, window_bounds = array<i64: 1, 80, 512>}]} {
    %c0 = arith.constant 0 : index
    %c0_0 = arith.constant 0 : index
    %0 = vector.load %arg3[%c0, %c0_0] : memref<1x128xf32, #tpu.memory_space<vmem>>, vector<1x128xf32>
    %c0_1 = arith.constant 0 : index
    %c0_2 = arith.constant 0 : index
    %1 = vector.load %arg5[%c0_1, %c0_2] : memref<1x128xf32, #tpu.memory_space<vmem>>, vector<1x128xf32>
    %c0_3 = arith.constant 0 : index
    %c0_4 = arith.constant 0 : index
    %2 = vector.load %arg4[%c0_3, %c0_4] : memref<128x128xf32, #tpu.memory_space<vmem>>, vector<128x128xf32>
    %c0_5 = arith.constant 0 : index
    %c0_6 = arith.constant 0 : index
    %c0_7 = arith.constant 0 : index
    %3 = vector.load %arg1[%c0_5, %c0_6, %c0_7] : memref<1x102x128xf32, #tpu.memory_space<vmem>>, vector<1x80x128xf32>
    %4 = vector.shape_cast %3 : vector<1x80x128xf32> to vector<80x128xf32>
    %c0_8 = arith.constant 0 : index
    %c1 = arith.constant 1 : index
    %c0_9 = arith.constant 0 : index
    %5 = vector.load %arg1[%c0_8, %c1, %c0_9] : memref<1x102x128xf32, #tpu.memory_space<vmem>>, vector<1x80x128xf32>
    %6 = vector.shape_cast %5 : vector<1x80x128xf32> to vector<80x128xf32>
    %c0_10 = arith.constant 0 : index
    %c2 = arith.constant 2 : index
    %c0_11 = arith.constant 0 : index
    %7 = vector.load %arg1[%c0_10, %c2, %c0_11] : memref<1x102x128xf32, #tpu.memory_space<vmem>>, vector<1x80x128xf32>
    %8 = vector.shape_cast %7 : vector<1x80x128xf32> to vector<80x128xf32>
    %c0_12 = arith.constant 0 : index
    %c10 = arith.constant 10 : index
    %c0_13 = arith.constant 0 : index
    %9 = vector.load %arg1[%c0_12, %c10, %c0_13] : memref<1x102x128xf32, #tpu.memory_space<vmem>>, vector<1x80x128xf32>
    %10 = vector.shape_cast %9 : vector<1x80x128xf32> to vector<80x128xf32>
    %c0_14 = arith.constant 0 : index
    %c11 = arith.constant 11 : index
    %c0_15 = arith.constant 0 : index
    %11 = vector.load %arg1[%c0_14, %c11, %c0_15] : memref<1x102x128xf32, #tpu.memory_space<vmem>>, vector<1x80x128xf32>
    %12 = vector.shape_cast %11 : vector<1x80x128xf32> to vector<80x128xf32>
    %c0_16 = arith.constant 0 : index
    %c12 = arith.constant 12 : index
    %c0_17 = arith.constant 0 : index
    %13 = vector.load %arg1[%c0_16, %c12, %c0_17] : memref<1x102x128xf32, #tpu.memory_space<vmem>>, vector<1x80x128xf32>
    %14 = vector.shape_cast %13 : vector<1x80x128xf32> to vector<80x128xf32>
    %c0_18 = arith.constant 0 : index
    %c20 = arith.constant 20 : index
    %c0_19 = arith.constant 0 : index
    %15 = vector.load %arg1[%c0_18, %c20, %c0_19] : memref<1x102x128xf32, #tpu.memory_space<vmem>>, vector<1x80x128xf32>
    %16 = vector.shape_cast %15 : vector<1x80x128xf32> to vector<80x128xf32>
    %c0_20 = arith.constant 0 : index
    %c21 = arith.constant 21 : index
    %c0_21 = arith.constant 0 : index
    %17 = vector.load %arg1[%c0_20, %c21, %c0_21] : memref<1x102x128xf32, #tpu.memory_space<vmem>>, vector<1x80x128xf32>
    %18 = vector.shape_cast %17 : vector<1x80x128xf32> to vector<80x128xf32>
    %c0_22 = arith.constant 0 : index
    %c22 = arith.constant 22 : index
    %c0_23 = arith.constant 0 : index
    %19 = vector.load %arg1[%c0_22, %c22, %c0_23] : memref<1x102x128xf32, #tpu.memory_space<vmem>>, vector<1x80x128xf32>
    %20 = vector.shape_cast %19 : vector<1x80x128xf32> to vector<80x128xf32>
    %cst = arith.constant 0.000000e+00 : f32
    %21 = vector.broadcast %cst : f32 to vector<80x128xf32>
    %c0_24 = arith.constant 0 : index
    %c0_25 = arith.constant 0 : index
    %c0_26 = arith.constant 0 : index
    %c0_27 = arith.constant 0 : index
    %22 = vector.load %arg2[%c0_24, %c0_25, %c0_26, %c0_27] : memref<4x4x128x128xf32, #tpu.memory_space<vmem>>, vector<1x1x128x128xf32>
    %23 = vector.shape_cast %22 : vector<1x1x128x128xf32> to vector<128x128xf32>
    %cst_28 = arith.constant dense<0.000000e+00> : vector<80x128xf32>
    %24 = tpu.matmul %4, %23, %cst_28 {dimension_numbers = #tpu.dot_dimension_numbers<[1], [0], [0], [1], [0, 0, 1, 1], [], []>} : vector<80x128xf32>, vector<128x128xf32>, vector<80x128xf32> -> vector<80x128xf32>
    %25 = arith.addf %21, %24 : vector<80x128xf32>
    %c0_29 = arith.constant 0 : index
    %c1_30 = arith.constant 1 : index
    %c0_31 = arith.constant 0 : index
    %c0_32 = arith.constant 0 : index
    %26 = vector.load %arg2[%c0_29, %c1_30, %c0_31, %c0_32] : memref<4x4x128x128xf32, #tpu.memory_space<vmem>>, vector<1x1x128x128xf32>
    %27 = vector.shape_cast %26 : vector<1x1x128x128xf32> to vector<128x128xf32>
    %cst_33 = arith.constant dense<0.000000e+00> : vector<80x128xf32>
    %28 = tpu.matmul %6, %27, %cst_33 {dimension_numbers = #tpu.dot_dimension_numbers<[1], [0], [0], [1], [0, 0, 1, 1], [], []>} : vector<80x128xf32>, vector<128x128xf32>, vector<80x128xf32> -> vector<80x128xf32>
    %29 = arith.addf %25, %28 : vector<80x128xf32>
    %c0_34 = arith.constant 0 : index
    %c2_35 = arith.constant 2 : index
    %c0_36 = arith.constant 0 : index
    %c0_37 = arith.constant 0 : index
    %30 = vector.load %arg2[%c0_34, %c2_35, %c0_36, %c0_37] : memref<4x4x128x128xf32, #tpu.memory_space<vmem>>, vector<1x1x128x128xf32>
    %31 = vector.shape_cast %30 : vector<1x1x128x128xf32> to vector<128x128xf32>
    %cst_38 = arith.constant dense<0.000000e+00> : vector<80x128xf32>
    %32 = tpu.matmul %10, %31, %cst_38 {dimension_numbers = #tpu.dot_dimension_numbers<[1], [0], [0], [1], [0, 0, 1, 1], [], []>} : vector<80x128xf32>, vector<128x128xf32>, vector<80x128xf32> -> vector<80x128xf32>
    %33 = arith.addf %29, %32 : vector<80x128xf32>
    %c0_39 = arith.constant 0 : index
    %c3 = arith.constant 3 : index
    %c0_40 = arith.constant 0 : index
    %c0_41 = arith.constant 0 : index
    %34 = vector.load %arg2[%c0_39, %c3, %c0_40, %c0_41] : memref<4x4x128x128xf32, #tpu.memory_space<vmem>>, vector<1x1x128x128xf32>
    %35 = vector.shape_cast %34 : vector<1x1x128x128xf32> to vector<128x128xf32>
    %cst_42 = arith.constant dense<0.000000e+00> : vector<80x128xf32>
    %36 = tpu.matmul %12, %35, %cst_42 {dimension_numbers = #tpu.dot_dimension_numbers<[1], [0], [0], [1], [0, 0, 1, 1], [], []>} : vector<80x128xf32>, vector<128x128xf32>, vector<80x128xf32> -> vector<80x128xf32>
    %37 = arith.addf %33, %36 : vector<80x128xf32>
    %38 = vector.broadcast %0 : vector<1x128xf32> to vector<80x128xf32>
    %39 = arith.addf %37, %38 : vector<80x128xf32>
    %cst_43 = arith.constant 0.000000e+00 : f32
    %40 = vector.broadcast %cst_43 : f32 to vector<80x128xf32>
    %41 = arith.maximumf %39, %40 : vector<80x128xf32>
    %cst_44 = arith.constant dense<0.000000e+00> : vector<80x128xf32>
    %42 = tpu.matmul %41, %2, %cst_44 {dimension_numbers = #tpu.dot_dimension_numbers<[1], [0], [0], [1], [0, 0, 1, 1], [], []>} : vector<80x128xf32>, vector<128x128xf32>, vector<80x128xf32> -> vector<80x128xf32>
    %43 = vector.broadcast %1 : vector<1x128xf32> to vector<80x128xf32>
    %44 = arith.addf %42, %43 : vector<80x128xf32>
    %c0_45 = arith.constant 0 : index
    %c0_46 = arith.constant 0 : index
    %c0_47 = arith.constant 0 : index
    %45 = vector.load %arg6[%c0_45, %c0_46, %c0_47] : memref<1x80x512xf32, #tpu.memory_space<vmem>>, vector<1x80x128xf32>
    %46 = vector.shape_cast %45 : vector<1x80x128xf32> to vector<80x128xf32>
    %47 = vector.shape_cast %44 : vector<80x128xf32> to vector<1x80x128xf32>
    tpu.vector_store %arg6[%c0_45, %c0_46, %c0_47], %47 {strides = array<i32>} : memref<1x80x512xf32, #tpu.memory_space<vmem>>, vector<1x80x128xf32>,
    %cst_48 = arith.constant 0.000000e+00 : f32
    %48 = vector.broadcast %cst_48 : f32 to vector<80x128xf32>
    %c1_49 = arith.constant 1 : index
    %c0_50 = arith.constant 0 : index
    %c0_51 = arith.constant 0 : index
    %c0_52 = arith.constant 0 : index
    %49 = vector.load %arg2[%c1_49, %c0_50, %c0_51, %c0_52] : memref<4x4x128x128xf32, #tpu.memory_space<vmem>>, vector<1x1x128x128xf32>
    %50 = vector.shape_cast %49 : vector<1x1x128x128xf32> to vector<128x128xf32>
    %cst_53 = arith.constant dense<0.000000e+00> : vector<80x128xf32>
    %51 = tpu.matmul %6, %50, %cst_53 {dimension_numbers = #tpu.dot_dimension_numbers<[1], [0], [0], [1], [0, 0, 1, 1], [], []>} : vector<80x128xf32>, vector<128x128xf32>, vector<80x128xf32> -> vector<80x128xf32>
    %52 = arith.addf %48, %51 : vector<80x128xf32>
    %c1_54 = arith.constant 1 : index
    %c1_55 = arith.constant 1 : index
    %c0_56 = arith.constant 0 : index
    %c0_57 = arith.constant 0 : index
    %53 = vector.load %arg2[%c1_54, %c1_55, %c0_56, %c0_57] : memref<4x4x128x128xf32, #tpu.memory_space<vmem>>, vector<1x1x128x128xf32>
    %54 = vector.shape_cast %53 : vector<1x1x128x128xf32> to vector<128x128xf32>
    %cst_58 = arith.constant dense<0.000000e+00> : vector<80x128xf32>
    %55 = tpu.matmul %8, %54, %cst_58 {dimension_numbers = #tpu.dot_dimension_numbers<[1], [0], [0], [1], [0, 0, 1, 1], [], []>} : vector<80x128xf32>, vector<128x128xf32>, vector<80x128xf32> -> vector<80x128xf32>
    %56 = arith.addf %52, %55 : vector<80x128xf32>
    %c1_59 = arith.constant 1 : index
    %c2_60 = arith.constant 2 : index
    %c0_61 = arith.constant 0 : index
    %c0_62 = arith.constant 0 : index
    %57 = vector.load %arg2[%c1_59, %c2_60, %c0_61, %c0_62] : memref<4x4x128x128xf32, #tpu.memory_space<vmem>>, vector<1x1x128x128xf32>
    %58 = vector.shape_cast %57 : vector<1x1x128x128xf32> to vector<128x128xf32>
    %cst_63 = arith.constant dense<0.000000e+00> : vector<80x128xf32>
    %59 = tpu.matmul %12, %58, %cst_63 {dimension_numbers = #tpu.dot_dimension_numbers<[1], [0], [0], [1], [0, 0, 1, 1], [], []>} : vector<80x128xf32>, vector<128x128xf32>, vector<80x128xf32> -> vector<80x128xf32>
    %60 = arith.addf %56, %59 : vector<80x128xf32>
    %c1_64 = arith.constant 1 : index
    %c3_65 = arith.constant 3 : index
    %c0_66 = arith.constant 0 : index
    %c0_67 = arith.constant 0 : index
    %61 = vector.load %arg2[%c1_64, %c3_65, %c0_66, %c0_67] : memref<4x4x128x128xf32, #tpu.memory_space<vmem>>, vector<1x1x128x128xf32>
    %62 = vector.shape_cast %61 : vector<1x1x128x128xf32> to vector<128x128xf32>
    %cst_68 = arith.constant dense<0.000000e+00> : vector<80x128xf32>
    %63 = tpu.matmul %14, %62, %cst_68 {dimension_numbers = #tpu.dot_dimension_numbers<[1], [0], [0], [1], [0, 0, 1, 1], [], []>} : vector<80x128xf32>, vector<128x128xf32>, vector<80x128xf32> -> vector<80x128xf32>
    %64 = arith.addf %60, %63 : vector<80x128xf32>
    %65 = vector.broadcast %0 : vector<1x128xf32> to vector<80x128xf32>
    %66 = arith.addf %64, %65 : vector<80x128xf32>
    %cst_69 = arith.constant 0.000000e+00 : f32
    %67 = vector.broadcast %cst_69 : f32 to vector<80x128xf32>
    %68 = arith.maximumf %66, %67 : vector<80x128xf32>
    %cst_70 = arith.constant dense<0.000000e+00> : vector<80x128xf32>
    %69 = tpu.matmul %68, %2, %cst_70 {dimension_numbers = #tpu.dot_dimension_numbers<[1], [0], [0], [1], [0, 0, 1, 1], [], []>} : vector<80x128xf32>, vector<128x128xf32>, vector<80x128xf32> -> vector<80x128xf32>
    %70 = vector.broadcast %1 : vector<1x128xf32> to vector<80x128xf32>
    %71 = arith.addf %69, %70 : vector<80x128xf32>
    %c0_71 = arith.constant 0 : index
    %c0_72 = arith.constant 0 : index
    %c128 = arith.constant 128 : index
    %72 = vector.load %arg6[%c0_71, %c0_72, %c128] : memref<1x80x512xf32, #tpu.memory_space<vmem>>, vector<1x80x128xf32>
    %73 = vector.shape_cast %72 : vector<1x80x128xf32> to vector<80x128xf32>
    %74 = vector.shape_cast %71 : vector<80x128xf32> to vector<1x80x128xf32>
    tpu.vector_store %arg6[%c0_71, %c0_72, %c128], %74 {strides = array<i32>} : memref<1x80x512xf32, #tpu.memory_space<vmem>>, vector<1x80x128xf32>,
    %cst_73 = arith.constant 0.000000e+00 : f32
    %75 = vector.broadcast %cst_73 : f32 to vector<80x128xf32>
    %c2_74 = arith.constant 2 : index
    %c0_75 = arith.constant 0 : index
    %c0_76 = arith.constant 0 : index
    %c0_77 = arith.constant 0 : index
    %76 = vector.load %arg2[%c2_74, %c0_75, %c0_76, %c0_77] : memref<4x4x128x128xf32, #tpu.memory_space<vmem>>, vector<1x1x128x128xf32>
    %77 = vector.shape_cast %76 : vector<1x1x128x128xf32> to vector<128x128xf32>
    %cst_78 = arith.constant dense<0.000000e+00> : vector<80x128xf32>
    %78 = tpu.matmul %10, %77, %cst_78 {dimension_numbers = #tpu.dot_dimension_numbers<[1], [0], [0], [1], [0, 0, 1, 1], [], []>} : vector<80x128xf32>, vector<128x128xf32>, vector<80x128xf32> -> vector<80x128xf32>
    %79 = arith.addf %75, %78 : vector<80x128xf32>
    %c2_79 = arith.constant 2 : index
    %c1_80 = arith.constant 1 : index
    %c0_81 = arith.constant 0 : index
    %c0_82 = arith.constant 0 : index
    %80 = vector.load %arg2[%c2_79, %c1_80, %c0_81, %c0_82] : memref<4x4x128x128xf32, #tpu.memory_space<vmem>>, vector<1x1x128x128xf32>
    %81 = vector.shape_cast %80 : vector<1x1x128x128xf32> to vector<128x128xf32>
    %cst_83 = arith.constant dense<0.000000e+00> : vector<80x128xf32>
    %82 = tpu.matmul %12, %81, %cst_83 {dimension_numbers = #tpu.dot_dimension_numbers<[1], [0], [0], [1], [0, 0, 1, 1], [], []>} : vector<80x128xf32>, vector<128x128xf32>, vector<80x128xf32> -> vector<80x128xf32>
    %83 = arith.addf %79, %82 : vector<80x128xf32>
    %c2_84 = arith.constant 2 : index
    %c2_85 = arith.constant 2 : index
    %c0_86 = arith.constant 0 : index
    %c0_87 = arith.constant 0 : index
    %84 = vector.load %arg2[%c2_84, %c2_85, %c0_86, %c0_87] : memref<4x4x128x128xf32, #tpu.memory_space<vmem>>, vector<1x1x128x128xf32>
    %85 = vector.shape_cast %84 : vector<1x1x128x128xf32> to vector<128x128xf32>
    %cst_88 = arith.constant dense<0.000000e+00> : vector<80x128xf32>
    %86 = tpu.matmul %16, %85, %cst_88 {dimension_numbers = #tpu.dot_dimension_numbers<[1], [0], [0], [1], [0, 0, 1, 1], [], []>} : vector<80x128xf32>, vector<128x128xf32>, vector<80x128xf32> -> vector<80x128xf32>
    %87 = arith.addf %83, %86 : vector<80x128xf32>
    %c2_89 = arith.constant 2 : index
    %c3_90 = arith.constant 3 : index
    %c0_91 = arith.constant 0 : index
    %c0_92 = arith.constant 0 : index
    %88 = vector.load %arg2[%c2_89, %c3_90, %c0_91, %c0_92] : memref<4x4x128x128xf32, #tpu.memory_space<vmem>>, vector<1x1x128x128xf32>
    %89 = vector.shape_cast %88 : vector<1x1x128x128xf32> to vector<128x128xf32>
    %cst_93 = arith.constant dense<0.000000e+00> : vector<80x128xf32>
    %90 = tpu.matmul %18, %89, %cst_93 {dimension_numbers = #tpu.dot_dimension_numbers<[1], [0], [0], [1], [0, 0, 1, 1], [], []>} : vector<80x128xf32>, vector<128x128xf32>, vector<80x128xf32> -> vector<80x128xf32>
    %91 = arith.addf %87, %90 : vector<80x128xf32>
    %92 = vector.broadcast %0 : vector<1x128xf32> to vector<80x128xf32>
    %93 = arith.addf %91, %92 : vector<80x128xf32>
    %cst_94 = arith.constant 0.000000e+00 : f32
    %94 = vector.broadcast %cst_94 : f32 to vector<80x128xf32>
    %95 = arith.maximumf %93, %94 : vector<80x128xf32>
    %cst_95 = arith.constant dense<0.000000e+00> : vector<80x128xf32>
    %96 = tpu.matmul %95, %2, %cst_95 {dimension_numbers = #tpu.dot_dimension_numbers<[1], [0], [0], [1], [0, 0, 1, 1], [], []>} : vector<80x128xf32>, vector<128x128xf32>, vector<80x128xf32> -> vector<80x128xf32>
    %97 = vector.broadcast %1 : vector<1x128xf32> to vector<80x128xf32>
    %98 = arith.addf %96, %97 : vector<80x128xf32>
    %c0_96 = arith.constant 0 : index
    %c0_97 = arith.constant 0 : index
    %c256 = arith.constant 256 : index
    %99 = vector.load %arg6[%c0_96, %c0_97, %c256] : memref<1x80x512xf32, #tpu.memory_space<vmem>>, vector<1x80x128xf32>
    %100 = vector.shape_cast %99 : vector<1x80x128xf32> to vector<80x128xf32>
    %101 = vector.shape_cast %98 : vector<80x128xf32> to vector<1x80x128xf32>
    tpu.vector_store %arg6[%c0_96, %c0_97, %c256], %101 {strides = array<i32>} : memref<1x80x512xf32, #tpu.memory_space<vmem>>, vector<1x80x128xf32>,
    %cst_98 = arith.constant 0.000000e+00 : f32
    %102 = vector.broadcast %cst_98 : f32 to vector<80x128xf32>
    %c3_99 = arith.constant 3 : index
    %c0_100 = arith.constant 0 : index
    %c0_101 = arith.constant 0 : index
    %c0_102 = arith.constant 0 : index
    %103 = vector.load %arg2[%c3_99, %c0_100, %c0_101, %c0_102] : memref<4x4x128x128xf32, #tpu.memory_space<vmem>>, vector<1x1x128x128xf32>
    %104 = vector.shape_cast %103 : vector<1x1x128x128xf32> to vector<128x128xf32>
    %cst_103 = arith.constant dense<0.000000e+00> : vector<80x128xf32>
    %105 = tpu.matmul %12, %104, %cst_103 {dimension_numbers = #tpu.dot_dimension_numbers<[1], [0], [0], [1], [0, 0, 1, 1], [], []>} : vector<80x128xf32>, vector<128x128xf32>, vector<80x128xf32> -> vector<80x128xf32>
    %106 = arith.addf %102, %105 : vector<80x128xf32>
    %c3_104 = arith.constant 3 : index
    %c1_105 = arith.constant 1 : index
    %c0_106 = arith.constant 0 : index
    %c0_107 = arith.constant 0 : index
    %107 = vector.load %arg2[%c3_104, %c1_105, %c0_106, %c0_107] : memref<4x4x128x128xf32, #tpu.memory_space<vmem>>, vector<1x1x128x128xf32>
    %108 = vector.shape_cast %107 : vector<1x1x128x128xf32> to vector<128x128xf32>
    %cst_108 = arith.constant dense<0.000000e+00> : vector<80x128xf32>
    %109 = tpu.matmul %14, %108, %cst_108 {dimension_numbers = #tpu.dot_dimension_numbers<[1], [0], [0], [1], [0, 0, 1, 1], [], []>} : vector<80x128xf32>, vector<128x128xf32>, vector<80x128xf32> -> vector<80x128xf32>
    %110 = arith.addf %106, %109 : vector<80x128xf32>
    %c3_109 = arith.constant 3 : index
    %c2_110 = arith.constant 2 : index
    %c0_111 = arith.constant 0 : index
    %c0_112 = arith.constant 0 : index
    %111 = vector.load %arg2[%c3_109, %c2_110, %c0_111, %c0_112] : memref<4x4x128x128xf32, #tpu.memory_space<vmem>>, vector<1x1x128x128xf32>
    %112 = vector.shape_cast %111 : vector<1x1x128x128xf32> to vector<128x128xf32>
    %cst_113 = arith.constant dense<0.000000e+00> : vector<80x128xf32>
    %113 = tpu.matmul %18, %112, %cst_113 {dimension_numbers = #tpu.dot_dimension_numbers<[1], [0], [0], [1], [0, 0, 1, 1], [], []>} : vector<80x128xf32>, vector<128x128xf32>, vector<80x128xf32> -> vector<80x128xf32>
    %114 = arith.addf %110, %113 : vector<80x128xf32>
    %c3_114 = arith.constant 3 : index
    %c3_115 = arith.constant 3 : index
    %c0_116 = arith.constant 0 : index
    %c0_117 = arith.constant 0 : index
    %115 = vector.load %arg2[%c3_114, %c3_115, %c0_116, %c0_117] : memref<4x4x128x128xf32, #tpu.memory_space<vmem>>, vector<1x1x128x128xf32>
    %116 = vector.shape_cast %115 : vector<1x1x128x128xf32> to vector<128x128xf32>
    %cst_118 = arith.constant dense<0.000000e+00> : vector<80x128xf32>
    %117 = tpu.matmul %20, %116, %cst_118 {dimension_numbers = #tpu.dot_dimension_numbers<[1], [0], [0], [1], [0, 0, 1, 1], [], []>} : vector<80x128xf32>, vector<128x128xf32>, vector<80x128xf32> -> vector<80x128xf32>
    %118 = arith.addf %114, %117 : vector<80x128xf32>
    %119 = vector.broadcast %0 : vector<1x128xf32> to vector<80x128xf32>
    %120 = arith.addf %118, %119 : vector<80x128xf32>
    %cst_119 = arith.constant 0.000000e+00 : f32
    %121 = vector.broadcast %cst_119 : f32 to vector<80x128xf32>
    %122 = arith.maximumf %120, %121 : vector<80x128xf32>
    %cst_120 = arith.constant dense<0.000000e+00> : vector<80x128xf32>
    %123 = tpu.matmul %122, %2, %cst_120 {dimension_numbers = #tpu.dot_dimension_numbers<[1], [0], [0], [1], [0, 0, 1, 1], [], []>} : vector<80x128xf32>, vector<128x128xf32>, vector<80x128xf32> -> vector<80x128xf32>
    %124 = vector.broadcast %1 : vector<1x128xf32> to vector<80x128xf32>
    %125 = arith.addf %123, %124 : vector<80x128xf32>
    %c0_121 = arith.constant 0 : index
    %c0_122 = arith.constant 0 : index
    %c384 = arith.constant 384 : index
    %126 = vector.load %arg6[%c0_121, %c0_122, %c384] : memref<1x80x512xf32, #tpu.memory_space<vmem>>, vector<1x80x128xf32>
    %127 = vector.shape_cast %126 : vector<1x80x128xf32> to vector<80x128xf32>
    %128 = vector.shape_cast %125 : vector<80x128xf32> to vector<1x80x128xf32>
    tpu.vector_store %arg6[%c0_121, %c0_122, %c384], %128 {strides = array<i32>} : memref<1x80x512xf32, #tpu.memory_space<vmem>>, vector<1x80x128xf32>,
    return
  }
  func.func @transform_0(%arg0: i32) -> (i32, i32, i32) {
    %c0_i32 = arith.constant 0 : i32
    %c0_i32_0 = arith.constant 0 : i32
    %c0_i32_1 = arith.constant 0 : i32
    return %arg0, %c0_i32, %c0_i32_0 : i32, i32, i32
  }
  func.func @transform_1(%arg0: i32) -> (i32, i32, i32, i32) {
    %c0_i32 = arith.constant 0 : i32
    %c0_i32_0 = arith.constant 0 : i32
    %c0_i32_1 = arith.constant 0 : i32
    %c0_i32_2 = arith.constant 0 : i32
    %c0_i32_3 = arith.constant 0 : i32
    return %c0_i32, %c0_i32_0, %c0_i32_1, %c0_i32_2 : i32, i32, i32, i32
  }
  func.func @transform_2(%arg0: i32) -> (i32, i32) {
    %c0_i32 = arith.constant 0 : i32
    %c0_i32_0 = arith.constant 0 : i32
    %c0_i32_1 = arith.constant 0 : i32
    return %c0_i32, %c0_i32_0 : i32, i32
  }
  func.func @transform_3(%arg0: i32) -> (i32, i32) {
    %c0_i32 = arith.constant 0 : i32
    %c0_i32_0 = arith.constant 0 : i32
    %c0_i32_1 = arith.constant 0 : i32
    return %c0_i32, %c0_i32_0 : i32, i32
  }
  func.func @transform_4(%arg0: i32) -> (i32, i32) {
    %c0_i32 = arith.constant 0 : i32
    %c0_i32_0 = arith.constant 0 : i32
    %c0_i32_1 = arith.constant 0 : i32
    return %c0_i32, %c0_i32_0 : i32, i32
  }
  func.func @transform_5(%arg0: i32) -> (i32, i32, i32) {
    %c0_i32 = arith.constant 0 : i32
    %c0_i32_0 = arith.constant 0 : i32
    %c0_i32_1 = arith.constant 0 : i32
    return %arg0, %c0_i32, %c0_i32_0 : i32, i32, i32
  }
}

</mosaic_0001>

<bundles_post_ra>
// kernel: pose_resnet_forward.2
= control target key start
LH: loop header
LB: loop body
LE: loop exit
PB: predicated region body
PF: predicated region fallthrough
CT: control target
= control target key end

     0   :  { %s2234_s12 = smov 0   ;;  %s2686_s0 = inlined_call_operand.vmem [shape: f32[2,4,82,4], index: 0, kind: input, shape index: {}]   ;;  %s2687_s1 = inlined_call_operand.vmem [shape: f32[9,4,128], index: 1, kind: input, shape index: {}]   ;;  %s2688_s2 = inlined_call_operand.vmem [shape: f32[1,128], index: 2, kind: input, shape index: {}]   ;;  %s2689_s3 = inlined_call_operand.vmem [shape: f32[2,72,128], index: 3, kind: output, shape index: {}]  }
   0x1 LB: > { %s1686_s13 = sadd.s32 4294967295, %s2210_s12   ;;  %p1690_p0 = scmp.ge.s32.totalorder %s2210_s12, 1  ;;  %s2210_s12 = sphi %s2234_s12, %s13_s12  }
   0x2   : > { %p137_p1 = scmp.lt.s32.totalorder %s2210_s12, 3 }
   0x4   : > { %p138_p2 = pnand %p1690_p0, %p137_p1 }
   0x5   : > { %v1702_v0 = vld [vmem:[%s2687_s1 + $0x4] sm:$0xf] (!%p138_p2)  ;;  %vm221_vm0 = vcmask (!%p138_p2), 1043456   ;;  %p161_p3 = scmp.lt.s32.totalorder (!%p138_p2), %s1686_s13, 1  ;;  %v2212_v1 = vmov (!%p138_p2), 0.0   ;;  %vm2213_vm1 = vmmov (!%p138_p2), 0  }
   0x6   : > { %141 = sbr.rel (%p138_p2) target bundleno = 397 (0x18d), region = 32  ;;  %1929 = vmatprep.subr.mxu0 (!%p138_p2), %v2212_v1  ;;  %2190 = vmatprep.subr.mxu1 (!%p138_p2), %v2212_v1  ;;  %vm193_vm2 = vcmask (!%p138_p2), 31744   ;;  %v1723_v2 = vld [vmem:[%s2687_s1 + $0x8] sm:$0xf] (!%p138_p2)  ;;  %v180_v3 = vld [vmem:[%s2687_s1] sm:$0xf] (!%p138_p2) }
   0x7   : > { %1930 = vmatpush3.msk.msra.mxu0 (!%p138_p2), %vm221_vm0, %v1702_v0  ;;  %2191 = vmatpush3.msk.msra.mxu1 (!%p138_p2), %vm221_vm0, %v1702_v0  ;;  %v1743_v14 = vld [vmem:[%s2687_s1 + $0xc] sm:$0xf] (!%p138_p2)  ;;  %v1763_v17 = vld [vmem:[%s2687_s1 + $0x10] sm:$0xf] (!%p138_p2)  ;;  %v1783_v34 = vld [vmem:[%s2687_s1 + $0x14] sm:$0xf] (!%p138_p2) }
   0x8   : > { %1931 = vmatprep.mubr.msk.f32.mxu0 (!%p138_p2), %vm2213_vm1, %v2212_v1  ;;  %1946 = vmatprep.mubr.msk.f32.mxu1 (!%p138_p2), %vm2213_vm1, %v2212_v1  ;;  %v1794_v37 = vld [vmem:[%s2687_s1 + $0x18] sm:$0xf] (!%p138_p2)  ;;  %v1814_v54 = vld [vmem:[%s2687_s1 + $0x1c] sm:$0xf] (!%p138_p2)  ;;  %v1825_v56 = vld [vmem:[%s2687_s1 + $0x20] sm:$0xf] (!%p138_p2) }
   0x9   : > { %1987 = vmatprep.subr.mxu0 (!%p138_p2), %v2212_v1  ;;  %1958 = vmatprep.subr.mxu1 (!%p138_p2), %v2212_v1 }
   0xd   : > { %s2691_s13 = smov (!%p161_p3, %s1686_s13), 1 }
   0xe   : > { %s2192_s16 = smul.u32 352, %s2691_s13 }
   0xf   : > { %s2193_s9 = smul.u32 72, %s2691_s13 }
  0x10   : > { %s2261_s19 = scalar_lea.vmem %s2686_s0, %s2192_s16 }
  0x11   : > { %v1693_v4 = vld [vmem:[%s2261_s19 + $0x58] sm:$0xff]  ;;  %v1698_v5 = vld [vmem:[%s2261_s19 + $0x80] sm:$0xff]  ;;  %v1699_v7 = vld [vmem:[%s2261_s19 + $0x88] sm:$0xff]  ;;  %s2661_s16 = scalar_lea.vmem %s2689_s3, %s2193_s9 }
  0x12   : > { %1932 = vmatmul.mubr.msk.f32.vlgmr.msra.gmra.mrb[0].mxu0 %vm193_vm2, %v1693_v4  ;;  %1947 = vmatmul.mubr.msk.f32.vlgmr.msra.gmra.mrb[0].mxu1 %vm193_vm2, %v1698_v5  ;;  %v1694_v6 = vld [vmem:[%s2261_s19 + $0x60] sm:$0xff]  ;;  %v1695_v8 = vld [vmem:[%s2261_s19 + $0x68] sm:$0xff]  ;;  %v1700_v9 = vld [vmem:[%s2261_s19 + $0x90] sm:$0xff] }
  0x13   : > { %1988 = vmatpush3.msk.msra.mxu0 %vm221_vm0, %v1723_v2  ;;  %1959 = vmatpush3.msk.msra.mxu1 %vm221_vm0, %v180_v3  ;;  %v1696_v10 = vld [vmem:[%s2261_s19 + $0x70] sm:$0xff]  ;;  %v1701_v11 = vld [vmem:[%s2261_s19 + $0x98] sm:$0xff]  ;;  %v171_v13 = vld [vmem:[%s2261_s19] sm:$0xff] }
  0x14   : > { %1934 = vmatprep.mubr.msk.f32.mxu0 %vm2213_vm1, %v2212_v1  ;;  %1949 = vmatprep.mubr.msk.f32.mxu1 %vm2213_vm1, %v2212_v1  ;;  %v1697_v12 = vld [vmem:[%s2261_s19 + $0x78] sm:$0xff]  ;;  %v172_v15 = vld [vmem:[%s2261_s19 + $0x8] sm:$0xff]  ;;  %v173_v18 = vld [vmem:[%s2261_s19 + $0x10] sm:$0xff] }
  0x15   : > { %2016 = vmatprep.subr.mxu1 %v2212_v1  ;;  %2045 = vmatprep.subr.mxu0 %v2212_v1  ;;  %v475_v16 = vld [vmem:[%s2261_s19 + $0x1] sm:$0xff]  ;;  %v2330_v19 = vld [vmem:[%s2261_s19 + $0x9] sm:$0xff]  ;;  %v174_v20 = vld [vmem:[%s2261_s19 + $0x18] sm:$0xff] }
  0x16   : > { %1935 = vmatmul.mubr.msk.f32.gmra.mrb[2].mxu0 %vm193_vm2, %v1694_v6  ;;  %1950 = vmatmul.mubr.msk.f32.gmra.mrb[2].mxu1 %vm193_vm2, %v1699_v7  ;;  %v2344_v21 = vld [vmem:[%s2261_s19 + $0x11] sm:$0xff]  ;;  %v175_v22 = vld [vmem:[%s2261_s19 + $0x20] sm:$0xff]  ;;  %v176_v24 = vld [vmem:[%s2261_s19 + $0x28] sm:$0xff] }
  0x17   : > { %1937 = vmatprep.mubr.msk.f32.mxu0 %vm2213_vm1, %v2212_v1  ;;  %1952 = vmatprep.mubr.msk.f32.mxu1 %vm2213_vm1, %v2212_v1  ;;  %v2355_v23 = vld [vmem:[%s2261_s19 + $0x19] sm:$0xff]  ;;  %v2366_v25 = vld [vmem:[%s2261_s19 + $0x21] sm:$0xff]  ;;  %v177_v26 = vld [vmem:[%s2261_s19 + $0x30] sm:$0xff] }
  0x18   : > { %v2377_v27 = vld [vmem:[%s2261_s19 + $0x29] sm:$0xff]  ;;  %v178_v28 = vld [vmem:[%s2261_s19 + $0x38] sm:$0xff]  ;;  %v179_v30 = vld [vmem:[%s2261_s19 + $0x40] sm:$0xff] }
  0x19   : > { %v2388_v29 = vld [vmem:[%s2261_s19 + $0x31] sm:$0xff]  ;;  %v2399_v31 = vld [vmem:[%s2261_s19 + $0x39] sm:$0xff]  ;;  %v2409_v32 = vld [vmem:[%s2261_s19 + $0x41] sm:$0xff] }
  0x1a   : > { %1938 = vmatmul.mubr.msk.f32.gmra.mrb[4].mxu0 %vm193_vm2, %v1695_v8  ;;  %1953 = vmatmul.mubr.msk.f32.gmra.mrb[4].mxu1 %vm193_vm2, %v1700_v9  ;;  %v1734_v33 = vld [vmem:[%s2261_s19 + $0xb0] sm:$0xff]  ;;  %v1735_v35 = vld [vmem:[%s2261_s19 + $0xb8] sm:$0xff]  ;;  %v1754_v36 = vld [vmem:[%s2261_s19 + $0x108] sm:$0xff] }
  0x1b   : > { %1940 = vmatprep.mubr.msk.f32.mxu0 %vm2213_vm1, %v2212_v1  ;;  %1955 = vmatprep.mubr.msk.f32.mxu1 %vm2213_vm1, %v2212_v1  ;;  %v1736_v38 = vld [vmem:[%s2261_s19 + $0xc0] sm:$0xff]  ;;  %v1755_v39 = vld [vmem:[%s2261_s19 + $0x110] sm:$0xff]  ;;  %v1737_v40 = vld [vmem:[%s2261_s19 + $0xc8] sm:$0xff] }
  0x1c   : > { %v1756_v41 = vld [vmem:[%s2261_s19 + $0x118] sm:$0xff]  ;;  %v1738_v42 = vld [vmem:[%s2261_s19 + $0xd0] sm:$0xff]  ;;  %v1757_v43 = vld [vmem:[%s2261_s19 + $0x120] sm:$0xff] }
  0x1d   : > { %v1739_v44 = vld [vmem:[%s2261_s19 + $0xd8] sm:$0xff]  ;;  %v1758_v45 = vld [vmem:[%s2261_s19 + $0x128] sm:$0xff]  ;;  %v1740_v46 = vld [vmem:[%s2261_s19 + $0xe0] sm:$0xff] }
  0x1e   : > { %1941 = vmatmul.mubr.msk.f32.gmra.mrb[6].mxu0 %vm193_vm2, %v1696_v10  ;;  %1956 = vmatmul.mubr.msk.f32.gmra.mrb[6].mxu1 %vm193_vm2, %v1701_v11  ;;  %v1759_v47 = vld [vmem:[%s2261_s19 + $0x130] sm:$0xff]  ;;  %v1741_v48 = vld [vmem:[%s2261_s19 + $0xe8] sm:$0xff]  ;;  %v1760_v49 = vld [vmem:[%s2261_s19 + $0x138] sm:$0xff] }
  0x1f   : > { %1943 = vmatprep.mubr.msk.f32.mxu0 %vm2213_vm1, %v2212_v1  ;;  %1960 = vmatprep.mubr.msk.f32.mxu1 %vm2213_vm1, %v2212_v1  ;;  %v1742_v50 = vld [vmem:[%s2261_s19 + $0xf0] sm:$0xff]  ;;  %v1761_v51 = vld [vmem:[%s2261_s19 + $0x140] sm:$0xff]  ;;  %v1762_v52 = vld [vmem:[%s2261_s19 + $0x148] sm:$0xff] }
  0x20   : > { %v1774_v53 = vld [vmem:[%s2261_s19 + $0xb1] sm:$0xff]  ;;  %v1775_v55 = vld [vmem:[%s2261_s19 + $0xb9] sm:$0xff]  ;;  %v1776_v57 = vld [vmem:[%s2261_s19 + $0xc1] sm:$0xff] }
  0x21   : > { %v1777_v58 = vld [vmem:[%s2261_s19 + $0xc9] sm:$0xff]  ;;  %v1778_v59 = vld [vmem:[%s2261_s19 + $0xd1] sm:$0xff]  ;;  %v1779_v60 = vld [vmem:[%s2261_s19 + $0xd9] sm:$0xff] }
  0x22   : > { %1944 = vmatmul.mubr.msk.f32.gmra.mrb[8].mxu0 %vm193_vm2, %v1697_v12  ;;  %1961 = vmatmul.mubr.msk.f32.vlgmr.msra.gmra.mrb[8].mxu1 %vm193_vm2, %v171_v13  ;;  %v1780_v61 = vld [vmem:[%s2261_s19 + $0xe1] sm:$0xff]  ;;  %v1781_v62 = vld [vmem:[%s2261_s19 + $0xe9] sm:$0xff]  ;;  %v1782_v63 = vld [vmem:[%s2261_s19 + $0xf1] sm:$0xff] }
  0x23   : > { %2017 = vmatpush3.msk.msra.mxu1 %vm221_vm0, %v1743_v14  ;;  %1963 = vmatprep.mubr.msk.f32.mxu1 %vm2213_vm1, %v2212_v1  ;;  %v1125_v0 = vld [vmem:[%s2261_s19 + $0x49] sm:$0xff]  ;;  %v1805_v2 = vld [vmem:[%s2261_s19 + $0x61] sm:$0xff]  ;;  %v1807_v5 = vld [vmem:[%s2261_s19 + $0x71] sm:$0xff] }
  0x24   : > { %1989 = vmatprep.mubr.msk.f32.mxu0 %vm2213_vm1, %v2212_v1  ;;  %2074 = vmatprep.subr.mxu1 %v2212_v1  ;;  %v1806_v3 = vld [vmem:[%s2261_s19 + $0x69] sm:$0xff]  ;;  %v1438_v6 = vld [vmem:[%s2261_s19 + $0x12] sm:$0xff]  ;;  %v1439_v8 = vld [vmem:[%s2261_s19 + $0x1a] sm:$0xff] }
  0x25   : > { %v1437_v4 = vld [vmem:[%s2261_s19 + $0xa] sm:$0xff]  ;;  %v1808_v7 = vld [vmem:[%s2261_s19 + $0x79] sm:$0xff]  ;;  %v1809_v9 = vld [vmem:[%s2261_s19 + $0x81] sm:$0xff] }
  0x26   : > { %1964 = vmatmul.mubr.msk.f32.gmra.mrb[10].mxu1 %vm193_vm2, %v172_v15  ;;  %1990 = vmatmul.mubr.msk.f32.vlgmr.msra.gmra.mrb[10].mxu0 %vm193_vm2, %v475_v16  ;;  %v1440_v10 = vld [vmem:[%s2261_s19 + $0x22] sm:$0xff]  ;;  %v1441_v12 = vld [vmem:[%s2261_s19 + $0x2a] sm:$0xff]  ;;  %v1442_v14 = vld [vmem:[%s2261_s19 + $0x32] sm:$0xff] }
  0x27   : > { %2046 = vmatpush3.msk.msra.mxu0 %vm221_vm0, %v1763_v17  ;;  %1966 = vmatprep.mubr.msk.f32.mxu1 %vm2213_vm1, %v2212_v1  ;;  %v1810_v11 = vld [vmem:[%s2261_s19 + $0x89] sm:$0xff]  ;;  %v1811_v13 = vld [vmem:[%s2261_s19 + $0x91] sm:$0xff]  ;;  %v1812_v15 = vld [vmem:[%s2261_s19 + $0x99] sm:$0xff] }
  0x28   : > { %1992 = vmatprep.mubr.msk.f32.mxu0 %vm2213_vm1, %v2212_v1  ;;  %2103 = vmatprep.subr.mxu0 %v2212_v1  ;;  %v1443_v16 = vld [vmem:[%s2261_s19 + $0x3a] sm:$0xff] }
  0x29   : > { %v1813_v17 = vld [vmem:[%s2261_s19 + $0xa1] sm:$0xff] }
  0x2a   : > { %1967 = vmatmul.mubr.msk.f32.gmra.mrb[12].mxu1 %vm193_vm2, %v173_v18  ;;  %1993 = vmatmul.mubr.msk.f32.gmra.mrb[12].mxu0 %vm193_vm2, %v2330_v19  ;;  %v1444_v18 = vld [vmem:[%s2261_s19 + $0x42] sm:$0xff] }
  0x2b   : > { %1969 = vmatprep.mubr.msk.f32.mxu1 %vm2213_vm1, %v2212_v1  ;;  %1995 = vmatprep.mubr.msk.f32.mxu0 %vm2213_vm1, %v2212_v1 }
  0x2e   : > { %1970 = vmatmul.mubr.msk.f32.gmra.mrb[14].mxu1 %vm193_vm2, %v174_v20  ;;  %1996 = vmatmul.mubr.msk.f32.gmra.mrb[14].mxu0 %vm193_vm2, %v2344_v21 }
  0x2f   : > { %1972 = vmatprep.mubr.msk.f32.mxu1 %vm2213_vm1, %v2212_v1  ;;  %1998 = vmatprep.mubr.msk.f32.mxu0 %vm2213_vm1, %v2212_v1 }
  0x32   : > { %1973 = vmatmul.mubr.msk.f32.gmra.mrb[16].mxu1 %vm193_vm2, %v175_v22  ;;  %1999 = vmatmul.mubr.msk.f32.gmra.mrb[16].mxu0 %vm193_vm2, %v2355_v23 }
  0x33   : > { %1975 = vmatprep.mubr.msk.f32.mxu1 %vm2213_vm1, %v2212_v1  ;;  %2001 = vmatprep.mubr.msk.f32.mxu0 %vm2213_vm1, %v2212_v1 }
  0x36   : > { %1976 = vmatmul.mubr.msk.f32.gmra.mrb[18].mxu1 %vm193_vm2, %v176_v24  ;;  %2002 = vmatmul.mubr.msk.f32.gmra.mrb[18].mxu0 %vm193_vm2, %v2366_v25 }
  0x37   : > { %1978 = vmatprep.mubr.msk.f32.mxu1 %vm2213_vm1, %v2212_v1  ;;  %2004 = vmatprep.mubr.msk.f32.mxu0 %vm2213_vm1, %v2212_v1 }
  0x3a   : > { %1979 = vmatmul.mubr.msk.f32.gmra.mrb[20].mxu1 %vm193_vm2, %v177_v26  ;;  %2005 = vmatmul.mubr.msk.f32.gmra.mrb[20].mxu0 %vm193_vm2, %v2377_v27 }
  0x3b   : > { %1981 = vmatprep.mubr.msk.f32.mxu1 %vm2213_vm1, %v2212_v1  ;;  %2007 = vmatprep.mubr.msk.f32.mxu0 %vm2213_vm1, %v2212_v1 }
  0x3e   : > { %1982 = vmatmul.mubr.msk.f32.gmra.mrb[22].mxu1 %vm193_vm2, %v178_v28  ;;  %2008 = vmatmul.mubr.msk.f32.gmra.mrb[22].mxu0 %vm193_vm2, %v2388_v29 }
  0x3f   : > { %1984 = vmatprep.mubr.msk.f32.mxu1 %vm2213_vm1, %v2212_v1  ;;  %2010 = vmatprep.mubr.msk.f32.mxu0 %vm2213_vm1, %v2212_v1 }
  0x42   : > { %1985 = vmatmul.mubr.msk.f32.gmra.mrb[24].mxu1 %vm193_vm2, %v179_v30  ;;  %2011 = vmatmul.mubr.msk.f32.gmra.mrb[24].mxu0 %vm193_vm2, %v2399_v31 }
  0x43   : > { %2013 = vmatprep.mubr.msk.f32.mxu0 %vm2213_vm1, %v2212_v1  ;;  %2018 = vmatprep.mubr.msk.f32.mxu1 %vm2213_vm1, %v2212_v1 }
  0x46   : > { %2014 = vmatmul.mubr.msk.f32.gmra.mrb[26].mxu0 %vm193_vm2, %v2409_v32  ;;  %2019 = vmatmul.mubr.msk.f32.vlgmr.msra.gmra.mrb[26].mxu1 %vm193_vm2, %v1734_v33 }
  0x47   : > { %2075 = vmatpush3.msk.msra.mxu1 %vm221_vm0, %v1783_v34  ;;  %2021 = vmatprep.mubr.msk.f32.mxu1 %vm2213_vm1, %v2212_v1 }
  0x48   : > { %2047 = vmatprep.mubr.msk.f32.mxu0 %vm2213_vm1, %v2212_v1  ;;  %2132 = vmatprep.subr.mxu1 %v2212_v1 }
  0x4a   : > { %2022 = vmatmul.mubr.msk.f32.gmra.mrb[28].mxu1 %vm193_vm2, %v1735_v35  ;;  %2048 = vmatmul.mubr.msk.f32.vlgmr.msra.gmra.mrb[28].mxu0 %vm193_vm2, %v1754_v36 }
  0x4b   : > { %2104 = vmatpush3.msk.msra.mxu0 %vm221_vm0, %v1794_v37  ;;  %2024 = vmatprep.mubr.msk.f32.mxu1 %vm2213_vm1, %v2212_v1 }
  0x4c   : > { %2050 = vmatprep.mubr.msk.f32.mxu0 %vm2213_vm1, %v2212_v1  ;;  %2161 = vmatprep.subr.mxu0 %v2212_v1 }
  0x4e   : > { %2025 = vmatmul.mubr.msk.f32.gmra.mrb[30].mxu1 %vm193_vm2, %v1736_v38  ;;  %2051 = vmatmul.mubr.msk.f32.gmra.mrb[30].mxu0 %vm193_vm2, %v1755_v39 }
  0x4f   : > { %2027 = vmatprep.mubr.msk.f32.mxu1 %vm2213_vm1, %v2212_v1  ;;  %2053 = vmatprep.mubr.msk.f32.mxu0 %vm2213_vm1, %v2212_v1 }
  0x52   : > { %2028 = vmatmul.mubr.msk.f32.gmra.mrb[32].mxu1 %vm193_vm2, %v1737_v40  ;;  %2054 = vmatmul.mubr.msk.f32.gmra.mrb[32].mxu0 %vm193_vm2, %v1756_v41 }
  0x53   : > { %2030 = vmatprep.mubr.msk.f32.mxu1 %vm2213_vm1, %v2212_v1  ;;  %2056 = vmatprep.mubr.msk.f32.mxu0 %vm2213_vm1, %v2212_v1 }
  0x56   : > { %2031 = vmatmul.mubr.msk.f32.gmra.mrb[34].mxu1 %vm193_vm2, %v1738_v42  ;;  %2057 = vmatmul.mubr.msk.f32.gmra.mrb[34].mxu0 %vm193_vm2, %v1757_v43 }
  0x57   : > { %2033 = vmatprep.mubr.msk.f32.mxu1 %vm2213_vm1, %v2212_v1  ;;  %2059 = vmatprep.mubr.msk.f32.mxu0 %vm2213_vm1, %v2212_v1 }
  0x5a   : > { %2034 = vmatmul.mubr.msk.f32.gmra.mrb[36].mxu1 %vm193_vm2, %v1739_v44  ;;  %2060 = vmatmul.mubr.msk.f32.gmra.mrb[36].mxu0 %vm193_vm2, %v1758_v45 }
  0x5b   : > { %2036 = vmatprep.mubr.msk.f32.mxu1 %vm2213_vm1, %v2212_v1  ;;  %2062 = vmatprep.mubr.msk.f32.mxu0 %vm2213_vm1, %v2212_v1 }
  0x5e   : > { %2037 = vmatmul.mubr.msk.f32.gmra.mrb[38].mxu1 %vm193_vm2, %v1740_v46  ;;  %2063 = vmatmul.mubr.msk.f32.gmra.mrb[38].mxu0 %vm193_vm2, %v1759_v47 }
  0x5f   : > { %2039 = vmatprep.mubr.msk.f32.mxu1 %vm2213_vm1, %v2212_v1  ;;  %2065 = vmatprep.mubr.msk.f32.mxu0 %vm2213_vm1, %v2212_v1 }
  0x62   : > { %2040 = vmatmul.mubr.msk.f32.gmra.mrb[40].mxu1 %vm193_vm2, %v1741_v48  ;;  %2066 = vmatmul.mubr.msk.f32.gmra.mrb[40].mxu0 %vm193_vm2, %v1760_v49 }
  0x63   : > { %2042 = vmatprep.mubr.msk.f32.mxu1 %vm2213_vm1, %v2212_v1  ;;  %2068 = vmatprep.mubr.msk.f32.mxu0 %vm2213_vm1, %v2212_v1 }
  0x66   : > { %2043 = vmatmul.mubr.msk.f32.gmra.mrb[42].mxu1 %vm193_vm2, %v1742_v50  ;;  %2069 = vmatmul.mubr.msk.f32.gmra.mrb[42].mxu0 %vm193_vm2, %v1761_v51 }
  0x67   : > { %2071 = vmatprep.mubr.msk.f32.mxu0 %vm2213_vm1, %v2212_v1  ;;  %2076 = vmatprep.mubr.msk.f32.mxu1 %vm2213_vm1, %v2212_v1 }
  0x6a   : > { %2072 = vmatmul.mubr.msk.f32.gmra.mrb[44].mxu0 %vm193_vm2, %v1762_v52  ;;  %2077 = vmatmul.mubr.msk.f32.vlgmr.msra.gmra.mrb[44].mxu1 %vm193_vm2, %v1774_v53 }
  0x6b   : > { %2133 = vmatpush3.msk.msra.mxu1 %vm221_vm0, %v1814_v54  ;;  %2079 = vmatprep.mubr.msk.f32.mxu1 %vm2213_vm1, %v2212_v1 }
  0x6c   : > { %2105 = vmatprep.mubr.msk.f32.mxu0 %vm2213_vm1, %v2212_v1 }
  0x6e   : > { %2080 = vmatmul.mubr.msk.f32.gmra.mrb[46].mxu1 %vm193_vm2, %v1775_v55  ;;  %2106 = vmatmul.mubr.msk.f32.vlgmr.msra.gmra.mrb[46].mxu0 %vm193_vm2, %v2330_v19  ;;  %v1445_v19 = vld [vmem:[%s2261_s19 + $0x4a] sm:$0xff] }
  0x6f   : > { %2162 = vmatpush3.msk.msra.mxu0 %vm221_vm0, %v1825_v56  ;;  %2082 = vmatprep.mubr.msk.f32.mxu1 %vm2213_vm1, %v2212_v1 }
  0x70   : > { %2108 = vmatprep.mubr.msk.f32.mxu0 %vm2213_vm1, %v2212_v1 }
  0x72   : > { %2083 = vmatmul.mubr.msk.f32.gmra.mrb[48].mxu1 %vm193_vm2, %v1776_v57  ;;  %2109 = vmatmul.mubr.msk.f32.gmra.mrb[48].mxu0 %vm193_vm2, %v2344_v21 }
  0x73   : > { %2085 = vmatprep.mubr.msk.f32.mxu1 %vm2213_vm1, %v2212_v1  ;;  %2111 = vmatprep.mubr.msk.f32.mxu0 %vm2213_vm1, %v2212_v1 }
  0x76   : > { %2086 = vmatmul.mubr.msk.f32.gmra.mrb[50].mxu1 %vm193_vm2, %v1777_v58  ;;  %2112 = vmatmul.mubr.msk.f32.gmra.mrb[50].mxu0 %vm193_vm2, %v2355_v23 }
  0x77   : > { %2088 = vmatprep.mubr.msk.f32.mxu1 %vm2213_vm1, %v2212_v1  ;;  %2114 = vmatprep.mubr.msk.f32.mxu0 %vm2213_vm1, %v2212_v1 }
  0x7a   : > { %2089 = vmatmul.mubr.msk.f32.gmra.mrb[52].mxu1 %vm193_vm2, %v1778_v59  ;;  %2115 = vmatmul.mubr.msk.f32.gmra.mrb[52].mxu0 %vm193_vm2, %v2366_v25 }
  0x7b   : > { %2091 = vmatprep.mubr.msk.f32.mxu1 %vm2213_vm1, %v2212_v1  ;;  %2117 = vmatprep.mubr.msk.f32.mxu0 %vm2213_vm1, %v2212_v1 }
  0x7e   : > { %2092 = vmatmul.mubr.msk.f32.gmra.mrb[54].mxu1 %vm193_vm2, %v1779_v60  ;;  %2118 = vmatmul.mubr.msk.f32.gmra.mrb[54].mxu0 %vm193_vm2, %v2377_v27 }
  0x7f   : > { %2094 = vmatprep.mubr.msk.f32.mxu1 %vm2213_vm1, %v2212_v1  ;;  %2120 = vmatprep.mubr.msk.f32.mxu0 %vm2213_vm1, %v2212_v1 }
  0x82   : > { %2095 = vmatmul.mubr.msk.f32.gmra.mrb[56].mxu1 %vm193_vm2, %v1780_v61  ;;  %2121 = vmatmul.mubr.msk.f32.gmra.mrb[56].mxu0 %vm193_vm2, %v2388_v29 }
  0x83   : > { %2097 = vmatprep.mubr.msk.f32.mxu1 %vm2213_vm1, %v2212_v1  ;;  %2123 = vmatprep.mubr.msk.f32.mxu0 %vm2213_vm1, %v2212_v1 }
  0x86   : > { %2098 = vmatmul.mubr.msk.f32.gmra.mrb[58].mxu1 %vm193_vm2, %v1781_v62  ;;  %2124 = vmatmul.mubr.msk.f32.gmra.mrb[58].mxu0 %vm193_vm2, %v2399_v31 }
  0x87   : > { %2100 = vmatprep.mubr.msk.f32.mxu1 %vm2213_vm1, %v2212_v1  ;;  %2126 = vmatprep.mubr.msk.f32.mxu0 %vm2213_vm1, %v2212_v1 }
  0x8a   : > { %2101 = vmatmul.mubr.msk.f32.gmra.mrb[60].mxu1 %vm193_vm2, %v1782_v63  ;;  %2127 = vmatmul.mubr.msk.f32.gmra.mrb[60].mxu0 %vm193_vm2, %v2409_v32 }
  0x8b   : > { %2129 = vmatprep.mubr.msk.f32.mxu0 %vm2213_vm1, %v2212_v1  ;;  %2134 = vmatprep.mubr.msk.f32.mxu1 %vm2213_vm1, %v2212_v1 }
  0x8e   : > { %2130 = vmatmul.mubr.msk.f32.gmra.mrb[62].mxu0 %vm193_vm2, %v1125_v0  ;;  %2135 = vmatmul.mubr.msk.f32.vlgmr.msra.gmra.mrb[62].mxu1 %vm193_vm2, %v1805_v2 }
  0x8f   : > { %2137 = vmatprep.mubr.msk.f32.mxu1 %vm2213_vm1, %v2212_v1  ;;  %2163 = vmatprep.mubr.msk.f32.mxu0 %vm2213_vm1, %v2212_v1 }
  0x92   : > { %2138 = vmatmul.mubr.msk.f32.gmra.mrb[64].mxu1 %vm193_vm2, %v1806_v3  ;;  %2164 = vmatmul.mubr.msk.f32.vlgmr.msra.gmra.mrb[64].mxu0 %vm193_vm2, %v1437_v4 }
  0x93   : > { %2140 = vmatprep.mubr.msk.f32.mxu1 %vm2213_vm1, %v2212_v1  ;;  %2166 = vmatprep.mubr.msk.f32.mxu0 %vm2213_vm1, %v2212_v1 }
  0x96   : > { %2141 = vmatmul.mubr.msk.f32.gmra.mrb[66].mxu1 %vm193_vm2, %v1807_v5  ;;  %2167 = vmatmul.mubr.msk.f32.gmra.mrb[66].mxu0 %vm193_vm2, %v1438_v6 }
  0x97   : > { %2143 = vmatprep.mubr.msk.f32.mxu1 %vm2213_vm1, %v2212_v1  ;;  %2169 = vmatprep.mubr.msk.f32.mxu0 %vm2213_vm1, %v2212_v1 }
  0x9a   : > { %2144 = vmatmul.mubr.msk.f32.gmra.mrb[68].mxu1 %vm193_vm2, %v1808_v7  ;;  %2170 = vmatmul.mubr.msk.f32.gmra.mrb[68].mxu0 %vm193_vm2, %v1439_v8 }
  0x9b   : > { %2146 = vmatprep.mubr.msk.f32.mxu1 %vm2213_vm1, %v2212_v1  ;;  %2172 = vmatprep.mubr.msk.f32.mxu0 %vm2213_vm1, %v2212_v1 }
  0x9e   : > { %2147 = vmatmul.mubr.msk.f32.gmra.mrb[70].mxu1 %vm193_vm2, %v1809_v9  ;;  %2173 = vmatmul.mubr.msk.f32.gmra.mrb[70].mxu0 %vm193_vm2, %v1440_v10 }
  0x9f   : > { %2149 = vmatprep.mubr.msk.f32.mxu1 %vm2213_vm1, %v2212_v1  ;;  %2175 = vmatprep.mubr.msk.f32.mxu0 %vm2213_vm1, %v2212_v1 }
  0xa2   : > { %2150 = vmatmul.mubr.msk.f32.gmra.mrb[72].mxu1 %vm193_vm2, %v1810_v11  ;;  %2176 = vmatmul.mubr.msk.f32.gmra.mrb[72].mxu0 %vm193_vm2, %v1441_v12 }
  0xa3   : > { %2152 = vmatprep.mubr.msk.f32.mxu1 %vm2213_vm1, %v2212_v1  ;;  %2178 = vmatprep.mubr.msk.f32.mxu0 %vm2213_vm1, %v2212_v1 }
  0xa6   : > { %2153 = vmatmul.mubr.msk.f32.gmra.mrb[74].mxu1 %vm193_vm2, %v1811_v13  ;;  %2179 = vmatmul.mubr.msk.f32.gmra.mrb[74].mxu0 %vm193_vm2, %v1442_v14 }
  0xa7   : > { %2155 = vmatprep.mubr.msk.f32.mxu1 %vm2213_vm1, %v2212_v1  ;;  %2181 = vmatprep.mubr.msk.f32.mxu0 %vm2213_vm1, %v2212_v1 }
  0xaa   : > { %2156 = vmatmul.mubr.msk.f32.gmra.mrb[76].mxu1 %vm193_vm2, %v1812_v15  ;;  %2182 = vmatmul.mubr.msk.f32.gmra.mrb[76].mxu0 %vm193_vm2, %v1443_v16 }
  0xab   : > { %2158 = vmatprep.mubr.msk.f32.mxu1 %vm2213_vm1, %v2212_v1  ;;  %2184 = vmatprep.mubr.msk.f32.mxu0 %vm2213_vm1, %v2212_v1 }
  0xae   : > { %2159 = vmatmul.mubr.msk.f32.gmra.mrb[78].mxu1 %vm193_vm2, %v1813_v17  ;;  %2185 = vmatmul.mubr.msk.f32.gmra.mrb[78].mxu0 %vm193_vm2, %v1444_v18 }
  0xaf   : > { %2187 = vmatprep.mubr.msk.f32.mxu0 %vm2213_vm1, %v2212_v1 }
  0xb2   : > { %2188 = vmatmul.mubr.msk.f32.gmra.mrb[80].mxu0 %vm193_vm2, %v1445_v19 }
  0xe5   : > { %v291_v20 = vpop.f32.mrb[0].mxu0  ;;  %v316_v21 = vpop.f32.mrb[0].mxu1 }
  0xe6   : > { %v1933_v22 = vpop.f32.mrb[1].mxu0  ;;  %v1948_v23 = vpop.f32.mrb[1].mxu1 }
  0xe9   : > { %v296_v24 = vpop.f32.mrb[2].mxu0  ;;  %v321_v25 = vpop.f32.mrb[2].mxu1 }
  0xea   : > { %v1936_v26 = vpop.f32.mrb[3].mxu0  ;;  %v1951_v27 = vpop.f32.mrb[3].mxu1 }
  0xed   : > { %v301_v28 = vpop.f32.mrb[4].mxu0  ;;  %v326_v29 = vpop.f32.mrb[4].mxu1 }
  0xee   : > { %v1939_v30 = vpop.f32.mrb[5].mxu0  ;;  %v1954_v31 = vpop.f32.mrb[5].mxu1 }
  0xf1   : > { %v306_v32 = vpop.f32.mrb[6].mxu0  ;;  %v331_v33 = vpop.f32.mrb[6].mxu1 }
  0xf2   : > { %v1942_v34 = vpop.f32.mrb[7].mxu0  ;;  %v1957_v35 = vpop.f32.mrb[7].mxu1 }
  0xf5   : > { %v311_v1 = vpop.f32.mrb[8].mxu0  ;;  %v431_v36 = vpop.f32.mrb[8].mxu1 }
  0xf6   : > { %v432_v37 = vadd.f32 %v431_v36, %v291_v20  ;;  %v1945_v38 = vpop.f32.mrb[9].mxu0  ;;  %v1962_v39 = vpop.f32.mrb[9].mxu1 }
  0xf9   : > { %v436_v40 = vpop.f32.mrb[10].mxu1  ;;  %v582_v41 = vpop.f32.mrb[10].mxu0 }
  0xfa   : > { %v437_v42 = vadd.f32 %v436_v40, %v296_v24  ;;  %v626_v43 = vadd.f32 %v582_v41, %v432_v37  ;;  %v1991_v44 = vpop.f32.mrb[11].mxu0  ;;  %v1965_v45 = vpop.f32.mrb[11].mxu1 }
  0xfd   : > { %v441_v46 = vpop.f32.mrb[12].mxu1  ;;  %v587_v47 = vpop.f32.mrb[12].mxu0 }
  0xfe   : > { %v442_v48 = vadd.f32 %v441_v46, %v301_v28  ;;  %v627_v49 = vadd.f32 %v587_v47, %v437_v42  ;;  %v1994_v50 = vpop.f32.mrb[13].mxu0  ;;  %v1968_v51 = vpop.f32.mrb[13].mxu1 }
 0x101   : > { %v446_v52 = vpop.f32.mrb[14].mxu1  ;;  %v592_v53 = vpop.f32.mrb[14].mxu0 }
 0x102   : > { %v447_v54 = vadd.f32 %v446_v52, %v306_v32  ;;  %v628_v55 = vadd.f32 %v592_v53, %v442_v48  ;;  %v1997_v56 = vpop.f32.mrb[15].mxu0  ;;  %v1971_v57 = vpop.f32.mrb[15].mxu1 }
 0x105   : > { %v451_v58 = vpop.f32.mrb[16].mxu1  ;;  %v597_v59 = vpop.f32.mrb[16].mxu0 }
 0x106   : > { %v452_v60 = vadd.f32 %v451_v58, %v311_v1  ;;  %v629_v61 = vadd.f32 %v597_v59, %v447_v54  ;;  %v2000_v62 = vpop.f32.mrb[17].mxu0  ;;  %v1974_v63 = vpop.f32.mrb[17].mxu1 }
 0x109   : > { %v456_v0 = vpop.f32.mrb[18].mxu1  ;;  %v602_v2 = vpop.f32.mrb[18].mxu0 }
 0x10a   : > { %v457_v3 = vadd.f32 %v456_v0, %v316_v21  ;;  %v630_v4 = vadd.f32 %v602_v2, %v452_v60  ;;  %v2003_v5 = vpop.f32.mrb[19].mxu0  ;;  %v1977_v6 = vpop.f32.mrb[19].mxu1 }
 0x10d   : > { %v461_v7 = vpop.f32.mrb[20].mxu1  ;;  %v607_v8 = vpop.f32.mrb[20].mxu0 }
 0x10e   : > { %v462_v9 = vadd.f32 %v461_v7, %v321_v25  ;;  %v631_v10 = vadd.f32 %v607_v8, %v457_v3  ;;  %v2006_v11 = vpop.f32.mrb[21].mxu0  ;;  %v1980_v12 = vpop.f32.mrb[21].mxu1 }
 0x111   : > { %v466_v13 = vpop.f32.mrb[22].mxu1  ;;  %v612_v14 = vpop.f32.mrb[22].mxu0 }
 0x112   : > { %v467_v15 = vadd.f32 %v466_v13, %v326_v29  ;;  %v632_v16 = vadd.f32 %v612_v14, %v462_v9  ;;  %v2009_v17 = vpop.f32.mrb[23].mxu0  ;;  %v1983_v18 = vpop.f32.mrb[23].mxu1 }
 0x115   : > { %v471_v19 = vpop.f32.mrb[24].mxu1  ;;  %v617_v20 = vpop.f32.mrb[24].mxu0 }
 0x116   : > { %v472_v22 = vadd.f32 %v471_v19, %v331_v33  ;;  %v633_v23 = vadd.f32 %v617_v20, %v467_v15  ;;  %v2012_v21 = vpop.f32.mrb[25].mxu0  ;;  %v1986_v24 = vpop.f32.mrb[25].mxu1 }
 0x119   : > { %v622_v26 = vpop.f32.mrb[26].mxu0  ;;  %v743_v27 = vpop.f32.mrb[26].mxu1 }
 0x11a   : > { %v634_v28 = vadd.f32 %v622_v26, %v472_v22  ;;  %v787_v30 = vadd.f32 %v743_v27, %v626_v43  ;;  %v2015_v25 = vpop.f32.mrb[27].mxu0  ;;  %v2020_v31 = vpop.f32.mrb[27].mxu1 }
 0x11d   : > { %v748_v32 = vpop.f32.mrb[28].mxu1  ;;  %v904_v34 = vpop.f32.mrb[28].mxu0 }
 0x11e   : > { %v788_v35 = vadd.f32 %v748_v32, %v627_v49  ;;  %v948_v1 = vadd.f32 %v904_v34, %v787_v30  ;;  %v2049_v29 = vpop.f32.mrb[29].mxu0  ;;  %v2023_v36 = vpop.f32.mrb[29].mxu1 }
 0x121   : > { %v753_v37 = vpop.f32.mrb[30].mxu1  ;;  %v909_v38 = vpop.f32.mrb[30].mxu0 }
 0x122   : > { %v789_v39 = vadd.f32 %v753_v37, %v628_v55  ;;  %v949_v40 = vadd.f32 %v909_v38, %v788_v35  ;;  %v2052_v33 = vpop.f32.mrb[31].mxu0  ;;  %v2026_v41 = vpop.f32.mrb[31].mxu1 }
 0x125   : > { %v758_v42 = vpop.f32.mrb[32].mxu1  ;;  %v914_v44 = vpop.f32.mrb[32].mxu0 }
 0x126   : > { %v790_v45 = vadd.f32 %v758_v42, %v629_v61  ;;  %v950_v46 = vadd.f32 %v914_v44, %v789_v39  ;;  %v2055_v47 = vpop.f32.mrb[33].mxu0  ;;  %v2029_v43 = vpop.f32.mrb[33].mxu1 }
 0x129   : > { %v763_v48 = vpop.f32.mrb[34].mxu1  ;;  %v919_v50 = vpop.f32.mrb[34].mxu0 }
 0x12a   : > { %v791_v51 = vadd.f32 %v763_v48, %v630_v4  ;;  %v951_v52 = vadd.f32 %v919_v50, %v790_v45  ;;  %v2058_v49 = vpop.f32.mrb[35].mxu0  ;;  %v2032_v53 = vpop.f32.mrb[35].mxu1 }
 0x12d   : > { %v768_v54 = vpop.f32.mrb[36].mxu1  ;;  %v924_v56 = vpop.f32.mrb[36].mxu0 }
 0x12e   : > { %v792_v57 = vadd.f32 %v768_v54, %v631_v10  ;;  %v952_v58 = vadd.f32 %v924_v56, %v791_v51  ;;  %v2061_v55 = vpop.f32.mrb[37].mxu0  ;;  %v2035_v59 = vpop.f32.mrb[37].mxu1 }
 0x131   : > { %v773_v60 = vpop.f32.mrb[38].mxu1  ;;  %v929_v62 = vpop.f32.mrb[38].mxu0 }
 0x132   : > { %v793_v63 = vadd.f32 %v773_v60, %v632_v16  ;;  %v953_v0 = vadd.f32 %v929_v62, %v792_v57  ;;  %v2064_v61 = vpop.f32.mrb[39].mxu0  ;;  %v2038_v2 = vpop.f32.mrb[39].mxu1 }
 0x135   : > { %v778_v3 = vpop.f32.mrb[40].mxu1  ;;  %v934_v5 = vpop.f32.mrb[40].mxu0 }
 0x136   : > { %v794_v6 = vadd.f32 %v778_v3, %v633_v23  ;;  %v954_v7 = vadd.f32 %v934_v5, %v793_v63  ;;  %v2067_v4 = vpop.f32.mrb[41].mxu0  ;;  %v2041_v8 = vpop.f32.mrb[41].mxu1 }
 0x139   : > { %v783_v9 = vpop.f32.mrb[42].mxu1  ;;  %v939_v11 = vpop.f32.mrb[42].mxu0 }
 0x13a   : > { %v795_v12 = vadd.f32 %v783_v9, %v634_v28  ;;  %v955_v13 = vadd.f32 %v939_v11, %v794_v6  ;;  %v2070_v10 = vpop.f32.mrb[43].mxu0  ;;  %v2044_v14 = vpop.f32.mrb[43].mxu1 }
 0x13b   : > { %v2655_v10 = vld [vmem:[%s2688_s2] ss:$0 sm:$0xff] }
 0x13d   : > { %v944_v15 = vpop.f32.mrb[44].mxu0  ;;  %v1064_v17 = vpop.f32.mrb[44].mxu1 }
 0x13e   : > { %v956_v18 = vadd.f32 %v944_v15, %v795_v12  ;;  %v1108_v19 = vadd.f32 %v1064_v17, %v948_v1  ;;  %v2073_v16 = vpop.f32.mrb[45].mxu0  ;;  %v2078_v20 = vpop.f32.mrb[45].mxu1 }
 0x141   : > { %v1069_v22 = vpop.f32.mrb[46].mxu1  ;;  %v1224_v21 = vpop.f32.mrb[46].mxu0 }
 0x142   : > { %v1109_v24 = vadd.f32 %v1069_v22, %v949_v40  ;;  %v1268_v26 = vadd.f32 %v1224_v21, %v1108_v19  ;;  %v2107_v23 = vpop.f32.mrb[47].mxu0  ;;  %v2081_v27 = vpop.f32.mrb[47].mxu1 }
 0x145   : > { %v1074_v30 = vpop.f32.mrb[48].mxu1  ;;  %v1229_v25 = vpop.f32.mrb[48].mxu0 }
 0x146   : > { %v1110_v31 = vadd.f32 %v1074_v30, %v950_v46  ;;  %v1269_v32 = vadd.f32 %v1229_v25, %v1109_v24  ;;  %v2110_v28 = vpop.f32.mrb[49].mxu0  ;;  %v2084_v34 = vpop.f32.mrb[49].mxu1 }
 0x149   : > { %v1079_v35 = vpop.f32.mrb[50].mxu1  ;;  %v1234_v29 = vpop.f32.mrb[50].mxu0 }
 0x14a   : > { %v1111_v36 = vadd.f32 %v1079_v35, %v951_v52  ;;  %v1270_v37 = vadd.f32 %v1234_v29, %v1110_v31  ;;  %v2113_v38 = vpop.f32.mrb[51].mxu0  ;;  %v2087_v1 = vpop.f32.mrb[51].mxu1 }
 0x14d   : > { %v1084_v39 = vpop.f32.mrb[52].mxu1  ;;  %v1239_v33 = vpop.f32.mrb[52].mxu0 }
 0x14e   : > { %v1112_v41 = vadd.f32 %v1084_v39, %v952_v58  ;;  %v1271_v42 = vadd.f32 %v1239_v33, %v1111_v36  ;;  %v2116_v40 = vpop.f32.mrb[53].mxu0  ;;  %v2090_v44 = vpop.f32.mrb[53].mxu1 }
 0x151   : > { %v1089_v45 = vpop.f32.mrb[54].mxu1  ;;  %v1244_v47 = vpop.f32.mrb[54].mxu0 }
 0x152   : > { %v1113_v43 = vadd.f32 %v1089_v45, %v953_v0  ;;  %v1272_v48 = vadd.f32 %v1244_v47, %v1112_v41  ;;  %v2119_v46 = vpop.f32.mrb[55].mxu0  ;;  %v2093_v50 = vpop.f32.mrb[55].mxu1 }
 0x155   : > { %v1094_v51 = vpop.f32.mrb[56].mxu1  ;;  %v1249_v49 = vpop.f32.mrb[56].mxu0 }
 0x156   : > { %v1114_v53 = vadd.f32 %v1094_v51, %v954_v7  ;;  %v1273_v54 = vadd.f32 %v1249_v49, %v1113_v43  ;;  %v2122_v52 = vpop.f32.mrb[57].mxu0  ;;  %v2096_v56 = vpop.f32.mrb[57].mxu1 }
 0x159   : > { %v1099_v57 = vpop.f32.mrb[58].mxu1  ;;  %v1254_v55 = vpop.f32.mrb[58].mxu0 }
 0x15a   : > { %v1115_v59 = vadd.f32 %v1099_v57, %v955_v13  ;;  %v2645_v60 = vadd.f32 %v1254_v55, %v1114_v53  ;;  %v2125_v58 = vpop.f32.mrb[59].mxu0  ;;  %v2099_v62 = vpop.f32.mrb[59].mxu1 }
 0x15d   : > { %v1104_v63 = vpop.f32.mrb[60].mxu1  ;;  %v1259_v61 = vpop.f32.mrb[60].mxu0 }
 0x15e   : > { %v1116_v0 = vadd.f32 %v1104_v63, %v956_v18  ;;  %v2647_v2 = vadd.f32 %v1259_v61, %v1115_v59  ;;  %v2128_v3 = vpop.f32.mrb[61].mxu0  ;;  %v2102_v5 = vpop.f32.mrb[61].mxu1 }
 0x161   : > { %v1264_v6 = vpop.f32.mrb[62].mxu0  ;;  %v1384_v7 = vpop.f32.mrb[62].mxu1 }
 0x162   : > { %v2649_v4 = vadd.f32 %v1264_v6, %v1116_v0  ;;  %v1428_v8 = vadd.f32 %v1384_v7, %v1268_v26  ;;  %v2131_v9 = vpop.f32.mrb[63].mxu0  ;;  %v2136_v11 = vpop.f32.mrb[63].mxu1 }
 0x165   : > { %v1389_v12 = vpop.f32.mrb[64].mxu1  ;;  %v1544_v13 = vpop.f32.mrb[64].mxu0 }
 0x166   : > { %v1429_v14 = vadd.f32 %v1389_v12, %v1269_v32  ;;  %v1588_v15 = vadd.f32 %v1544_v13, %v1428_v8  ;;  %v2165_v17 = vpop.f32.mrb[65].mxu0  ;;  %v2139_v18 = vpop.f32.mrb[65].mxu1 }
 0x168   : > { %v1604_v19 = vadd.f32 %v2655_v10, %v1588_v15 }
 0x169   : > { %v1394_v16 = vpop.f32.mrb[66].mxu1  ;;  %v1549_v20 = vpop.f32.mrb[66].mxu0 }
 0x16a   : > { %v1613_v22 = vmax.f32 %v1604_v19, 0.0  ;;  %v1430_v21 = vadd.f32 %v1394_v16, %v1270_v37  ;;  %v1589_v24 = vadd.f32 %v1549_v20, %v1429_v14  ;;  %v2168_v26 = vpop.f32.mrb[67].mxu0  ;;  %v2142_v23 = vpop.f32.mrb[67].mxu1 }
 0x16c   : > { %1622 = vst [vmem:[%s2661_s16] sm:$0xff] %v1613_v22  ;;  %v1605_v27 = vadd.f32 %v2655_v10, %v1589_v24 }
 0x16d   : > { %v1399_v30 = vpop.f32.mrb[68].mxu1  ;;  %v1554_v25 = vpop.f32.mrb[68].mxu0 }
 0x16e   : > { %v1614_v31 = vmax.f32 %v1605_v27, 0.0  ;;  %v1431_v32 = vadd.f32 %v1399_v30, %v1271_v42  ;;  %v1590_v28 = vadd.f32 %v1554_v25, %v1430_v21  ;;  %v2171_v34 = vpop.f32.mrb[69].mxu0  ;;  %v2145_v35 = vpop.f32.mrb[69].mxu1 }
 0x170   : > { %1623 = vst [vmem:[%s2661_s16 + $0x8] sm:$0xff] %v1614_v31  ;;  %v1606_v29 = vadd.f32 %v2655_v10, %v1590_v28 }
 0x171   : > { %v1404_v36 = vpop.f32.mrb[70].mxu1  ;;  %v1559_v37 = vpop.f32.mrb[70].mxu0 }
 0x172   : > { %v1615_v38 = vmax.f32 %v1606_v29, 0.0  ;;  %v1432_v1 = vadd.f32 %v1404_v36, %v1272_v48  ;;  %v1591_v39 = vadd.f32 %v1559_v37, %v1431_v32  ;;  %v2174_v33 = vpop.f32.mrb[71].mxu0  ;;  %v2148_v41 = vpop.f32.mrb[71].mxu1 }
 0x174   : > { %1624 = vst [vmem:[%s2661_s16 + $0x10] sm:$0xff] %v1615_v38  ;;  %v1607_v40 = vadd.f32 %v2655_v10, %v1591_v39 }
 0x175   : > { %v1409_v44 = vpop.f32.mrb[72].mxu1  ;;  %v1564_v42 = vpop.f32.mrb[72].mxu0 }
 0x176   : > { %v1616_v45 = vmax.f32 %v1607_v40, 0.0  ;;  %v1433_v47 = vadd.f32 %v1409_v44, %v1273_v54  ;;  %v1592_v43 = vadd.f32 %v1564_v42, %v1432_v1  ;;  %v2177_v46 = vpop.f32.mrb[73].mxu0  ;;  %v2151_v50 = vpop.f32.mrb[73].mxu1 }
 0x178   : > { %1625 = vst [vmem:[%s2661_s16 + $0x18] sm:$0xff] %v1616_v45  ;;  %v1608_v51 = vadd.f32 %v2655_v10, %v1592_v43 }
 0x179   : > { %v1414_v49 = vpop.f32.mrb[74].mxu1  ;;  %v1569_v48 = vpop.f32.mrb[74].mxu0 }
 0x17a   : > { %v1617_v53 = vmax.f32 %v1608_v51, 0.0  ;;  %v1434_v52 = vadd.f32 %v1414_v49, %v2645_v60  ;;  %v1593_v56 = vadd.f32 %v1569_v48, %v1433_v47  ;;  %v2180_v57 = vpop.f32.mrb[75].mxu0  ;;  %v2154_v55 = vpop.f32.mrb[75].mxu1 }
 0x17c   : > { %1626 = vst [vmem:[%s2661_s16 + $0x20] sm:$0xff] %v1617_v53  ;;  %v1609_v59 = vadd.f32 %v2655_v10, %v1593_v56 }
 0x17d   : > { %v1419_v58 = vpop.f32.mrb[76].mxu1  ;;  %v1574_v54 = vpop.f32.mrb[76].mxu0 }
 0x17e   : > { %v1618_v62 = vmax.f32 %v1609_v59, 0.0  ;;  %v1435_v63 = vadd.f32 %v1419_v58, %v2647_v2  ;;  %v1594_v61 = vadd.f32 %v1574_v54, %v1434_v52  ;;  %v2183_v0 = vpop.f32.mrb[77].mxu0  ;;  %v2157_v3 = vpop.f32.mrb[77].mxu1 }
 0x180   : > { %1627 = vst [vmem:[%s2661_s16 + $0x28] sm:$0xff] %v1618_v62  ;;  %v1610_v5 = vadd.f32 %v2655_v10, %v1594_v61 }
 0x181   : > { %v1424_v60 = vpop.f32.mrb[78].mxu1  ;;  %v1579_v6 = vpop.f32.mrb[78].mxu0 }
 0x182   : > { %v1619_v7 = vmax.f32 %v1610_v5, 0.0  ;;  %v1436_v8 = vadd.f32 %v1424_v60, %v2649_v4  ;;  %v1595_v9 = vadd.f32 %v1579_v6, %v1435_v63  ;;  %v2186_v11 = vpop.f32.mrb[79].mxu0  ;;  %v2160_v12 = vpop.f32.mrb[79].mxu1 }
 0x184   : > { %1628 = vst [vmem:[%s2661_s16 + $0x30] sm:$0xff] %v1619_v7  ;;  %v1611_v13 = vadd.f32 %v2655_v10, %v1595_v9 }
 0x185   : > { %v1584_v2 = vpop.f32.mrb[80].mxu0 }
 0x186   : > { %v1620_v14 = vmax.f32 %v1611_v13, 0.0  ;;  %v1596_v15 = vadd.f32 %v1584_v2, %v1436_v8  ;;  %v2189_v17 = vpop.f32.mrb[81].mxu0 }
 0x188   : > { %1629 = vst [vmem:[%s2661_s16 + $0x38] sm:$0xff] %v1620_v14  ;;  %v1612_v18 = vadd.f32 %v2655_v10, %v1596_v15 }
 0x18a   : > { %v1621_v19 = vmax.f32 %v1612_v18, 0.0 }
 0x18c   : > { %1630 = vst [vmem:[%s2661_s16 + $0x40] sm:$0xff] %v1621_v19 }
 0x18d PF: > { %s13_s12 = sadd.s32 1, %s2210_s12  }
 0x18e   : > { %p10_p4 = scmp.ge.s32.totalorder %s13_s12, 4  }
 0x190   :  { %12 = sbr.rel (!%p10_p4) target bundleno = 1 (0x1), region = 73 }

// kernel: pose_resnet_forward.3
= control target key start
LH: loop header
LB: loop body
LE: loop exit
PB: predicated region body
PF: predicated region fallthrough
CT: control target
= control target key end

     0   :  { %s5694_s18 = smov 0   ;;  %s7062_s0 = inlined_call_operand.vmem [shape: f32[2,102,128], index: 0, kind: input, shape index: {}]   ;;  %s7063_s1 = inlined_call_operand.vmem [shape: f32[4,4,128,128], index: 1, kind: input, shape index: {}]   ;;  %s7064_s2 = inlined_call_operand.vmem [shape: f32[1,128], index: 2, kind: input, shape index: {}]   ;;  %s7065_s3 = inlined_call_operand.vmem [shape: f32[128,128], index: 3, kind: input, shape index: {}]   ;;  %s7066_s4 = inlined_call_operand.vmem [shape: f32[1,128], index: 4, kind: input, shape index: {}]   ;;  %s7067_s5 = inlined_call_operand.vmem [shape: f32[2,80,512], index: 5, kind: output, shape index: {}]  }
   0x1 LB: > { %s3153_s19 = sadd.s32 4294967295, %s5662_s18   ;;  %p3157_p0 = scmp.ge.s32.totalorder %s5662_s18, 1  ;;  %s5662_s18 = sphi %s5694_s18, %s15_s18  }
   0x2   : > { %p187_p1 = scmp.lt.s32.totalorder %s5662_s18, 3 }
   0x4   : > { %p188_p2 = pnand %p3157_p0, %p187_p1 }
   0x5   : > { %v3160_v0 = vld [vmem:[%s7063_s1 + $0x80] sm:$0xff] (!%p188_p2)  ;;  %v3161_v1 = vld [vmem:[%s7063_s1 + $0x88] sm:$0xff] (!%p188_p2)  ;;  %v3162_v2 = vld [vmem:[%s7063_s1 + $0x90] sm:$0xff] (!%p188_p2)  ;;  %p215_p3 = scmp.lt.s32.totalorder (!%p188_p2), %s3153_s19, 1 }
   0x6   : > { %191 = sbr.rel (%p188_p2) target bundleno = 1624 (0x658), region = 40  ;;  %v4864_v3 = vpack.c.bf16 (!%p188_p2), %v3161_v1, %v3160_v0  ;;  %v3163_v4 = vld [vmem:[%s7063_s1 + $0x98] sm:$0xff] (!%p188_p2)  ;;  %v3164_v6 = vld [vmem:[%s7063_s1 + $0xa0] sm:$0xff] (!%p188_p2)  ;;  %v3165_v7 = vld [vmem:[%s7063_s1 + $0xa8] sm:$0xff] (!%p188_p2) }
   0x7   : > { %v4868_v5 = vpack.c.bf16 (!%p188_p2), %v3163_v4, %v3162_v2  ;;  %v4872_v8 = vpack.c.bf16 (!%p188_p2), %v3165_v7, %v3164_v6  ;;  %v3166_v9 = vld [vmem:[%s7063_s1 + $0xb0] sm:$0xff] (!%p188_p2)  ;;  %v3167_v10 = vld [vmem:[%s7063_s1 + $0xb8] sm:$0xff] (!%p188_p2)  ;;  %v3168_v13 = vld [vmem:[%s7063_s1 + $0xc0] sm:$0xff] (!%p188_p2) }
   0x8   : > { %4865 = vmatprep.subr.bf16.mxu0 (!%p188_p2), %v4864_v3  ;;  %v4876_v12 = vpack.c.bf16 (!%p188_p2), %v3167_v10, %v3166_v9  ;;  %v3169_v14 = vld [vmem:[%s7063_s1 + $0xc8] sm:$0xff] (!%p188_p2)  ;;  %v3170_v16 = vld [vmem:[%s7063_s1 + $0xd0] sm:$0xff] (!%p188_p2)  ;;  %v3171_v17 = vld [vmem:[%s7063_s1 + $0xd8] sm:$0xff] (!%p188_p2) }
   0x9   : > { %4867 = vmatpush3.bf16.msra.mxu0 (!%p188_p2), %v4864_v3  ;;  %v4880_v15 = vpack.c.bf16 (!%p188_p2), %v3169_v14, %v3168_v13  ;;  %v4884_v18 = vpack.c.bf16 (!%p188_p2), %v3171_v17, %v3170_v16  ;;  %v3172_v19 = vld [vmem:[%s7063_s1 + $0xe0] sm:$0xff] (!%p188_p2)  ;;  %v3173_v20 = vld [vmem:[%s7063_s1 + $0xe8] sm:$0xff] (!%p188_p2)  ;;  %v3174_v22 = vld [vmem:[%s7063_s1 + $0xf0] sm:$0xff] (!%p188_p2) }
   0xa   : > { %4869 = vmatprep.subr.bf16.mxu0 (!%p188_p2), %v4868_v5  ;;  %v4888_v21 = vpack.c.bf16 (!%p188_p2), %v3173_v20, %v3172_v19  ;;  %v3175_v23 = vld [vmem:[%s7063_s1 + $0xf8] sm:$0xff] (!%p188_p2)  ;;  %v315_v25 = vld [vmem:[%s7063_s1] sm:$0xff] (!%p188_p2)  ;;  %v316_v26 = vld [vmem:[%s7063_s1 + $0x8] sm:$0xff] (!%p188_p2) }
   0xb   : > { %v4892_v24 = vpack.c.bf16 (!%p188_p2), %v3175_v23, %v3174_v22  ;;  %v4896_v27 = vpack.c.bf16 (!%p188_p2), %v316_v26, %v315_v25  ;;  %v317_v28 = vld [vmem:[%s7063_s1 + $0x10] sm:$0xff] (!%p188_p2)  ;;  %v318_v29 = vld [vmem:[%s7063_s1 + $0x18] sm:$0xff] (!%p188_p2)  ;;  %v319_v33 = vld [vmem:[%s7063_s1 + $0x20] sm:$0xff] (!%p188_p2) }
   0xc   : > { %v4900_v31 = vpack.c.bf16 (!%p188_p2), %v318_v29, %v317_v28  ;;  %v320_v34 = vld [vmem:[%s7063_s1 + $0x28] sm:$0xff] (!%p188_p2)  ;;  %v227_v35 = vld [vmem:[%s7065_s3] sm:$0xff] (!%p188_p2)  ;;  %v229_v37 = vld [vmem:[%s7065_s3 + $0x10] sm:$0xff] (!%p188_p2) }
   0xd   : > { %s7069_s19 = smov (!%p215_p3, %s3153_s19), 1  ;;  %4871 = vmatpush3.bf16.msra.mxu0 %v4868_v5  ;;  %v228_v36 = vld [vmem:[%s7065_s3 + $0x8] sm:$0xff]  ;;  %v230_v38 = vld [vmem:[%s7065_s3 + $0x18] sm:$0xff]  ;;  %v4904_v41 = vpack.c.bf16 %v320_v34, %v319_v33  ;;  %v321_v42 = vld [vmem:[%s7063_s1 + $0x30] sm:$0xff] }
   0xe   : > { %s5624_s7 = smul.u32 104, %s7069_s19  ;;  %4873 = vmatprep.subr.bf16.mxu0 %v4872_v8  ;;  %v5803_v40 = vpack.c.bf16 %v228_v36, %v227_v35  ;;  %v5811_v44 = vpack.c.bf16 %v230_v38, %v229_v37  ;;  %v322_v45 = vld [vmem:[%s7063_s1 + $0x38] sm:$0xff]  ;;  %v231_v46 = vld [vmem:[%s7065_s3 + $0x20] sm:$0xff]  ;;  %v232_v47 = vld [vmem:[%s7065_s3 + $0x28] sm:$0xff] }
   0xf   : > { %v4908_v49 = vpack.c.bf16 %v322_v45, %v321_v42  ;;  %v323_v50 = vld [vmem:[%s7063_s1 + $0x40] sm:$0xff]  ;;  %v5836_v52 = vpack.c.bf16 %v232_v47, %v231_v46  ;;  %v324_v53 = vld [vmem:[%s7063_s1 + $0x48] sm:$0xff]  ;;  %v233_v54 = vld [vmem:[%s7065_s3 + $0x30] sm:$0xff]  ;;  %s5625_s27 = smul.u32 320, %s7069_s19 }
  0x10   : > { %s5732_s14 = scalar_lea.vmem %s7062_s0, %s5624_s7  ;;  %4993 = vmatprep.subr.bf16.mxu1 %v5803_v40  ;;  %v234_v55 = vld [vmem:[%s7065_s3 + $0x38] sm:$0xff]  ;;  %v4912_v57 = vpack.c.bf16 %v324_v53, %v323_v50  ;;  %v325_v58 = vld [vmem:[%s7063_s1 + $0x50] sm:$0xff]  ;;  %v235_v62 = vld [vmem:[%s7065_s3 + $0x40] sm:$0xff] }
  0x11   : > { %v5735_v11 = vld [vmem:[%s5732_s14 + $0x1] sm:$0xff]  ;;  %4875 = vmatpush3.bf16.msra.mxu0 %v4872_v8  ;;  %v5775_v30 = vld [vmem:[%s5732_s14 + $0x9] sm:$0xff]  ;;  %v5778_v32 = vld [vmem:[%s5732_s14 + $0x11] sm:$0xff]  ;;  %4995 = vmatpush3.bf16.msra.mxu1 %v5803_v40  ;;  %v5860_v60 = vpack.c.bf16 %v234_v55, %v233_v54  ;;  %s6427_s7 = scalar_lea.vmem %s7067_s5, %s5625_s27 }
  0x12   : > { %3956 = vmatprep.mubr.f32.mxu0 %v5735_v11  ;;  %4877 = vmatprep.subr.bf16.mxu0 %v4876_v12  ;;  %v5801_v39 = vld [vmem:[%s5732_s14 + $0x19] sm:$0xff]  ;;  %v5809_v43 = vld [vmem:[%s5732_s14 + $0x21] sm:$0xff]  ;;  %v5827_v48 = vld [vmem:[%s5732_s14 + $0x29] sm:$0xff] }
  0x13   : > { %v5833_v51 = vld [vmem:[%s5732_s14 + $0x31] sm:$0xff]  ;;  %4997 = vmatprep.subr.bf16.mxu1 %v5811_v44  ;;  %v5851_v56 = vld [vmem:[%s5732_s14 + $0x39] sm:$0xff]  ;;  %v5857_v59 = vld [vmem:[%s5732_s14 + $0x41] sm:$0xff] }
  0x14   : > { %v326_v61 = vld [vmem:[%s7063_s1 + $0x58] sm:$0xff]  ;;  %v236_v63 = vld [vmem:[%s7065_s3 + $0x48] sm:$0xff]  ;;  %v243_v2 = vld [vmem:[%s5732_s14] sm:$0xff] }
  0x15   : > { %4879 = vmatpush3.bf16.msra.mxu0 %v4876_v12  ;;  %4999 = vmatpush3.bf16.msra.mxu1 %v5811_v44  ;;  %v5875_v0 = vld [vmem:[%s5732_s14 + $0x49] sm:$0xff]  ;;  %v4916_v1 = vpack.c.bf16 %v326_v61, %v325_v58  ;;  %v5879_v3 = vpack.c.bf16 %v236_v63, %v235_v62  ;;  %v238_v5 = vld [vmem:[%s7065_s3 + $0x58] sm:$0xff]  ;;  %v327_v6 = vld [vmem:[%s7063_s1 + $0x60] sm:$0xff] }
  0x16   : > { %4881 = vmatprep.subr.bf16.mxu0 %v4880_v15  ;;  %5001 = vmatprep.subr.bf16.mxu1 %v5836_v52  ;;  %v237_v4 = vld [vmem:[%s7065_s3 + $0x50] sm:$0xff]  ;;  %v328_v7 = vld [vmem:[%s7063_s1 + $0x68] sm:$0xff]  ;;  %v239_v10 = vld [vmem:[%s7065_s3 + $0x60] sm:$0xff] }
  0x17   : > { %v5895_v8 = vpack.c.bf16 %v238_v5, %v237_v4  ;;  %v4920_v9 = vpack.c.bf16 %v328_v7, %v327_v6  ;;  %v240_v12 = vld [vmem:[%s7065_s3 + $0x68] sm:$0xff]  ;;  %v329_v13 = vld [vmem:[%s7063_s1 + $0x70] sm:$0xff]  ;;  %v330_v14 = vld [vmem:[%s7063_s1 + $0x78] sm:$0xff] }
  0x18   : > { %v4924_v16 = vpack.c.bf16 %v330_v14, %v329_v13  ;;  %v3176_v17 = vld [vmem:[%s7063_s1 + $0x100] sm:$0xff]  ;;  %v3178_v20 = vld [vmem:[%s7063_s1 + $0x110] sm:$0xff]  ;;  %v244_v22 = vld [vmem:[%s5732_s14 + $0x8] sm:$0xff] }
  0x19   : > { %4883 = vmatpush3.bf16.msra.mxu0 %v4880_v15  ;;  %5003 = vmatpush3.bf16.msra.mxu1 %v5836_v52  ;;  %v5912_v15 = vpack.c.bf16 %v240_v12, %v239_v10  ;;  %v3180_v25 = vld [vmem:[%s7063_s1 + $0x120] sm:$0xff]  ;;  %v3181_v26 = vld [vmem:[%s7063_s1 + $0x128] sm:$0xff]  ;;  %v3183_v33 = vld [vmem:[%s7063_s1 + $0x138] sm:$0xff] }
  0x1a   : > { %4885 = vmatprep.subr.bf16.mxu0 %v4884_v18  ;;  %5005 = vmatprep.subr.bf16.mxu1 %v5860_v60  ;;  %v4936_v28 = vpack.c.bf16 %v3181_v26, %v3180_v25  ;;  %v247_v29 = vld [vmem:[%s5732_s14 + $0x20] sm:$0xff]  ;;  %v248_v34 = vld [vmem:[%s5732_s14 + $0x28] sm:$0xff]  ;;  %v249_v36 = vld [vmem:[%s5732_s14 + $0x30] sm:$0xff] }
  0x1b   : > { %v3184_v37 = vld [vmem:[%s7063_s1 + $0x140] sm:$0xff]  ;;  %v3185_v38 = vld [vmem:[%s7063_s1 + $0x148] sm:$0xff]  ;;  %v3186_v46 = vld [vmem:[%s7063_s1 + $0x150] sm:$0xff] }
  0x1c   : > { %v4944_v42 = vpack.c.bf16 %v3185_v38, %v3184_v37  ;;  %v251_v45 = vld [vmem:[%s5732_s14 + $0x40] sm:$0xff]  ;;  %v3187_v47 = vld [vmem:[%s7063_s1 + $0x158] sm:$0xff]  ;;  %v5963_v53 = vld [vmem:[%s5732_s14 + $0xa] sm:$0xff] }
  0x1d   : > { %4887 = vmatpush3.bf16.msra.mxu0 %v4884_v18  ;;  %5007 = vmatpush3.bf16.msra.mxu1 %v5860_v60  ;;  %v3177_v18 = vld [vmem:[%s7063_s1 + $0x108] sm:$0xff]  ;;  %v4948_v50 = vpack.c.bf16 %v3187_v47, %v3186_v46  ;;  %v3188_v54 = vld [vmem:[%s7063_s1 + $0x160] sm:$0xff]  ;;  %v3190_v58 = vld [vmem:[%s7063_s1 + $0x170] sm:$0xff] }
  0x1e   : > { %4889 = vmatprep.subr.bf16.mxu0 %v4888_v21  ;;  %5009 = vmatprep.subr.bf16.mxu1 %v5879_v3  ;;  %v4928_v19 = vpack.c.bf16 %v3177_v18, %v3176_v17  ;;  %v3189_v55 = vld [vmem:[%s7063_s1 + $0x168] sm:$0xff]  ;;  %v3191_v61 = vld [vmem:[%s7063_s1 + $0x178] sm:$0xff]  ;;  %v3192_v63 = vld [vmem:[%s7063_s1 + $0x180] sm:$0xff] }
  0x1f   : > { %v4956_v62 = vpack.c.bf16 %v3191_v61, %v3190_v58  ;;  %v3194_v4 = vld [vmem:[%s7063_s1 + $0x190] sm:$0xff]  ;;  %v3195_v5 = vld [vmem:[%s7063_s1 + $0x198] sm:$0xff]  ;;  %v3196_v10 = vld [vmem:[%s7063_s1 + $0x1a0] sm:$0xff] }
  0x20   : > { %v5991_v6 = vld [vmem:[%s5732_s14 + $0x12] sm:$0xff]  ;;  %v4964_v7 = vpack.c.bf16 %v3195_v5, %v3194_v4  ;;  %v3197_v12 = vld [vmem:[%s7063_s1 + $0x1a8] sm:$0xff]  ;;  %v6134_v4 = vld [vmem:[%s7064_s2] ss:$0 sm:$0xff] }
  0x21   : > { %4891 = vmatpush3.bf16.msra.mxu0 %v4888_v21  ;;  %5011 = vmatpush3.bf16.msra.mxu1 %v5879_v3  ;;  %v3179_v21 = vld [vmem:[%s7063_s1 + $0x118] sm:$0xff]  ;;  %v6005_v13 = vld [vmem:[%s5732_s14 + $0x22] sm:$0xff]  ;;  %v4968_v14 = vpack.c.bf16 %v3197_v12, %v3196_v10  ;;  %v3198_v17 = vld [vmem:[%s7063_s1 + $0x1b0] sm:$0xff] }
  0x22   : > { %4893 = vmatprep.subr.bf16.mxu0 %v4892_v24  ;;  %5013 = vmatprep.subr.bf16.mxu1 %v5895_v8  ;;  %v4932_v23 = vpack.c.bf16 %v3179_v21, %v3178_v20  ;;  %v3199_v18 = vld [vmem:[%s7063_s1 + $0x1b8] sm:$0xff]  ;;  %v6036_v26 = vld [vmem:[%s5732_s14 + $0x4a] sm:$0xff] }
  0x23   : > { %v4972_v20 = vpack.c.bf16 %v3199_v18, %v3198_v17  ;;  %v6022_v21 = vld [vmem:[%s5732_s14 + $0x3a] sm:$0xff]  ;;  %v3206_v37 = vld [vmem:[%s7063_s1 + $0x1f0] sm:$0xff]  ;;  %v6073_v46 = vld [vmem:[%s5732_s14 + $0x23] sm:$0xff] }
  0x24   : > { %v3207_v38 = vld [vmem:[%s7063_s1 + $0x1f8] sm:$0xff]  ;;  %v6077_v47 = vld [vmem:[%s5732_s14 + $0x2b] sm:$0xff] }
  0x25   : > { %4895 = vmatpush3.bf16.msra.mxu0 %v4892_v24  ;;  %5015 = vmatpush3.bf16.msra.mxu1 %v5895_v8  ;;  %v245_v24 = vld [vmem:[%s5732_s14 + $0x10] sm:$0xff]  ;;  %v242_v61 = vld [vmem:[%s7065_s3 + $0x78] sm:$0xff] }
  0x26   : > { %4897 = vmatprep.subr.bf16.mxu0 %v4896_v27  ;;  %5017 = vmatprep.subr.bf16.mxu1 %v5912_v15  ;;  %v241_v58 = vld [vmem:[%s7065_s3 + $0x70] sm:$0xff]  ;;  %v3229_v17 = vld [vmem:[%s7063_s1 + $0x298] sm:$0xff] }
  0x28   : > { %3957 = vmatmul.mubr.f32.vlgmr.msra.gmra.mrb[0].mxu0 %v5775_v30 }
  0x29   : > { %4899 = vmatpush3.bf16.msra.mxu0 %v4896_v27  ;;  %3959 = vmatprep.mubr.f32.mxu0 %v5778_v32  ;;  %v246_v27 = vld [vmem:[%s5732_s14 + $0x18] sm:$0xff] }
  0x2a   : > { %4901 = vmatprep.subr.bf16.mxu0 %v4900_v31  ;;  %5019 = vmatpush3.bf16.msra.mxu1 %v5912_v15 }
  0x2c   : > { %3960 = vmatmul.mubr.f32.gmra.mrb[2].mxu0 %v5801_v39 }
  0x2d   : > { %4903 = vmatpush3.bf16.msra.mxu0 %v4900_v31  ;;  %3962 = vmatprep.mubr.f32.mxu0 %v5809_v43  ;;  %v3182_v31 = vld [vmem:[%s7063_s1 + $0x130] sm:$0xff] }
  0x2e   : > { %4905 = vmatprep.subr.bf16.mxu0 %v4904_v41  ;;  %v4940_v35 = vpack.c.bf16 %v3183_v33, %v3182_v31  ;;  %v6048_v33 = vld [vmem:[%s5732_s14 + $0xb] sm:$0xff] }
  0x30   : > { %3963 = vmatmul.mubr.f32.gmra.mrb[4].mxu0 %v5827_v48 }
  0x31   : > { %4907 = vmatpush3.bf16.msra.mxu0 %v4904_v41  ;;  %3965 = vmatprep.mubr.f32.mxu0 %v5833_v51  ;;  %v250_v41 = vld [vmem:[%s5732_s14 + $0x38] sm:$0xff] }
  0x32   : > { %4909 = vmatprep.subr.bf16.mxu0 %v4908_v49 }
  0x34   : > { %3966 = vmatmul.mubr.f32.gmra.mrb[6].mxu0 %v5851_v56 }
  0x35   : > { %4911 = vmatpush3.bf16.msra.mxu0 %v4908_v49  ;;  %3968 = vmatprep.mubr.f32.mxu0 %v5857_v59  ;;  %v252_v49 = vld [vmem:[%s5732_s14 + $0x48] sm:$0xff] }
  0x36   : > { %4913 = vmatprep.subr.bf16.mxu0 %v4912_v57 }
  0x38   : > { %3969 = vmatmul.mubr.f32.gmra.mrb[8].mxu0 %v5875_v0 }
  0x39   : > { %4915 = vmatpush3.bf16.msra.mxu0 %v4912_v57  ;;  %4003 = vmatprep.mubr.f32.mxu0 %v243_v2  ;;  %v4952_v57 = vpack.c.bf16 %v3189_v55, %v3188_v54  ;;  %v6093_v54 = vld [vmem:[%s5732_s14 + $0x43] sm:$0xff]  ;;  %v6097_v55 = vld [vmem:[%s5732_s14 + $0x4b] sm:$0xff] }
  0x3a   : > { %4917 = vmatprep.subr.bf16.mxu0 %v4916_v1 }
  0x3d   : > { %4919 = vmatpush3.bf16.msra.mxu0 %v4916_v1  ;;  %v3193_v1 = vld [vmem:[%s7063_s1 + $0x188] sm:$0xff] }
  0x3e   : > { %4921 = vmatprep.subr.bf16.mxu0 %v4920_v9  ;;  %v4960_v2 = vpack.c.bf16 %v3193_v1, %v3192_v63  ;;  %v3226_v63 = vld [vmem:[%s7063_s1 + $0x280] sm:$0xff]  ;;  %v3227_v1 = vld [vmem:[%s7063_s1 + $0x288] sm:$0xff] }
  0x41   : > { %4923 = vmatpush3.bf16.msra.mxu0 %v4920_v9  ;;  %v5994_v9 = vld [vmem:[%s5732_s14 + $0x1a] sm:$0xff] }
  0x42   : > { %4925 = vmatprep.subr.bf16.mxu0 %v4924_v16 }
  0x45   : > { %4927 = vmatpush3.bf16.msra.mxu0 %v4924_v16  ;;  %v6008_v16 = vld [vmem:[%s5732_s14 + $0x2a] sm:$0xff] }
  0x46   : > { %4929 = vmatprep.subr.bf16.mxu0 %v4928_v19 }
  0x48   : > { %4004 = vmatmul.mubr.f32.vlgmr.msra.gmra.mrb[0].mxu0 %v244_v22  ;;  %v3200_v22 = vld [vmem:[%s7063_s1 + $0x1c0] sm:$0xff] }
  0x49   : > { %4931 = vmatpush3.bf16.msra.mxu0 %v4928_v19  ;;  %4006 = vmatprep.mubr.f32.mxu0 %v245_v24  ;;  %v6019_v19 = vld [vmem:[%s5732_s14 + $0x32] sm:$0xff]  ;;  %v6033_v24 = vld [vmem:[%s5732_s14 + $0x42] sm:$0xff] }
  0x4a   : > { %4933 = vmatprep.subr.bf16.mxu0 %v4932_v23 }
  0x4c   : > { %4007 = vmatmul.mubr.f32.gmra.mrb[2].mxu0 %v246_v27  ;;  %v3202_v27 = vld [vmem:[%s7063_s1 + $0x1d0] sm:$0xff] }
  0x4d   : > { %4935 = vmatpush3.bf16.msra.mxu0 %v4932_v23  ;;  %4009 = vmatprep.mubr.f32.mxu0 %v247_v29  ;;  %v3201_v23 = vld [vmem:[%s7063_s1 + $0x1c8] sm:$0xff]  ;;  %v273_v29 = vld [vmem:[%s5732_s14 + $0x52] sm:$0xff] }
  0x4e   : > { %4937 = vmatprep.subr.bf16.mxu0 %v4936_v28  ;;  %v4976_v25 = vpack.c.bf16 %v3201_v23, %v3200_v22 }
  0x50   : > { %4010 = vmatmul.mubr.f32.gmra.mrb[4].mxu0 %v248_v34  ;;  %v3204_v34 = vld [vmem:[%s7063_s1 + $0x1e0] sm:$0xff] }
  0x51   : > { %4939 = vmatpush3.bf16.msra.mxu0 %v4936_v28  ;;  %4012 = vmatprep.mubr.f32.mxu0 %v249_v36  ;;  %v3203_v28 = vld [vmem:[%s7063_s1 + $0x1d8] sm:$0xff] }
  0x52   : > { %4941 = vmatprep.subr.bf16.mxu0 %v4940_v35  ;;  %v4980_v31 = vpack.c.bf16 %v3203_v28, %v3202_v27 }
  0x54   : > { %4013 = vmatmul.mubr.f32.gmra.mrb[6].mxu0 %v250_v41  ;;  %v4988_v41 = vpack.c.bf16 %v3207_v38, %v3206_v37 }
  0x55   : > { %4943 = vmatpush3.bf16.msra.mxu0 %v4940_v35  ;;  %4015 = vmatprep.mubr.f32.mxu0 %v251_v45  ;;  %v3205_v35 = vld [vmem:[%s7063_s1 + $0x1e8] sm:$0xff]  ;;  %v6067_v45 = vld [vmem:[%s5732_s14 + $0x1b] sm:$0xff] }
  0x56   : > { %4945 = vmatprep.subr.bf16.mxu0 %v4944_v42  ;;  %v4984_v36 = vpack.c.bf16 %v3205_v35, %v3204_v34 }
  0x58   : > { %4016 = vmatmul.mubr.f32.gmra.mrb[8].mxu0 %v252_v49  ;;  %v6083_v49 = vld [vmem:[%s5732_s14 + $0x33] sm:$0xff] }
  0x59   : > { %4947 = vmatpush3.bf16.msra.mxu0 %v4944_v42  ;;  %4050 = vmatprep.mubr.f32.mxu0 %v5963_v53  ;;  %v6064_v42 = vld [vmem:[%s5732_s14 + $0x13] sm:$0xff] }
  0x5a   : > { %4949 = vmatprep.subr.bf16.mxu0 %v4948_v50 }
  0x5d   : > { %4951 = vmatpush3.bf16.msra.mxu0 %v4948_v50  ;;  %v6087_v50 = vld [vmem:[%s5732_s14 + $0x3b] sm:$0xff] }
  0x5e   : > { %4953 = vmatprep.subr.bf16.mxu0 %v4952_v57 }
  0x61   : > { %4955 = vmatpush3.bf16.msra.mxu0 %v4952_v57  ;;  %v6103_v57 = vld [vmem:[%s5732_s14 + $0x53] sm:$0xff] }
  0x62   : > { %4957 = vmatprep.subr.bf16.mxu0 %v4956_v62 }
  0x65   : > { %4959 = vmatpush3.bf16.msra.mxu0 %v4956_v62  ;;  %v6119_v62 = vpack.c.bf16 %v242_v61, %v241_v58  ;;  %v3232_v61 = vld [vmem:[%s7063_s1 + $0x2b0] sm:$0xff] }
  0x66   : > { %4961 = vmatprep.subr.bf16.mxu0 %v4960_v2 }
  0x67   : > { %5021 = vmatprep.subr.bf16.mxu1 %v6119_v62 }
  0x68   : > { %4051 = vmatmul.mubr.f32.vlgmr.msra.gmra.mrb[0].mxu0 %v5991_v6  ;;  %5023 = vmatpush3.bf16.msra.mxu1 %v6119_v62 }
  0x69   : > { %4963 = vmatpush3.bf16.msra.mxu0 %v4960_v2  ;;  %4053 = vmatprep.mubr.f32.mxu0 %v5994_v9  ;;  %v5024_v2 = vpack.c.bf16 %v3227_v1, %v3226_v63  ;;  %v3233_v63 = vld [vmem:[%s7063_s1 + $0x2b8] sm:$0xff] }
  0x6a   : > { %4965 = vmatprep.subr.bf16.mxu0 %v4964_v7 }
  0x6b   : > { %5025 = vmatprep.subr.bf16.mxu1 %v5024_v2 }
  0x6c   : > { %4054 = vmatmul.mubr.f32.gmra.mrb[2].mxu0 %v6005_v13 }
  0x6d   : > { %4967 = vmatpush3.bf16.msra.mxu0 %v4964_v7  ;;  %4056 = vmatprep.mubr.f32.mxu0 %v6008_v16 }
  0x6e   : > { %4969 = vmatprep.subr.bf16.mxu0 %v4968_v14 }
  0x70   : > { %4057 = vmatmul.mubr.f32.gmra.mrb[4].mxu0 %v6019_v19 }
  0x71   : > { %4971 = vmatpush3.bf16.msra.mxu0 %v4968_v14  ;;  %4059 = vmatprep.mubr.f32.mxu0 %v6022_v21  ;;  %v3228_v14 = vld [vmem:[%s7063_s1 + $0x290] sm:$0xff] }
  0x72   : > { %4973 = vmatprep.subr.bf16.mxu0 %v4972_v20  ;;  %v5028_v27 = vpack.c.bf16 %v3229_v17, %v3228_v14  ;;  %v3234_v17 = vld [vmem:[%s7063_s1 + $0x2c0] sm:$0xff] }
  0x74   : > { %4060 = vmatmul.mubr.f32.gmra.mrb[6].mxu0 %v6033_v24 }
  0x75   : > { %4975 = vmatpush3.bf16.msra.mxu0 %v4972_v20  ;;  %4062 = vmatprep.mubr.f32.mxu0 %v6036_v26 }
  0x76   : > { %4977 = vmatprep.subr.bf16.mxu0 %v4976_v25 }
  0x78   : > { %4063 = vmatmul.mubr.f32.gmra.mrb[8].mxu0 %v273_v29  ;;  %v3230_v29 = vld [vmem:[%s7063_s1 + $0x2a0] sm:$0xff] }
  0x79   : > { %4979 = vmatpush3.bf16.msra.mxu0 %v4976_v25  ;;  %4097 = vmatprep.mubr.f32.mxu0 %v6048_v33 }
  0x7a   : > { %4981 = vmatprep.subr.bf16.mxu0 %v4980_v31 }
  0x7d   : > { %4983 = vmatpush3.bf16.msra.mxu0 %v4980_v31  ;;  %v3231_v31 = vld [vmem:[%s7063_s1 + $0x2a8] sm:$0xff] }
  0x7e   : > { %4985 = vmatprep.subr.bf16.mxu0 %v4984_v36 }
  0x81   : > { %4987 = vmatpush3.bf16.msra.mxu0 %v4984_v36 }
  0x82   : > { %4989 = vmatprep.subr.bf16.mxu0 %v4988_v41 }
  0x85   : > { %4991 = vmatpush3.bf16.msra.mxu0 %v4988_v41  ;;  %v5032_v41 = vpack.c.bf16 %v3231_v31, %v3230_v29  ;;  %v3236_v31 = vld [vmem:[%s7063_s1 + $0x2d0] sm:$0xff] }
  0x86   : > { %5153 = vmatprep.subr.bf16.mxu0 %v5803_v40 }
  0x88   : > { %4098 = vmatmul.mubr.f32.vlgmr.msra.gmra.mrb[0].mxu0 %v6064_v42 }
  0x89   : > { %4100 = vmatprep.mubr.f32.mxu0 %v6067_v45  ;;  %5155 = vmatpush3.bf16.msra.mxu0 %v5803_v40 }
  0x8a   : > { %5157 = vmatprep.subr.bf16.mxu0 %v5811_v44 }
  0x8c   : > { %4101 = vmatmul.mubr.f32.gmra.mrb[2].mxu0 %v6073_v46 }
  0x8d   : > { %4103 = vmatprep.mubr.f32.mxu0 %v6077_v47  ;;  %5159 = vmatpush3.bf16.msra.mxu0 %v5811_v44 }
  0x8e   : > { %5161 = vmatprep.subr.bf16.mxu0 %v5836_v52 }
  0x90   : > { %4104 = vmatmul.mubr.f32.gmra.mrb[4].mxu0 %v6083_v49 }
  0x91   : > { %4106 = vmatprep.mubr.f32.mxu0 %v6087_v50  ;;  %5163 = vmatpush3.bf16.msra.mxu0 %v5836_v52 }
  0x92   : > { %5165 = vmatprep.subr.bf16.mxu0 %v5860_v60 }
  0x94   : > { %4107 = vmatmul.mubr.f32.gmra.mrb[6].mxu0 %v6093_v54 }
  0x95   : > { %4109 = vmatprep.mubr.f32.mxu0 %v6097_v55  ;;  %5167 = vmatpush3.bf16.msra.mxu0 %v5860_v60 }
  0x96   : > { %5169 = vmatprep.subr.bf16.mxu0 %v5879_v3 }
  0x98   : > { %4110 = vmatmul.mubr.f32.gmra.mrb[8].mxu0 %v6103_v57 }
  0x99   : > { %5171 = vmatpush3.bf16.msra.mxu0 %v5879_v3 }
  0x9a   : > { %5173 = vmatprep.subr.bf16.mxu0 %v5895_v8 }
  0x9d   : > { %5175 = vmatpush3.bf16.msra.mxu0 %v5895_v8 }
  0x9e   : > { %5177 = vmatprep.subr.bf16.mxu0 %v5912_v15 }
  0xa1   : > { %5179 = vmatpush3.bf16.msra.mxu0 %v5912_v15 }
  0xa2   : > { %5181 = vmatprep.subr.bf16.mxu0 %v6119_v62 }
  0xa5   : > { %5183 = vmatpush3.bf16.msra.mxu0 %v6119_v62 }
 0x15b   : > { %v4099_v5 = vpop.f32.mrb[0].mxu0 }
 0x15c   : > { %v869_v7 = vadd.f32 %v4099_v5, %v6134_v4  ;;  %v803_v10 = vpop.f32.mrb[1].mxu0 }
 0x15d   : > { %v868_v12 = vadd.f32 %v6134_v4, %v803_v10 }
 0x15e   : > { %v879_v22 = vmax.f32 %v869_v7, 0.0 }
 0x15f   : > { %v4102_v18 = vpop.f32.mrb[2].mxu0  ;;  %v878_v20 = vmax.f32 %v868_v12, 0.0  ;;  %v5036_v12 = vpack.c.bf16 %v3233_v63, %v3232_v61  ;;  %v3240_v63 = vld [vmem:[%s7063_s1 + $0x2f0] sm:$0xff] }
 0x160   : > { %v871_v23 = vadd.f32 %v4102_v18, %v6134_v4  ;;  %v813_v25 = vpop.f32.mrb[3].mxu0  ;;  %v3235_v18 = vld [vmem:[%s7063_s1 + $0x2c8] sm:$0xff] }
 0x161   : > { %v870_v28 = vadd.f32 %v6134_v4, %v813_v25  ;;  %4144 = vmatprep.mubr.f32.mxu1 %v878_v20 }
 0x162   : > { %4145 = vmatmul.mubr.f32.vlgmr.msra.gmra.mrb[0].mxu1 %v879_v22  ;;  %v881_v36 = vmax.f32 %v871_v23, 0.0 }
 0x163   : > { %v880_v34 = vmax.f32 %v870_v28, 0.0  ;;  %5027 = vmatpush3.bf16.msra.mxu1 %v5024_v2  ;;  %v4105_v35 = vpop.f32.mrb[4].mxu0  ;;  %v5040_v28 = vpack.c.bf16 %v3235_v18, %v3234_v17  ;;  %v3214_v18 = vld [vmem:[%s7063_s1 + $0x220] sm:$0xff] }
 0x164   : > { %v873_v37 = vadd.f32 %v4105_v35, %v6134_v4  ;;  %v823_v38 = vpop.f32.mrb[5].mxu0  ;;  %5029 = vmatprep.subr.bf16.mxu1 %v5028_v27 }
 0x165   : > { %v872_v58 = vadd.f32 %v6134_v4, %v823_v38  ;;  %4147 = vmatprep.mubr.f32.mxu1 %v880_v34  ;;  %v3237_v34 = vld [vmem:[%s7063_s1 + $0x2d8] sm:$0xff]  ;;  %v263_v38 = vld [vmem:[%s5732_s14 + $0x2] sm:$0xff] }
 0x166   : > { %4148 = vmatmul.mubr.f32.gmra.mrb[2].mxu1 %v881_v36  ;;  %v883_v5 = vmax.f32 %v873_v37, 0.0  ;;  %v5044_v37 = vpack.c.bf16 %v3237_v34, %v3236_v31  ;;  %v3225_v31 = vld [vmem:[%s7063_s1 + $0x278] sm:$0xff] }
 0x167   : > { %v882_v1 = vmax.f32 %v872_v58, 0.0  ;;  %5031 = vmatpush3.bf16.msra.mxu1 %v5028_v27  ;;  %v4108_v2 = vpop.f32.mrb[6].mxu0  ;;  %v3239_v58 = vld [vmem:[%s7063_s1 + $0x2e8] sm:$0xff] }
 0x168   : > { %v875_v7 = vadd.f32 %v4108_v2, %v6134_v4  ;;  %v833_v10 = vpop.f32.mrb[7].mxu0  ;;  %5033 = vmatprep.subr.bf16.mxu1 %v5032_v41 }
 0x169   : > { %v874_v14 = vadd.f32 %v6134_v4, %v833_v10  ;;  %4150 = vmatprep.mubr.f32.mxu1 %v882_v1  ;;  %v3241_v1 = vld [vmem:[%s7063_s1 + $0x2f8] sm:$0xff] }
 0x16a   : > { %4151 = vmatmul.mubr.f32.gmra.mrb[4].mxu1 %v883_v5  ;;  %v885_v23 = vmax.f32 %v875_v7, 0.0  ;;  %v5052_v2 = vpack.c.bf16 %v3241_v1, %v3240_v63  ;;  %v3210_v5 = vld [vmem:[%s7063_s1 + $0x200] sm:$0xff]  ;;  %v3211_v7 = vld [vmem:[%s7063_s1 + $0x208] sm:$0xff]  ;;  %v3248_v63 = vld [vmem:[%s7063_s1 + $0x330] sm:$0xff] }
 0x16b   : > { %v884_v20 = vmax.f32 %v874_v14, 0.0  ;;  %5035 = vmatpush3.bf16.msra.mxu1 %v5032_v41  ;;  %v4111_v22 = vpop.f32.mrb[8].mxu0  ;;  %v3238_v41 = vld [vmem:[%s7063_s1 + $0x2e0] sm:$0xff]  ;;  %v5056_v10 = vpack.c.bf16 %v3211_v7, %v3210_v5  ;;  %v3213_v14 = vld [vmem:[%s7063_s1 + $0x218] sm:$0xff]  ;;  %v3255_v7 = vld [vmem:[%s7063_s1 + $0x368] sm:$0xff] }
 0x16c   : > { %v877_v25 = vadd.f32 %v4111_v22, %v6134_v4  ;;  %v843_v27 = vpop.f32.mrb[9].mxu0  ;;  %5037 = vmatprep.subr.bf16.mxu1 %v5036_v12  ;;  %v5048_v61 = vpack.c.bf16 %v3239_v58, %v3238_v41  ;;  %v3246_v41 = vld [vmem:[%s7063_s1 + $0x320] sm:$0xff]  ;;  %v3247_v58 = vld [vmem:[%s7063_s1 + $0x328] sm:$0xff]  ;;  %v3249_v1 = vld [vmem:[%s7063_s1 + $0x338] sm:$0xff] }
 0x16d   : > { %v876_v29 = vadd.f32 %v6134_v4, %v843_v27  ;;  %4153 = vmatprep.mubr.f32.mxu1 %v884_v20  ;;  %v3215_v20 = vld [vmem:[%s7063_s1 + $0x228] sm:$0xff]  ;;  %v3253_v5 = vld [vmem:[%s7063_s1 + $0x358] sm:$0xff] }
 0x16e   : > { %4154 = vmatmul.mubr.f32.gmra.mrb[6].mxu1 %v885_v23  ;;  %v887_v36 = vmax.f32 %v877_v25, 0.0  ;;  %v5064_v22 = vpack.c.bf16 %v3215_v20, %v3214_v18  ;;  %v3216_v23 = vld [vmem:[%s7063_s1 + $0x230] sm:$0xff]  ;;  %v3217_v25 = vld [vmem:[%s7063_s1 + $0x238] sm:$0xff]  ;;  %v3219_v27 = vld [vmem:[%s7063_s1 + $0x248] sm:$0xff] }
 0x16f   : > { %v886_v35 = vmax.f32 %v876_v29, 0.0  ;;  %5039 = vmatpush3.bf16.msra.mxu1 %v5036_v12  ;;  %v3212_v12 = vld [vmem:[%s7063_s1 + $0x210] sm:$0xff]  ;;  %v3223_v29 = vld [vmem:[%s7063_s1 + $0x268] sm:$0xff]  ;;  %v3261_v20 = vld [vmem:[%s7063_s1 + $0x398] sm:$0xff] }
 0x170   : > { %5041 = vmatprep.subr.bf16.mxu1 %v5040_v28  ;;  %v5060_v17 = vpack.c.bf16 %v3213_v14, %v3212_v12  ;;  %v3259_v14 = vld [vmem:[%s7063_s1 + $0x388] sm:$0xff]  ;;  %v3260_v18 = vld [vmem:[%s7063_s1 + $0x390] sm:$0xff] }
 0x171   : > { %4156 = vmatprep.mubr.f32.mxu1 %v886_v35 }
 0x172   : > { %4157 = vmatmul.mubr.f32.gmra.mrb[8].mxu1 %v887_v36  ;;  %v3244_v36 = vld [vmem:[%s7063_s1 + $0x310] sm:$0xff] }
 0x173   : > { %5043 = vmatpush3.bf16.msra.mxu1 %v5040_v28  ;;  %4191 = vmatprep.mubr.f32.mxu1 %v263_v38  ;;  %v3221_v28 = vld [vmem:[%s7063_s1 + $0x258] sm:$0xff] }
 0x174   : > { %5045 = vmatprep.subr.bf16.mxu1 %v5044_v37 }
 0x177   : > { %5047 = vmatpush3.bf16.msra.mxu1 %v5044_v37  ;;  %v3245_v37 = vld [vmem:[%s7063_s1 + $0x318] sm:$0xff] }
 0x178   : > { %5049 = vmatprep.subr.bf16.mxu1 %v5048_v61  ;;  %v5092_v38 = vpack.c.bf16 %v3245_v37, %v3244_v36  ;;  %v6367_v37 = vld [vmem:[%s5732_s14 + $0x14] sm:$0xff] }
 0x17b   : > { %5051 = vmatpush3.bf16.msra.mxu1 %v5048_v61  ;;  %v5096_v61 = vpack.c.bf16 %v3247_v58, %v3246_v41  ;;  %v6376_v41 = vld [vmem:[%s5732_s14 + $0x24] sm:$0xff]  ;;  %v6380_v58 = vld [vmem:[%s5732_s14 + $0x2c] sm:$0xff] }
 0x17c   : > { %5053 = vmatprep.subr.bf16.mxu1 %v5052_v2 }
 0x17f   : > { %5055 = vmatpush3.bf16.msra.mxu1 %v5052_v2  ;;  %v3251_v2 = vld [vmem:[%s7063_s1 + $0x348] sm:$0xff] }
 0x180   : > { %5057 = vmatprep.subr.bf16.mxu1 %v5056_v10 }
 0x182   : > { %4192 = vmatmul.mubr.f32.vlgmr.msra.gmra.mrb[10].mxu1 %v5963_v53  ;;  %v5068_v53 = vpack.c.bf16 %v3217_v25, %v3216_v23  ;;  %v3262_v23 = vld [vmem:[%s7063_s1 + $0x3a0] sm:$0xff]  ;;  %v3263_v25 = vld [vmem:[%s7063_s1 + $0x3a8] sm:$0xff] }
 0x183   : > { %5059 = vmatpush3.bf16.msra.mxu1 %v5056_v10  ;;  %4194 = vmatprep.mubr.f32.mxu1 %v5991_v6  ;;  %v3218_v6 = vld [vmem:[%s7063_s1 + $0x240] sm:$0xff]  ;;  %v3257_v10 = vld [vmem:[%s7063_s1 + $0x378] sm:$0xff] }
 0x184   : > { %5061 = vmatprep.subr.bf16.mxu1 %v5060_v17 }
 0x186   : > { %4195 = vmatmul.mubr.f32.gmra.mrb[12].mxu1 %v5994_v9  ;;  %v5072_v9 = vpack.c.bf16 %v3219_v27, %v3218_v6  ;;  %v3264_v6 = vld [vmem:[%s7063_s1 + $0x3b0] sm:$0xff]  ;;  %v3265_v27 = vld [vmem:[%s7063_s1 + $0x3b8] sm:$0xff] }
 0x187   : > { %5063 = vmatpush3.bf16.msra.mxu1 %v5060_v17  ;;  %4197 = vmatprep.mubr.f32.mxu1 %v6005_v13  ;;  %v3220_v13 = vld [vmem:[%s7063_s1 + $0x250] sm:$0xff] }
 0x188   : > { %5065 = vmatprep.subr.bf16.mxu1 %v5064_v22 }
 0x18a   : > { %4198 = vmatmul.mubr.f32.gmra.mrb[14].mxu1 %v6008_v16  ;;  %v5076_v16 = vpack.c.bf16 %v3221_v28, %v3220_v13  ;;  %v3266_v13 = vld [vmem:[%s7063_s1 + $0x3c0] sm:$0xff]  ;;  %v3267_v28 = vld [vmem:[%s7063_s1 + $0x3c8] sm:$0xff] }
 0x18b   : > { %5067 = vmatpush3.bf16.msra.mxu1 %v5064_v22  ;;  %4200 = vmatprep.mubr.f32.mxu1 %v6019_v19  ;;  %v3222_v19 = vld [vmem:[%s7063_s1 + $0x260] sm:$0xff]  ;;  %v5124_v22 = vpack.c.bf16 %v3261_v20, %v3260_v18 }
 0x18c   : > { %5069 = vmatprep.subr.bf16.mxu1 %v5068_v53 }
 0x18e   : > { %4201 = vmatmul.mubr.f32.gmra.mrb[16].mxu1 %v6022_v21  ;;  %v5080_v21 = vpack.c.bf16 %v3223_v29, %v3222_v19  ;;  %v3268_v19 = vld [vmem:[%s7063_s1 + $0x3d0] sm:$0xff]  ;;  %v3269_v29 = vld [vmem:[%s7063_s1 + $0x3d8] sm:$0xff] }
 0x18f   : > { %5071 = vmatpush3.bf16.msra.mxu1 %v5068_v53  ;;  %4203 = vmatprep.mubr.f32.mxu1 %v6033_v24  ;;  %v3224_v24 = vld [vmem:[%s7063_s1 + $0x270] sm:$0xff]  ;;  %v5128_v53 = vpack.c.bf16 %v3263_v25, %v3262_v23 }
 0x190   : > { %5073 = vmatprep.subr.bf16.mxu1 %v5072_v9  ;;  %v5084_v34 = vpack.c.bf16 %v3225_v31, %v3224_v24  ;;  %v6350_v24 = vld [vmem:[%s5732_s14 + $0xc] sm:$0xff]  ;;  %v3270_v31 = vld [vmem:[%s7063_s1 + $0x3e0] sm:$0xff] }
 0x192   : > { %4204 = vmatmul.mubr.f32.gmra.mrb[18].mxu1 %v6036_v26  ;;  %v3242_v26 = vld [vmem:[%s7063_s1 + $0x300] sm:$0xff] }
 0x193   : > { %5075 = vmatpush3.bf16.msra.mxu1 %v5072_v9  ;;  %4238 = vmatprep.mubr.f32.mxu1 %v5735_v11  ;;  %v3243_v11 = vld [vmem:[%s7063_s1 + $0x308] sm:$0xff]  ;;  %v5132_v9 = vpack.c.bf16 %v3265_v27, %v3264_v6 }
 0x194   : > { %5077 = vmatprep.subr.bf16.mxu1 %v5076_v16  ;;  %v5088_v35 = vpack.c.bf16 %v3243_v11, %v3242_v26  ;;  %v3272_v11 = vld [vmem:[%s7063_s1 + $0x3f0] sm:$0xff] }
 0x197   : > { %5079 = vmatpush3.bf16.msra.mxu1 %v5076_v16  ;;  %v5136_v16 = vpack.c.bf16 %v3267_v28, %v3266_v13 }
 0x198   : > { %5081 = vmatprep.subr.bf16.mxu1 %v5080_v21 }
 0x19b   : > { %5083 = vmatpush3.bf16.msra.mxu1 %v5080_v21  ;;  %v5140_v21 = vpack.c.bf16 %v3269_v29, %v3268_v19 }
 0x19c   : > { %5085 = vmatprep.subr.bf16.mxu1 %v5084_v34 }
 0x19f   : > { %5087 = vmatpush3.bf16.msra.mxu1 %v5084_v34  ;;  %v3271_v34 = vld [vmem:[%s7063_s1 + $0x3e8] sm:$0xff] }
 0x1a0   : > { %5089 = vmatprep.subr.bf16.mxu1 %v5088_v35  ;;  %v5144_v26 = vpack.c.bf16 %v3271_v34, %v3270_v31  ;;  %v3293_v31 = vld [vmem:[%s7063_s1 + $0x498] sm:$0xff] }
 0x1a2   : > { %4239 = vmatmul.mubr.f32.vlgmr.msra.gmra.mrb[10].mxu1 %v5775_v30  ;;  %v5100_v30 = vpack.c.bf16 %v3249_v1, %v3248_v63  ;;  %v6390_v63 = vld [vmem:[%s5732_s14 + $0x3c] sm:$0xff]  ;;  %v6396_v1 = vld [vmem:[%s5732_s14 + $0x44] sm:$0xff] }
 0x1a3   : > { %5091 = vmatpush3.bf16.msra.mxu1 %v5088_v35  ;;  %4241 = vmatprep.mubr.f32.mxu1 %v5778_v32  ;;  %v3250_v32 = vld [vmem:[%s7063_s1 + $0x340] sm:$0xff]  ;;  %v3273_v35 = vld [vmem:[%s7063_s1 + $0x3f8] sm:$0xff] }
 0x1a4   : > { %5093 = vmatprep.subr.bf16.mxu1 %v5092_v38  ;;  %v5148_v36 = vpack.c.bf16 %v3273_v35, %v3272_v11 }
 0x1a6   : > { %4242 = vmatmul.mubr.f32.gmra.mrb[12].mxu1 %v5801_v39  ;;  %v5104_v39 = vpack.c.bf16 %v3251_v2, %v3250_v32  ;;  %v6406_v32 = vld [vmem:[%s5732_s14 + $0x54] sm:$0xff]  ;;  %v6422_v2 = vld [vmem:[%s7066_s4] ss:$0 sm:$0xff] }
 0x1a7   : > { %5095 = vmatpush3.bf16.msra.mxu1 %v5092_v38  ;;  %4244 = vmatprep.mubr.f32.mxu1 %v5809_v43  ;;  %v3252_v43 = vld [vmem:[%s7063_s1 + $0x350] sm:$0xff]  ;;  %v6370_v38 = vld [vmem:[%s5732_s14 + $0x1c] sm:$0xff] }
 0x1a8   : > { %5097 = vmatprep.subr.bf16.mxu1 %v5096_v61 }
 0x1aa   : > { %4245 = vmatmul.mubr.f32.gmra.mrb[14].mxu1 %v5827_v48  ;;  %v5108_v48 = vpack.c.bf16 %v3253_v5, %v3252_v43 }
 0x1ab   : > { %5099 = vmatpush3.bf16.msra.mxu1 %v5096_v61  ;;  %4247 = vmatprep.mubr.f32.mxu1 %v5833_v51  ;;  %v3254_v51 = vld [vmem:[%s7063_s1 + $0x360] sm:$0xff]  ;;  %v6386_v61 = vld [vmem:[%s5732_s14 + $0x34] sm:$0xff] }
 0x1ac   : > { %5101 = vmatprep.subr.bf16.mxu1 %v5100_v30 }
 0x1ae   : > { %4248 = vmatmul.mubr.f32.gmra.mrb[16].mxu1 %v5851_v56  ;;  %v5112_v56 = vpack.c.bf16 %v3255_v7, %v3254_v51  ;;  %v3290_v51 = vld [vmem:[%s7063_s1 + $0x480] sm:$0xff]  ;;  %v3291_v7 = vld [vmem:[%s7063_s1 + $0x488] sm:$0xff] }
 0x1af   : > { %5103 = vmatpush3.bf16.msra.mxu1 %v5100_v30  ;;  %4250 = vmatprep.mubr.f32.mxu1 %v5857_v59  ;;  %v3256_v59 = vld [vmem:[%s7063_s1 + $0x370] sm:$0xff] }
 0x1b0   : > { %5105 = vmatprep.subr.bf16.mxu1 %v5104_v39  ;;  %v5116_v12 = vpack.c.bf16 %v3257_v10, %v3256_v59  ;;  %v6400_v30 = vld [vmem:[%s5732_s14 + $0x4c] sm:$0xff]  ;;  %v5184_v59 = vpack.c.bf16 %v3291_v7, %v3290_v51 }
 0x1b2   : > { %4251 = vmatmul.mubr.f32.gmra.mrb[18].mxu1 %v5875_v0  ;;  %v3258_v0 = vld [vmem:[%s7063_s1 + $0x380] sm:$0xff]  ;;  %5185 = vmatprep.subr.bf16.mxu0 %v5184_v59 }
 0x1b3   : > { %5107 = vmatpush3.bf16.msra.mxu1 %v5104_v39  ;;  %4285 = vmatprep.mubr.f32.mxu1 %v6048_v33  ;;  %v5120_v17 = vpack.c.bf16 %v3259_v14, %v3258_v0 }
 0x1b4   : > { %5109 = vmatprep.subr.bf16.mxu1 %v5108_v48 }
 0x1b7   : > { %5111 = vmatpush3.bf16.msra.mxu1 %v5108_v48 }
 0x1b8   : > { %5113 = vmatprep.subr.bf16.mxu1 %v5112_v56 }
 0x1bb   : > { %5115 = vmatpush3.bf16.msra.mxu1 %v5112_v56 }
 0x1bc   : > { %5117 = vmatprep.subr.bf16.mxu1 %v5116_v12 }
 0x1bf   : > { %5119 = vmatpush3.bf16.msra.mxu1 %v5116_v12 }
 0x1c0   : > { %5121 = vmatprep.subr.bf16.mxu1 %v5120_v17 }
 0x1c2   : > { %4286 = vmatmul.mubr.f32.vlgmr.msra.gmra.mrb[10].mxu1 %v6064_v42 }
 0x1c3   : > { %5123 = vmatpush3.bf16.msra.mxu1 %v5120_v17  ;;  %4288 = vmatprep.mubr.f32.mxu1 %v6067_v45 }
 0x1c4   : > { %5125 = vmatprep.subr.bf16.mxu1 %v5124_v22 }
 0x1c6   : > { %4289 = vmatmul.mubr.f32.gmra.mrb[12].mxu1 %v6073_v46 }
 0x1c7   : > { %5127 = vmatpush3.bf16.msra.mxu1 %v5124_v22  ;;  %4291 = vmatprep.mubr.f32.mxu1 %v6077_v47 }
 0x1c8   : > { %5129 = vmatprep.subr.bf16.mxu1 %v5128_v53 }
 0x1ca   : > { %4292 = vmatmul.mubr.f32.gmra.mrb[14].mxu1 %v6083_v49 }
 0x1cb   : > { %5131 = vmatpush3.bf16.msra.mxu1 %v5128_v53  ;;  %4294 = vmatprep.mubr.f32.mxu1 %v6087_v50 }
 0x1cc   : > { %5133 = vmatprep.subr.bf16.mxu1 %v5132_v9 }
 0x1ce   : > { %4295 = vmatmul.mubr.f32.gmra.mrb[16].mxu1 %v6093_v54 }
 0x1cf   : > { %5135 = vmatpush3.bf16.msra.mxu1 %v5132_v9  ;;  %4297 = vmatprep.mubr.f32.mxu1 %v6097_v55 }
 0x1d0   : > { %5137 = vmatprep.subr.bf16.mxu1 %v5136_v16 }
 0x1d2   : > { %4298 = vmatmul.mubr.f32.gmra.mrb[18].mxu1 %v6103_v57 }
 0x1d3   : > { %5139 = vmatpush3.bf16.msra.mxu1 %v5136_v16  ;;  %4332 = vmatprep.mubr.f32.mxu1 %v6350_v24 }
 0x1d4   : > { %5141 = vmatprep.subr.bf16.mxu1 %v5140_v21 }
 0x1d7   : > { %5143 = vmatpush3.bf16.msra.mxu1 %v5140_v21  ;;  %v3292_v21 = vld [vmem:[%s7063_s1 + $0x490] sm:$0xff] }
 0x1d8   : > { %5145 = vmatprep.subr.bf16.mxu1 %v5144_v26 }
 0x1db   : > { %5147 = vmatpush3.bf16.msra.mxu1 %v5144_v26 }
 0x1dc   : > { %5149 = vmatprep.subr.bf16.mxu1 %v5148_v36 }
 0x1df   : > { %5151 = vmatpush3.bf16.msra.mxu1 %v5148_v36 }
 0x1e0   : > { %5313 = vmatprep.subr.bf16.mxu1 %v5803_v40 }
 0x1e2   : > { %4333 = vmatmul.mubr.f32.vlgmr.msra.gmra.mrb[10].mxu1 %v6367_v37 }
 0x1e3   : > { %4335 = vmatprep.mubr.f32.mxu1 %v6370_v38  ;;  %5315 = vmatpush3.bf16.msra.mxu1 %v5803_v40 }
 0x1e4   : > { %5317 = vmatprep.subr.bf16.mxu1 %v5811_v44 }
 0x1e6   : > { %4336 = vmatmul.mubr.f32.gmra.mrb[12].mxu1 %v6376_v41 }
 0x1e7   : > { %4338 = vmatprep.mubr.f32.mxu1 %v6380_v58  ;;  %5319 = vmatpush3.bf16.msra.mxu1 %v5811_v44 }
 0x1e8   : > { %5321 = vmatprep.subr.bf16.mxu1 %v5836_v52 }
 0x1ea   : > { %4339 = vmatmul.mubr.f32.gmra.mrb[14].mxu1 %v6386_v61 }
 0x1eb   : > { %4341 = vmatprep.mubr.f32.mxu1 %v6390_v63  ;;  %5323 = vmatpush3.bf16.msra.mxu1 %v5836_v52 }
 0x1ec   : > { %5325 = vmatprep.subr.bf16.mxu1 %v5860_v60 }
 0x1ee   : > { %4342 = vmatmul.mubr.f32.gmra.mrb[16].mxu1 %v6396_v1 }
 0x1ef   : > { %4344 = vmatprep.mubr.f32.mxu1 %v6400_v30  ;;  %5327 = vmatpush3.bf16.msra.mxu1 %v5860_v60 }
 0x1f0   : > { %5329 = vmatprep.subr.bf16.mxu1 %v5879_v3 }
 0x1f2   : > { %4345 = vmatmul.mubr.f32.gmra.mrb[18].mxu1 %v6406_v32 }
 0x1f3   : > { %5331 = vmatpush3.bf16.msra.mxu1 %v5879_v3 }
 0x1f4   : > { %5333 = vmatprep.subr.bf16.mxu1 %v5895_v8 }
 0x1f7   : > { %5335 = vmatpush3.bf16.msra.mxu1 %v5895_v8 }
 0x1f8   : > { %5337 = vmatprep.subr.bf16.mxu1 %v5912_v15 }
 0x1fb   : > { %5339 = vmatpush3.bf16.msra.mxu1 %v5912_v15 }
 0x1fc   : > { %5341 = vmatprep.subr.bf16.mxu1 %v6119_v62 }
 0x1ff   : > { %5343 = vmatpush3.bf16.msra.mxu1 %v6119_v62 }
 0x235   : > { %v4146_v39 = vpop.f32.mrb[0].mxu1 }
 0x236   : > { %v966_v43 = vadd.f32 %v4146_v39, %v6422_v2  ;;  %v960_v5 = vpop.f32.mrb[1].mxu1  ;;  %v5188_v39 = vpack.c.bf16 %v3293_v31, %v3292_v21 }
 0x237   : > { %v961_v48 = vadd.f32 %v6422_v2, %v960_v5  ;;  %v3294_v5 = vld [vmem:[%s7063_s1 + $0x4a0] sm:$0xff] }
 0x238   : > { %1010 = vst [vmem:[%s6427_s7 + $0x20] sm:$0xff] %v966_v43 }
 0x239   : > { %1009 = vst [vmem:[%s6427_s7] sm:$0xff] %v961_v48  ;;  %v4149_v56 = vpop.f32.mrb[2].mxu1  ;;  %v3295_v48 = vld [vmem:[%s7063_s1 + $0x4a8] sm:$0xff] }
 0x23a   : > { %v976_v10 = vadd.f32 %v4149_v56, %v6422_v2  ;;  %v970_v12 = vpop.f32.mrb[3].mxu1 }
 0x23b   : > { %v971_v0 = vadd.f32 %v6422_v2, %v970_v12 }
 0x23c   : > { %1012 = vst [vmem:[%s6427_s7 + $0x60] sm:$0xff] %v976_v10 }
 0x23d   : > { %1011 = vst [vmem:[%s6427_s7 + $0x40] sm:$0xff] %v971_v0  ;;  %v4152_v14 = vpop.f32.mrb[4].mxu1  ;;  %v5192_v0 = vpack.c.bf16 %v3295_v48, %v3294_v5  ;;  %v3304_v5 = vld [vmem:[%s7063_s1 + $0x4f0] sm:$0xff]  ;;  %v3305_v48 = vld [vmem:[%s7063_s1 + $0x4f8] sm:$0xff] }
 0x23e   : > { %v986_v17 = vadd.f32 %v4152_v14, %v6422_v2  ;;  %v980_v18 = vpop.f32.mrb[5].mxu1 }
 0x23f   : > { %v981_v20 = vadd.f32 %v6422_v2, %v980_v18  ;;  %v3297_v18 = vld [vmem:[%s7063_s1 + $0x4b8] sm:$0xff] }
 0x240   : > { %1014 = vst [vmem:[%s6427_s7 + $0xa0] sm:$0xff] %v986_v17  ;;  %v3296_v17 = vld [vmem:[%s7063_s1 + $0x4b0] sm:$0xff] }
 0x241   : > { %1013 = vst [vmem:[%s6427_s7 + $0x80] sm:$0xff] %v981_v20  ;;  %v4155_v22 = vpop.f32.mrb[6].mxu1 }
 0x242   : > { %v996_v23 = vadd.f32 %v4155_v22, %v6422_v2  ;;  %v990_v25 = vpop.f32.mrb[7].mxu1 }
 0x243   : > { %v991_v53 = vadd.f32 %v6422_v2, %v990_v25 }
 0x244   : > { %1016 = vst [vmem:[%s6427_s7 + $0xe0] sm:$0xff] %v996_v23 }
 0x245   : > { %1015 = vst [vmem:[%s6427_s7 + $0xc0] sm:$0xff] %v991_v53  ;;  %v4158_v6 = vpop.f32.mrb[8].mxu1  ;;  %v5196_v53 = vpack.c.bf16 %v3297_v18, %v3296_v17  ;;  %v3279_v17 = vld [vmem:[%s7063_s1 + $0x428] sm:$0xff] }
 0x246   : > { %v1006_v27 = vadd.f32 %v4158_v6, %v6422_v2  ;;  %v1000_v9 = vpop.f32.mrb[9].mxu1 }
 0x247   : > { %v1001_v13 = vadd.f32 %v6422_v2, %v1000_v9  ;;  %v3299_v9 = vld [vmem:[%s7063_s1 + $0x4c8] sm:$0xff] }
 0x248   : > { %1018 = vst [vmem:[%s6427_s7 + $0x120] sm:$0xff] %v1006_v27  ;;  %v3298_v27 = vld [vmem:[%s7063_s1 + $0x4c0] sm:$0xff] }
 0x249   : > { %1017 = vst [vmem:[%s6427_s7 + $0x100] sm:$0xff] %v1001_v13  ;;  %v5200_v21 = vpack.c.bf16 %v3299_v9, %v3298_v27  ;;  %v3307_v9 = vld [vmem:[%s7063_s1 + $0x508] sm:$0xff] }
 0x2b5   : > { %v4334_v28 = vpop.f32.mrb[10].mxu1 }
 0x2b6   : > { %v1568_v16 = vadd.f32 %v4334_v28, %v6134_v4  ;;  %v1508_v19 = vpop.f32.mrb[11].mxu1 }
 0x2b7   : > { %v1567_v29 = vadd.f32 %v6134_v4, %v1508_v19 }
 0x2b8   : > { %v1578_v11 = vmax.f32 %v1568_v16, 0.0 }
 0x2b9   : > { %v1577_v34 = vmax.f32 %v1567_v29, 0.0  ;;  %v4337_v26 = vpop.f32.mrb[12].mxu1 }
 0x2ba   : > { %v1570_v35 = vadd.f32 %v4337_v26, %v6134_v4  ;;  %v1518_v36 = vpop.f32.mrb[13].mxu1  ;;  %v3301_v26 = vld [vmem:[%s7063_s1 + $0x4d8] sm:$0xff] }
 0x2bb   : > { %v1569_v43 = vadd.f32 %v6134_v4, %v1518_v36  ;;  %4379 = vmatprep.mubr.f32.mxu0 %v1577_v34  ;;  %v3300_v34 = vld [vmem:[%s7063_s1 + $0x4d0] sm:$0xff] }
 0x2bc   : > { %4380 = vmatmul.mubr.f32.vlgmr.msra.gmra.mrb[10].mxu0 %v1578_v11  ;;  %v1580_v56 = vmax.f32 %v1570_v35, 0.0  ;;  %v5204_v36 = vpack.c.bf16 %v3301_v26, %v3300_v34  ;;  %v5636_v34 = vld [vmem:[%s5732_s14 + $0x1a] sm:$0xff] }
 0x2bd   : > { %v1579_v51 = vmax.f32 %v1569_v43, 0.0  ;;  %5187 = vmatpush3.bf16.msra.mxu0 %v5184_v59  ;;  %v4340_v7 = vpop.f32.mrb[14].mxu1 }
 0x2be   : > { %v1572_v10 = vadd.f32 %v4340_v7, %v6134_v4  ;;  %v1528_v12 = vpop.f32.mrb[15].mxu1  ;;  %5189 = vmatprep.subr.bf16.mxu0 %v5188_v39  ;;  %v3274_v7 = vld [vmem:[%s7063_s1 + $0x400] sm:$0xff] }
 0x2bf   : > { %v1571_v14 = vadd.f32 %v6134_v4, %v1528_v12  ;;  %4382 = vmatprep.mubr.f32.mxu0 %v1579_v51  ;;  %v5212_v51 = vpack.c.bf16 %v3305_v48, %v3304_v5  ;;  %v3277_v12 = vld [vmem:[%s7063_s1 + $0x418] sm:$0xff]  ;;  %v3315_v5 = vld [vmem:[%s7063_s1 + $0x548] sm:$0xff] }
 0x2c0   : > { %4383 = vmatmul.mubr.f32.gmra.mrb[12].mxu0 %v1580_v56  ;;  %v1582_v22 = vmax.f32 %v1572_v10, 0.0  ;;  %v3276_v10 = vld [vmem:[%s7063_s1 + $0x410] sm:$0xff] }
 0x2c1   : > { %v1581_v59 = vmax.f32 %v1571_v14, 0.0  ;;  %5191 = vmatpush3.bf16.msra.mxu0 %v5188_v39  ;;  %v4343_v20 = vpop.f32.mrb[16].mxu1  ;;  %v3303_v39 = vld [vmem:[%s7063_s1 + $0x4e8] sm:$0xff]  ;;  %v3278_v14 = vld [vmem:[%s7063_s1 + $0x420] sm:$0xff]  ;;  %v5639_v48 = vld [vmem:[%s5732_s14 + $0x32] sm:$0xff] }
 0x2c2   : > { %v1574_v23 = vadd.f32 %v4343_v20, %v6134_v4  ;;  %v1538_v25 = vpop.f32.mrb[17].mxu1  ;;  %5193 = vmatprep.subr.bf16.mxu0 %v5192_v0  ;;  %v5224_v18 = vpack.c.bf16 %v3279_v17, %v3278_v14  ;;  %v3281_v20 = vld [vmem:[%s7063_s1 + $0x438] sm:$0xff]  ;;  %v3318_v14 = vld [vmem:[%s7063_s1 + $0x560] sm:$0xff]  ;;  %v3319_v17 = vld [vmem:[%s7063_s1 + $0x568] sm:$0xff] }
 0x2c3   : > { %v1573_v6 = vadd.f32 %v6134_v4, %v1538_v25  ;;  %4385 = vmatprep.mubr.f32.mxu0 %v1581_v59  ;;  %v3280_v59 = vld [vmem:[%s7063_s1 + $0x430] sm:$0xff]  ;;  %v3287_v25 = vld [vmem:[%s7063_s1 + $0x468] sm:$0xff] }
 0x2c4   : > { %4386 = vmatmul.mubr.f32.gmra.mrb[14].mxu0 %v1582_v22  ;;  %v1584_v16 = vmax.f32 %v1574_v23, 0.0  ;;  %v3283_v22 = vld [vmem:[%s7063_s1 + $0x448] sm:$0xff]  ;;  %v3285_v23 = vld [vmem:[%s7063_s1 + $0x458] sm:$0xff] }
 0x2c5   : > { %v1583_v13 = vmax.f32 %v1573_v6, 0.0  ;;  %5195 = vmatpush3.bf16.msra.mxu0 %v5192_v0  ;;  %v4346_v28 = vpop.f32.mrb[18].mxu1  ;;  %v5220_v0 = vpack.c.bf16 %v3277_v12, %v3276_v10  ;;  %v3289_v6 = vld [vmem:[%s7063_s1 + $0x478] sm:$0xff]  ;;  %v5641_v10 = vld [vmem:[%s5732_s14 + $0x42] sm:$0xff]  ;;  %v5642_v12 = vld [vmem:[%s5732_s14 + $0x4a] sm:$0xff] }
 0x2c6   : > { %v1576_v19 = vadd.f32 %v4346_v28, %v6134_v4  ;;  %v1548_v29 = vpop.f32.mrb[19].mxu1  ;;  %5197 = vmatprep.subr.bf16.mxu0 %v5196_v53  ;;  %v3308_v28 = vld [vmem:[%s7063_s1 + $0x510] sm:$0xff] }
 0x2c7   : > { %v1575_v31 = vadd.f32 %v6134_v4, %v1548_v29  ;;  %4388 = vmatprep.mubr.f32.mxu0 %v1583_v13  ;;  %v3302_v4 = vld [vmem:[%s7063_s1 + $0x4e0] sm:$0xff] }
 0x2c8   : > { %4389 = vmatmul.mubr.f32.gmra.mrb[16].mxu0 %v1584_v16  ;;  %v1586_v35 = vmax.f32 %v1576_v19, 0.0  ;;  %v5208_v43 = vpack.c.bf16 %v3303_v39, %v3302_v4  ;;  %v3309_v16 = vld [vmem:[%s7063_s1 + $0x518] sm:$0xff]  ;;  %v3310_v29 = vld [vmem:[%s7063_s1 + $0x520] sm:$0xff]  ;;  %v5638_v4 = vld [vmem:[%s5732_s14 + $0x2a] sm:$0xff] }
 0x2c9   : > { %v1585_v11 = vmax.f32 %v1575_v31, 0.0  ;;  %5199 = vmatpush3.bf16.msra.mxu0 %v5196_v53  ;;  %v5634_v53 = vld [vmem:[%s5732_s14 + $0xa] sm:$0xff]  ;;  %v5252_v19 = vpack.c.bf16 %v3309_v16, %v3308_v28  ;;  %v5635_v31 = vld [vmem:[%s5732_s14 + $0x12] sm:$0xff] }
 0x2ca   : > { %5201 = vmatprep.subr.bf16.mxu0 %v5200_v21  ;;  %v3332_v28 = vld [vmem:[%s7063_s1 + $0x5d0] sm:$0xff]  ;;  %v3333_v16 = vld [vmem:[%s7063_s1 + $0x5d8] sm:$0xff] }
 0x2cb   : > { %4391 = vmatprep.mubr.f32.mxu0 %v1585_v11  ;;  %v3312_v11 = vld [vmem:[%s7063_s1 + $0x530] sm:$0xff] }
 0x2cc   : > { %4392 = vmatmul.mubr.f32.gmra.mrb[18].mxu0 %v1586_v35  ;;  %v3313_v35 = vld [vmem:[%s7063_s1 + $0x538] sm:$0xff] }
 0x2cd   : > { %5203 = vmatpush3.bf16.msra.mxu0 %v5200_v21  ;;  %4426 = vmatprep.mubr.f32.mxu0 %v6048_v33  ;;  %v3275_v33 = vld [vmem:[%s7063_s1 + $0x408] sm:$0xff]  ;;  %v5260_v39 = vpack.c.bf16 %v3313_v35, %v3312_v11  ;;  %v3336_v11 = vld [vmem:[%s7063_s1 + $0x5f0] sm:$0xff]  ;;  %v3337_v35 = vld [vmem:[%s7063_s1 + $0x5f8] sm:$0xff] }
 0x2ce   : > { %5205 = vmatprep.subr.bf16.mxu0 %v5204_v36  ;;  %v5216_v56 = vpack.c.bf16 %v3275_v33, %v3274_v7  ;;  %v3311_v21 = vld [vmem:[%s7063_s1 + $0x528] sm:$0xff]  ;;  %v3316_v33 = vld [vmem:[%s7063_s1 + $0x550] sm:$0xff] }
 0x2cf   : > { %v5256_v26 = vpack.c.bf16 %v3311_v21, %v3310_v29  ;;  %v5300_v29 = vpack.c.bf16 %v3333_v16, %v3332_v28  ;;  %v6670_v21 = vld [vmem:[%s5732_s14 + $0x15] sm:$0xff] }
 0x2d1   : > { %5207 = vmatpush3.bf16.msra.mxu0 %v5204_v36  ;;  %v5637_v36 = vld [vmem:[%s5732_s14 + $0x22] sm:$0xff] }
 0x2d2   : > { %5209 = vmatprep.subr.bf16.mxu0 %v5208_v43 }
 0x2d5   : > { %5211 = vmatpush3.bf16.msra.mxu0 %v5208_v43  ;;  %v3314_v43 = vld [vmem:[%s7063_s1 + $0x540] sm:$0xff] }
 0x2d6   : > { %5213 = vmatprep.subr.bf16.mxu0 %v5212_v51  ;;  %v5264_v7 = vpack.c.bf16 %v3315_v5, %v3314_v43  ;;  %v6695_v43 = vld [vmem:[%s5732_s14 + $0x2d] sm:$0xff]  ;;  %v6699_v5 = vld [vmem:[%s5732_s14 + $0x35] sm:$0xff] }
 0x2d9   : > { %5215 = vmatpush3.bf16.msra.mxu0 %v5212_v51  ;;  %v5640_v51 = vld [vmem:[%s5732_s14 + $0x3a] sm:$0xff] }
 0x2da   : > { %5217 = vmatprep.subr.bf16.mxu0 %v5216_v56 }
 0x2dc   : > { %4427 = vmatmul.mubr.f32.vlgmr.msra.gmra.mrb[20].mxu0 %v6064_v42  ;;  %v5228_v42 = vpack.c.bf16 %v3281_v20, %v3280_v59  ;;  %v5272_v59 = vpack.c.bf16 %v3319_v17, %v3318_v14  ;;  %v3320_v20 = vld [vmem:[%s7063_s1 + $0x570] sm:$0xff] }
 0x2dd   : > { %5219 = vmatpush3.bf16.msra.mxu0 %v5216_v56  ;;  %4429 = vmatprep.mubr.f32.mxu0 %v6067_v45  ;;  %v3282_v45 = vld [vmem:[%s7063_s1 + $0x440] sm:$0xff]  ;;  %v3317_v56 = vld [vmem:[%s7063_s1 + $0x558] sm:$0xff] }
 0x2de   : > { %5221 = vmatprep.subr.bf16.mxu0 %v5220_v0 }
 0x2e0   : > { %4430 = vmatmul.mubr.f32.gmra.mrb[22].mxu0 %v6073_v46  ;;  %v5232_v46 = vpack.c.bf16 %v3283_v22, %v3282_v45  ;;  %v3322_v22 = vld [vmem:[%s7063_s1 + $0x580] sm:$0xff] }
 0x2e1   : > { %5223 = vmatpush3.bf16.msra.mxu0 %v5220_v0  ;;  %4432 = vmatprep.mubr.f32.mxu0 %v6077_v47  ;;  %v3284_v47 = vld [vmem:[%s7063_s1 + $0x450] sm:$0xff]  ;;  %v5268_v0 = vpack.c.bf16 %v3317_v56, %v3316_v33 }
 0x2e2   : > { %5225 = vmatprep.subr.bf16.mxu0 %v5224_v18 }
 0x2e4   : > { %4433 = vmatmul.mubr.f32.gmra.mrb[24].mxu0 %v6083_v49  ;;  %v5236_v49 = vpack.c.bf16 %v3285_v23, %v3284_v47  ;;  %v3324_v23 = vld [vmem:[%s7063_s1 + $0x590] sm:$0xff] }
 0x2e5   : > { %5227 = vmatpush3.bf16.msra.mxu0 %v5224_v18  ;;  %4435 = vmatprep.mubr.f32.mxu0 %v6087_v50  ;;  %v3286_v50 = vld [vmem:[%s7063_s1 + $0x460] sm:$0xff]  ;;  %v5643_v18 = vld [vmem:[%s5732_s14 + $0x52] sm:$0xff] }
 0x2e6   : > { %5229 = vmatprep.subr.bf16.mxu0 %v5228_v42 }
 0x2e8   : > { %4436 = vmatmul.mubr.f32.gmra.mrb[26].mxu0 %v6093_v54  ;;  %v5240_v54 = vpack.c.bf16 %v3287_v25, %v3286_v50  ;;  %v3326_v25 = vld [vmem:[%s7063_s1 + $0x5a0] sm:$0xff] }
 0x2e9   : > { %5231 = vmatpush3.bf16.msra.mxu0 %v5228_v42  ;;  %4438 = vmatprep.mubr.f32.mxu0 %v6097_v55  ;;  %v3288_v55 = vld [vmem:[%s7063_s1 + $0x470] sm:$0xff]  ;;  %v3321_v42 = vld [vmem:[%s7063_s1 + $0x578] sm:$0xff] }
 0x2ea   : > { %5233 = vmatprep.subr.bf16.mxu0 %v5232_v46  ;;  %v5244_v27 = vpack.c.bf16 %v3289_v6, %v3288_v55  ;;  %v5276_v45 = vpack.c.bf16 %v3321_v42, %v3320_v20  ;;  %v3328_v55 = vld [vmem:[%s7063_s1 + $0x5b0] sm:$0xff]  ;;  %v3329_v6 = vld [vmem:[%s7063_s1 + $0x5b8] sm:$0xff] }
 0x2ec   : > { %4439 = vmatmul.mubr.f32.gmra.mrb[28].mxu0 %v6103_v57  ;;  %v3306_v57 = vld [vmem:[%s7063_s1 + $0x500] sm:$0xff] }
 0x2ed   : > { %5235 = vmatpush3.bf16.msra.mxu0 %v5232_v46  ;;  %4473 = vmatprep.mubr.f32.mxu0 %v5634_v53  ;;  %v5248_v13 = vpack.c.bf16 %v3307_v9, %v3306_v57  ;;  %v3323_v46 = vld [vmem:[%s7063_s1 + $0x588] sm:$0xff]  ;;  %v3330_v57 = vld [vmem:[%s7063_s1 + $0x5c0] sm:$0xff] }
 0x2ee   : > { %5237 = vmatprep.subr.bf16.mxu0 %v5236_v49  ;;  %v5280_v47 = vpack.c.bf16 %v3323_v46, %v3322_v22  ;;  %v3327_v53 = vld [vmem:[%s7063_s1 + $0x5a8] sm:$0xff] }
 0x2ef   : > { %v3331_v9 = vld [vmem:[%s7063_s1 + $0x5c8] sm:$0xff] }
 0x2f1   : > { %5239 = vmatpush3.bf16.msra.mxu0 %v5236_v49  ;;  %v3325_v49 = vld [vmem:[%s7063_s1 + $0x598] sm:$0xff] }
 0x2f2   : > { %5241 = vmatprep.subr.bf16.mxu0 %v5240_v54  ;;  %v5284_v50 = vpack.c.bf16 %v3325_v49, %v3324_v23 }
 0x2f5   : > { %5243 = vmatpush3.bf16.msra.mxu0 %v5240_v54  ;;  %v5288_v54 = vpack.c.bf16 %v3327_v53, %v3326_v25  ;;  %v6766_v25 = vld [vmem:[%s7064_s2] ss:$0 sm:$0xff] }
 0x2f6   : > { %5245 = vmatprep.subr.bf16.mxu0 %v5244_v27 }
 0x2f9   : > { %5247 = vmatpush3.bf16.msra.mxu0 %v5244_v27  ;;  %v5292_v27 = vpack.c.bf16 %v3329_v6, %v3328_v55  ;;  %v3356_v6 = vld [vmem:[%s7063_s1 + $0x690] sm:$0xff] }
 0x2fa   : > { %5249 = vmatprep.subr.bf16.mxu0 %v5248_v13 }
 0x2fc   : > { %4474 = vmatmul.mubr.f32.vlgmr.msra.gmra.mrb[20].mxu0 %v5635_v31  ;;  %v3334_v31 = vld [vmem:[%s7063_s1 + $0x5e0] sm:$0xff] }
 0x2fd   : > { %5251 = vmatpush3.bf16.msra.mxu0 %v5248_v13  ;;  %4476 = vmatprep.mubr.f32.mxu0 %v5636_v34  ;;  %v5296_v13 = vpack.c.bf16 %v3331_v9, %v3330_v57  ;;  %v3335_v34 = vld [vmem:[%s7063_s1 + $0x5e8] sm:$0xff] }
 0x2fe   : > { %5253 = vmatprep.subr.bf16.mxu0 %v5252_v19 }
 0x300   : > { %4477 = vmatmul.mubr.f32.gmra.mrb[22].mxu0 %v5637_v36  ;;  %v5308_v36 = vpack.c.bf16 %v3337_v35, %v3336_v11 }
 0x301   : > { %5255 = vmatpush3.bf16.msra.mxu0 %v5252_v19  ;;  %4479 = vmatprep.mubr.f32.mxu0 %v5638_v4  ;;  %v294_v19 = vld [vmem:[%s5732_s14 + $0x5c] sm:$0xff] }
 0x302   : > { %5257 = vmatprep.subr.bf16.mxu0 %v5256_v26  ;;  %v6686_v4 = vld [vmem:[%s5732_s14 + $0x1d] sm:$0xff] }
 0x304   : > { %4480 = vmatmul.mubr.f32.gmra.mrb[24].mxu0 %v5639_v48  ;;  %v6705_v48 = vld [vmem:[%s5732_s14 + $0x3d] sm:$0xff] }
 0x305   : > { %5259 = vmatpush3.bf16.msra.mxu0 %v5256_v26  ;;  %4482 = vmatprep.mubr.f32.mxu0 %v5640_v51  ;;  %v5304_v26 = vpack.c.bf16 %v3335_v34, %v3334_v31  ;;  %v6709_v51 = vld [vmem:[%s5732_s14 + $0x45] sm:$0xff] }
 0x306   : > { %5261 = vmatprep.subr.bf16.mxu0 %v5260_v39  ;;  %v3359_v31 = vld [vmem:[%s7063_s1 + $0x6a8] sm:$0xff] }
 0x308   : > { %4483 = vmatmul.mubr.f32.gmra.mrb[26].mxu0 %v5641_v10 }
 0x309   : > { %5263 = vmatpush3.bf16.msra.mxu0 %v5260_v39  ;;  %4485 = vmatprep.mubr.f32.mxu0 %v5642_v12  ;;  %v6689_v39 = vld [vmem:[%s5732_s14 + $0x25] sm:$0xff] }
 0x30a   : > { %5265 = vmatprep.subr.bf16.mxu0 %v5264_v7 }
 0x30c   : > { %4486 = vmatmul.mubr.f32.gmra.mrb[28].mxu0 %v5643_v18 }
 0x30d   : > { %5267 = vmatpush3.bf16.msra.mxu0 %v5264_v7  ;;  %4520 = vmatprep.mubr.f32.mxu0 %v6367_v37  ;;  %v6719_v7 = vld [vmem:[%s5732_s14 + $0x55] sm:$0xff] }
 0x30e   : > { %5269 = vmatprep.subr.bf16.mxu0 %v5268_v0 }
 0x311   : > { %5271 = vmatpush3.bf16.msra.mxu0 %v5268_v0 }
 0x312   : > { %5273 = vmatprep.subr.bf16.mxu0 %v5272_v59 }
 0x315   : > { %5275 = vmatpush3.bf16.msra.mxu0 %v5272_v59 }
 0x316   : > { %5277 = vmatprep.subr.bf16.mxu0 %v5276_v45 }
 0x319   : > { %5279 = vmatpush3.bf16.msra.mxu0 %v5276_v45 }
 0x31a   : > { %5281 = vmatprep.subr.bf16.mxu0 %v5280_v47 }
 0x31c   : > { %4521 = vmatmul.mubr.f32.vlgmr.msra.gmra.mrb[20].mxu0 %v6370_v38 }
 0x31d   : > { %5283 = vmatpush3.bf16.msra.mxu0 %v5280_v47  ;;  %4523 = vmatprep.mubr.f32.mxu0 %v6376_v41 }
 0x31e   : > { %5285 = vmatprep.subr.bf16.mxu0 %v5284_v50 }
 0x320   : > { %4524 = vmatmul.mubr.f32.gmra.mrb[22].mxu0 %v6380_v58 }
 0x321   : > { %5287 = vmatpush3.bf16.msra.mxu0 %v5284_v50  ;;  %4526 = vmatprep.mubr.f32.mxu0 %v6386_v61 }
 0x322   : > { %5289 = vmatprep.subr.bf16.mxu0 %v5288_v54 }
 0x324   : > { %4527 = vmatmul.mubr.f32.gmra.mrb[24].mxu0 %v6390_v63 }
 0x325   : > { %5291 = vmatpush3.bf16.msra.mxu0 %v5288_v54  ;;  %4529 = vmatprep.mubr.f32.mxu0 %v6396_v1 }
 0x326   : > { %5293 = vmatprep.subr.bf16.mxu0 %v5292_v27 }
 0x328   : > { %4530 = vmatmul.mubr.f32.gmra.mrb[26].mxu0 %v6400_v30 }
 0x329   : > { %5295 = vmatpush3.bf16.msra.mxu0 %v5292_v27  ;;  %4532 = vmatprep.mubr.f32.mxu0 %v6406_v32 }
 0x32a   : > { %5297 = vmatprep.subr.bf16.mxu0 %v5296_v13 }
 0x32c   : > { %4533 = vmatmul.mubr.f32.gmra.mrb[28].mxu0 %v294_v19 }
 0x32d   : > { %5299 = vmatpush3.bf16.msra.mxu0 %v5296_v13  ;;  %4567 = vmatprep.mubr.f32.mxu0 %v6670_v21 }
 0x32e   : > { %5301 = vmatprep.subr.bf16.mxu0 %v5300_v29 }
 0x331   : > { %5303 = vmatpush3.bf16.msra.mxu0 %v5300_v29  ;;  %v3358_v29 = vld [vmem:[%s7063_s1 + $0x6a0] sm:$0xff] }
 0x332   : > { %5305 = vmatprep.subr.bf16.mxu0 %v5304_v26 }
 0x335   : > { %5307 = vmatpush3.bf16.msra.mxu0 %v5304_v26 }
 0x336   : > { %5309 = vmatprep.subr.bf16.mxu0 %v5308_v36 }
 0x339   : > { %5311 = vmatpush3.bf16.msra.mxu0 %v5308_v36 }
 0x33a   : > { %5473 = vmatprep.subr.bf16.mxu0 %v5803_v40 }
 0x33c   : > { %4568 = vmatmul.mubr.f32.vlgmr.msra.gmra.mrb[20].mxu0 %v6686_v4 }
 0x33d   : > { %4570 = vmatprep.mubr.f32.mxu0 %v6689_v39  ;;  %5475 = vmatpush3.bf16.msra.mxu0 %v5803_v40  ;;  %v6715_v40 = vld [vmem:[%s5732_s14 + $0x4d] sm:$0xff] }
 0x33e   : > { %5477 = vmatprep.subr.bf16.mxu0 %v5811_v44 }
 0x340   : > { %4571 = vmatmul.mubr.f32.gmra.mrb[22].mxu0 %v6695_v43 }
 0x341   : > { %4573 = vmatprep.mubr.f32.mxu0 %v6699_v5  ;;  %5479 = vmatpush3.bf16.msra.mxu0 %v5811_v44  ;;  %v6725_v44 = vld [vmem:[%s5732_s14 + $0x5d] sm:$0xff] }
 0x342   : > { %5481 = vmatprep.subr.bf16.mxu0 %v5836_v52 }
 0x344   : > { %4574 = vmatmul.mubr.f32.gmra.mrb[24].mxu0 %v6705_v48 }
 0x345   : > { %4576 = vmatprep.mubr.f32.mxu0 %v6709_v51  ;;  %5483 = vmatpush3.bf16.msra.mxu0 %v5836_v52 }
 0x346   : > { %5485 = vmatprep.subr.bf16.mxu0 %v5860_v60 }
 0x348   : > { %4577 = vmatmul.mubr.f32.gmra.mrb[26].mxu0 %v6715_v40 }
 0x349   : > { %4579 = vmatprep.mubr.f32.mxu0 %v6719_v7  ;;  %5487 = vmatpush3.bf16.msra.mxu0 %v5860_v60 }
 0x34a   : > { %5489 = vmatprep.subr.bf16.mxu0 %v5879_v3 }
 0x34c   : > { %4580 = vmatmul.mubr.f32.gmra.mrb[28].mxu0 %v6725_v44 }
 0x34d   : > { %5491 = vmatpush3.bf16.msra.mxu0 %v5879_v3 }
 0x34e   : > { %5493 = vmatprep.subr.bf16.mxu0 %v5895_v8 }
 0x351   : > { %5495 = vmatpush3.bf16.msra.mxu0 %v5895_v8  ;;  %v3354_v8 = vld [vmem:[%s7063_s1 + $0x680] sm:$0xff] }
 0x352   : > { %5497 = vmatprep.subr.bf16.mxu0 %v5912_v15 }
 0x355   : > { %5499 = vmatpush3.bf16.msra.mxu0 %v5912_v15  ;;  %v3355_v15 = vld [vmem:[%s7063_s1 + $0x688] sm:$0xff] }
 0x356   : > { %5501 = vmatprep.subr.bf16.mxu0 %v6119_v62  ;;  %v5344_v56 = vpack.c.bf16 %v3355_v15, %v3354_v8 }
 0x358   : > { %5345 = vmatprep.subr.bf16.mxu1 %v5344_v56 }
 0x359   : > { %5503 = vmatpush3.bf16.msra.mxu0 %v6119_v62 }
 0x38f   : > { %v4381_v52 = vpop.f32.mrb[10].mxu0 }
 0x390   : > { %v1659_v60 = vadd.f32 %v4381_v52, %v6422_v2  ;;  %v1653_v33 = vpop.f32.mrb[11].mxu0  ;;  %v5352_v52 = vpack.c.bf16 %v3359_v31, %v3358_v29  ;;  %v3342_v29 = vld [vmem:[%s7063_s1 + $0x620] sm:$0xff]  ;;  %v3343_v31 = vld [vmem:[%s7063_s1 + $0x628] sm:$0xff] }
 0x391   : > { %v1654_v3 = vadd.f32 %v6422_v2, %v1653_v33  ;;  %v3360_v33 = vld [vmem:[%s7063_s1 + $0x6b0] sm:$0xff] }
 0x392   : > { %1703 = vst [vmem:[%s6427_s7 + $0x28] sm:$0xff] %v1659_v60 }
 0x393   : > { %1702 = vst [vmem:[%s6427_s7 + $0x8] sm:$0xff] %v1654_v3  ;;  %v4384_v62 = vpop.f32.mrb[12].mxu0  ;;  %v3361_v3 = vld [vmem:[%s7063_s1 + $0x6b8] sm:$0xff] }
 0x394   : > { %v1669_v10 = vadd.f32 %v4384_v62, %v6422_v2  ;;  %v1663_v12 = vpop.f32.mrb[13].mxu0 }
 0x395   : > { %v1664_v0 = vadd.f32 %v6422_v2, %v1663_v12  ;;  %v5356_v12 = vpack.c.bf16 %v3361_v3, %v3360_v33  ;;  %v3353_v33 = vld [vmem:[%s7063_s1 + $0x678] sm:$0xff] }
 0x396   : > { %1705 = vst [vmem:[%s6427_s7 + $0x68] sm:$0xff] %v1669_v10 }
 0x397   : > { %1704 = vst [vmem:[%s6427_s7 + $0x48] sm:$0xff] %v1664_v0  ;;  %v4387_v14 = vpop.f32.mrb[14].mxu0 }
 0x398   : > { %v1679_v17 = vadd.f32 %v4387_v14, %v6422_v2  ;;  %v1673_v18 = vpop.f32.mrb[15].mxu0  ;;  %v3362_v14 = vld [vmem:[%s7063_s1 + $0x6c0] sm:$0xff] }
 0x399   : > { %v1674_v59 = vadd.f32 %v6422_v2, %v1673_v18 }
 0x39a   : > { %1707 = vst [vmem:[%s6427_s7 + $0xa8] sm:$0xff] %v1679_v17  ;;  %v3363_v17 = vld [vmem:[%s7063_s1 + $0x6c8] sm:$0xff] }
 0x39b   : > { %1706 = vst [vmem:[%s6427_s7 + $0x88] sm:$0xff] %v1674_v59  ;;  %v4390_v20 = vpop.f32.mrb[16].mxu0 }
 0x39c   : > { %v1689_v42 = vadd.f32 %v4390_v20, %v6422_v2  ;;  %v1683_v45 = vpop.f32.mrb[17].mxu0 }
 0x39d   : > { %v1684_v22 = vadd.f32 %v6422_v2, %v1683_v45 }
 0x39e   : > { %1709 = vst [vmem:[%s6427_s7 + $0xe8] sm:$0xff] %v1689_v42 }
 0x39f   : > { %1708 = vst [vmem:[%s6427_s7 + $0xc8] sm:$0xff] %v1684_v22  ;;  %v4393_v46 = vpop.f32.mrb[18].mxu0  ;;  %v5360_v22 = vpack.c.bf16 %v3363_v17, %v3362_v14  ;;  %v5646_v14 = vld [vmem:[%s5732_s14 + $0x13] sm:$0xff]  ;;  %v5647_v17 = vld [vmem:[%s5732_s14 + $0x1b] sm:$0xff] }
 0x3a0   : > { %v1699_v47 = vadd.f32 %v4393_v46, %v6422_v2  ;;  %v1693_v23 = vpop.f32.mrb[19].mxu0 }
 0x3a1   : > { %v1694_v49 = vadd.f32 %v6422_v2, %v1693_v23  ;;  %v3357_v2 = vld [vmem:[%s7063_s1 + $0x698] sm:$0xff] }
 0x3a2   : > { %1711 = vst [vmem:[%s6427_s7 + $0x128] sm:$0xff] %v1699_v47  ;;  %v5348_v16 = vpack.c.bf16 %v3357_v2, %v3356_v6  ;;  %v3364_v47 = vld [vmem:[%s7063_s1 + $0x6d0] sm:$0xff]  ;;  %v3365_v23 = vld [vmem:[%s7063_s1 + $0x6d8] sm:$0xff] }
 0x3a3   : > { %1710 = vst [vmem:[%s6427_s7 + $0x108] sm:$0xff] %v1694_v49  ;;  %v3368_v2 = vld [vmem:[%s7063_s1 + $0x6f0] sm:$0xff] }
 0x40f   : > { %v4569_v50 = vpop.f32.mrb[20].mxu0 }
 0x410   : > { %v2261_v53 = vadd.f32 %v6766_v25, %v4569_v50  ;;  %v2201_v54 = vpop.f32.mrb[21].mxu0 }
 0x411   : > { %v2260_v55 = vadd.f32 %v6766_v25, %v2201_v54  ;;  %v3366_v54 = vld [vmem:[%s7063_s1 + $0x6e0] sm:$0xff] }
 0x412   : > { %v2271_v9 = vmax.f32 %v2261_v53, 0.0  ;;  %v5364_v53 = vpack.c.bf16 %v3365_v23, %v3364_v47  ;;  %v3379_v47 = vld [vmem:[%s7063_s1 + $0x748] sm:$0xff]  ;;  %v5650_v23 = vld [vmem:[%s5732_s14 + $0x33] sm:$0xff] }
 0x413   : > { %v2270_v27 = vmax.f32 %v2260_v55, 0.0  ;;  %v4572_v57 = vpop.f32.mrb[22].mxu0  ;;  %v3367_v55 = vld [vmem:[%s7063_s1 + $0x6e8] sm:$0xff] }
 0x414   : > { %v2263_v13 = vadd.f32 %v6766_v25, %v4572_v57  ;;  %v2211_v28 = vpop.f32.mrb[23].mxu0  ;;  %v5368_v6 = vpack.c.bf16 %v3367_v55, %v3366_v54  ;;  %v3381_v54 = vld [vmem:[%s7063_s1 + $0x758] sm:$0xff]  ;;  %v5652_v55 = vld [vmem:[%s5732_s14 + $0x43] sm:$0xff] }
 0x415   : > { %v2262_v19 = vadd.f32 %v6766_v25, %v2211_v28  ;;  %4614 = vmatprep.mubr.f32.mxu1 %v2270_v27  ;;  %v3369_v27 = vld [vmem:[%s7063_s1 + $0x6f8] sm:$0xff]  ;;  %v3340_v28 = vld [vmem:[%s7063_s1 + $0x610] sm:$0xff] }
 0x416   : > { %4615 = vmatmul.mubr.f32.vlgmr.msra.gmra.mrb[20].mxu1 %v2271_v9  ;;  %v2273_v11 = vmax.f32 %v2263_v13, 0.0  ;;  %v5372_v57 = vpack.c.bf16 %v3369_v27, %v3368_v2  ;;  %v3338_v9 = vld [vmem:[%s7063_s1 + $0x600] sm:$0xff] }
 0x417   : > { %v2272_v34 = vmax.f32 %v2262_v19, 0.0  ;;  %5347 = vmatpush3.bf16.msra.mxu1 %v5344_v56  ;;  %v4575_v26 = vpop.f32.mrb[24].mxu0  ;;  %v3382_v27 = vld [vmem:[%s7063_s1 + $0x760] sm:$0xff] }
 0x418   : > { %v2265_v35 = vadd.f32 %v6766_v25, %v4575_v26  ;;  %v2221_v36 = vpop.f32.mrb[25].mxu0  ;;  %5349 = vmatprep.subr.bf16.mxu1 %v5348_v16  ;;  %v3344_v26 = vld [vmem:[%s7063_s1 + $0x630] sm:$0xff] }
 0x419   : > { %v2264_v60 = vadd.f32 %v6766_v25, %v2221_v36  ;;  %4617 = vmatprep.mubr.f32.mxu1 %v2272_v34  ;;  %v5384_v34 = vpack.c.bf16 %v3343_v31, %v3342_v29  ;;  %v3349_v36 = vld [vmem:[%s7063_s1 + $0x658] sm:$0xff]  ;;  %v3388_v31 = vld [vmem:[%s7063_s1 + $0x790] sm:$0xff] }
 0x41a   : > { %4618 = vmatmul.mubr.f32.gmra.mrb[22].mxu1 %v2273_v11  ;;  %v2275_v62 = vmax.f32 %v2265_v35, 0.0  ;;  %v3345_v11 = vld [vmem:[%s7063_s1 + $0x638] sm:$0xff]  ;;  %v3347_v35 = vld [vmem:[%s7063_s1 + $0x648] sm:$0xff] }
 0x41b   : > { %v2274_v8 = vmax.f32 %v2264_v60, 0.0  ;;  %5351 = vmatpush3.bf16.msra.mxu1 %v5348_v16  ;;  %v4578_v15 = vpop.f32.mrb[26].mxu0  ;;  %v3341_v16 = vld [vmem:[%s7063_s1 + $0x618] sm:$0xff]  ;;  %v5645_v60 = vld [vmem:[%s5732_s14 + $0xb] sm:$0xff] }
 0x41c   : > { %v2267_v56 = vadd.f32 %v6766_v25, %v4578_v15  ;;  %v2231_v10 = vpop.f32.mrb[27].mxu0  ;;  %5353 = vmatprep.subr.bf16.mxu1 %v5352_v52  ;;  %v5380_v19 = vpack.c.bf16 %v3341_v16, %v3340_v28  ;;  %v3385_v28 = vld [vmem:[%s7063_s1 + $0x778] sm:$0xff] }
 0x41d   : > { %v2266_v0 = vadd.f32 %v6766_v25, %v2231_v10  ;;  %4620 = vmatprep.mubr.f32.mxu1 %v2274_v8  ;;  %v3371_v8 = vld [vmem:[%s7063_s1 + $0x708] sm:$0xff] }
 0x41e   : > { %4621 = vmatmul.mubr.f32.gmra.mrb[24].mxu1 %v2275_v62  ;;  %v2277_v20 = vmax.f32 %v2267_v56, 0.0  ;;  %v3372_v62 = vld [vmem:[%s7063_s1 + $0x710] sm:$0xff]  ;;  %v3373_v56 = vld [vmem:[%s7063_s1 + $0x718] sm:$0xff] }
 0x41f   : > { %v2276_v18 = vmax.f32 %v2266_v0, 0.0  ;;  %5355 = vmatpush3.bf16.msra.mxu1 %v5352_v52  ;;  %v4581_v59 = vpop.f32.mrb[28].mxu0  ;;  %v3351_v52 = vld [vmem:[%s7063_s1 + $0x668] sm:$0xff]  ;;  %v5412_v10 = vpack.c.bf16 %v3373_v56, %v3372_v62  ;;  %v314_v62 = vld [vmem:[%s5732_s14 + $0x5e] sm:$0xff] }
 0x420   : > { %v2269_v42 = vadd.f32 %v6766_v25, %v4581_v59  ;;  %v2241_v45 = vpop.f32.mrb[29].mxu0  ;;  %5357 = vmatprep.subr.bf16.mxu1 %v5356_v12  ;;  %v3375_v0 = vld [vmem:[%s7063_s1 + $0x728] sm:$0xff]  ;;  %v3376_v59 = vld [vmem:[%s7063_s1 + $0x730] sm:$0xff] }
 0x421   : > { %v2268_v46 = vadd.f32 %v6766_v25, %v2241_v45  ;;  %4623 = vmatprep.mubr.f32.mxu1 %v2276_v18  ;;  %v5649_v45 = vld [vmem:[%s5732_s14 + $0x2b] sm:$0xff] }
 0x422   : > { %4624 = vmatmul.mubr.f32.gmra.mrb[26].mxu1 %v2277_v20  ;;  %v2279_v50 = vmax.f32 %v2269_v42, 0.0  ;;  %v3377_v20 = vld [vmem:[%s7063_s1 + $0x738] sm:$0xff]  ;;  %v5648_v42 = vld [vmem:[%s5732_s14 + $0x23] sm:$0xff] }
 0x423   : > { %v2278_v49 = vmax.f32 %v2268_v46, 0.0  ;;  %5359 = vmatpush3.bf16.msra.mxu1 %v5356_v12  ;;  %v3374_v12 = vld [vmem:[%s7063_s1 + $0x720] sm:$0xff] }
 0x424   : > { %5361 = vmatprep.subr.bf16.mxu1 %v5360_v22  ;;  %v5416_v18 = vpack.c.bf16 %v3375_v0, %v3374_v12  ;;  %v3378_v46 = vld [vmem:[%s7063_s1 + $0x740] sm:$0xff] }
 0x425   : > { %4626 = vmatprep.mubr.f32.mxu1 %v2278_v49  ;;  %v5651_v49 = vld [vmem:[%s5732_s14 + $0x3b] sm:$0xff] }
 0x426   : > { %4627 = vmatmul.mubr.f32.gmra.mrb[28].mxu1 %v2279_v50  ;;  %v5424_v50 = vpack.c.bf16 %v3379_v47, %v3378_v46 }
 0x427   : > { %5363 = vmatpush3.bf16.msra.mxu1 %v5360_v22  ;;  %4661 = vmatprep.mubr.f32.mxu1 %v6350_v24  ;;  %v3339_v24 = vld [vmem:[%s7063_s1 + $0x608] sm:$0xff]  ;;  %v5420_v22 = vpack.c.bf16 %v3377_v20, %v3376_v59 }
 0x428   : > { %5365 = vmatprep.subr.bf16.mxu1 %v5364_v53  ;;  %v5376_v13 = vpack.c.bf16 %v3339_v24, %v3338_v9  ;;  %v5654_v9 = vld [vmem:[%s5732_s14 + $0x53] sm:$0xff] }
 0x42b   : > { %5367 = vmatpush3.bf16.msra.mxu1 %v5364_v53  ;;  %v3380_v53 = vld [vmem:[%s7063_s1 + $0x750] sm:$0xff] }
 0x42c   : > { %5369 = vmatprep.subr.bf16.mxu1 %v5368_v6  ;;  %v5428_v2 = vpack.c.bf16 %v3381_v54, %v3380_v53 }
 0x42f   : > { %5371 = vmatpush3.bf16.msra.mxu1 %v5368_v6  ;;  %v5653_v6 = vld [vmem:[%s5732_s14 + $0x4b] sm:$0xff] }
 0x430   : > { %5373 = vmatprep.subr.bf16.mxu1 %v5372_v57 }
 0x433   : > { %5375 = vmatpush3.bf16.msra.mxu1 %v5372_v57  ;;  %v3383_v57 = vld [vmem:[%s7063_s1 + $0x768] sm:$0xff] }
 0x434   : > { %5377 = vmatprep.subr.bf16.mxu1 %v5376_v13  ;;  %v5432_v24 = vpack.c.bf16 %v3383_v57, %v3382_v27 }
 0x436   : > { %4662 = vmatmul.mubr.f32.vlgmr.msra.gmra.mrb[30].mxu1 %v6367_v37  ;;  %v5388_v37 = vpack.c.bf16 %v3345_v11, %v3344_v26  ;;  %v3390_v11 = vld [vmem:[%s7063_s1 + $0x7a0] sm:$0xff] }
 0x437   : > { %5379 = vmatpush3.bf16.msra.mxu1 %v5376_v13  ;;  %4664 = vmatprep.mubr.f32.mxu1 %v6370_v38  ;;  %v3346_v38 = vld [vmem:[%s7063_s1 + $0x640] sm:$0xff]  ;;  %v3384_v13 = vld [vmem:[%s7063_s1 + $0x770] sm:$0xff] }
 0x438   : > { %5381 = vmatprep.subr.bf16.mxu1 %v5380_v19  ;;  %v5436_v16 = vpack.c.bf16 %v3385_v28, %v3384_v13 }
 0x43a   : > { %4665 = vmatmul.mubr.f32.gmra.mrb[32].mxu1 %v6376_v41  ;;  %v5392_v41 = vpack.c.bf16 %v3347_v35, %v3346_v38  ;;  %v3392_v35 = vld [vmem:[%s7063_s1 + $0x7b0] sm:$0xff] }
 0x43b   : > { %5383 = vmatpush3.bf16.msra.mxu1 %v5380_v19  ;;  %4667 = vmatprep.mubr.f32.mxu1 %v6380_v58  ;;  %v3348_v58 = vld [vmem:[%s7063_s1 + $0x650] sm:$0xff]  ;;  %v3386_v19 = vld [vmem:[%s7063_s1 + $0x780] sm:$0xff] }
 0x43c   : > { %5385 = vmatprep.subr.bf16.mxu1 %v5384_v34 }
 0x43e   : > { %4668 = vmatmul.mubr.f32.gmra.mrb[34].mxu1 %v6386_v61  ;;  %v5396_v61 = vpack.c.bf16 %v3349_v36, %v3348_v58  ;;  %v3395_v58 = vld [vmem:[%s7063_s1 + $0x7c8] sm:$0xff]  ;;  %v3397_v36 = vld [vmem:[%s7063_s1 + $0x7d8] sm:$0xff] }
 0x43f   : > { %5387 = vmatpush3.bf16.msra.mxu1 %v5384_v34  ;;  %4670 = vmatprep.mubr.f32.mxu1 %v6390_v63  ;;  %v3350_v63 = vld [vmem:[%s7063_s1 + $0x660] sm:$0xff]  ;;  %v3389_v34 = vld [vmem:[%s7063_s1 + $0x798] sm:$0xff] }
 0x440   : > { %5389 = vmatprep.subr.bf16.mxu1 %v5388_v37  ;;  %v5444_v26 = vpack.c.bf16 %v3389_v34, %v3388_v31 }
 0x442   : > { %4671 = vmatmul.mubr.f32.gmra.mrb[36].mxu1 %v6396_v1  ;;  %v5400_v1 = vpack.c.bf16 %v3351_v52, %v3350_v63  ;;  %v3399_v63 = vld [vmem:[%s7063_s1 + $0x7e8] sm:$0xff]  ;;  %v3401_v52 = vld [vmem:[%s7063_s1 + $0x7f8] sm:$0xff] }
 0x443   : > { %5391 = vmatpush3.bf16.msra.mxu1 %v5388_v37  ;;  %4673 = vmatprep.mubr.f32.mxu1 %v6400_v30  ;;  %v3352_v30 = vld [vmem:[%s7063_s1 + $0x670] sm:$0xff]  ;;  %v3391_v37 = vld [vmem:[%s7063_s1 + $0x7a8] sm:$0xff] }
 0x444   : > { %5393 = vmatprep.subr.bf16.mxu1 %v5392_v41  ;;  %v5404_v3 = vpack.c.bf16 %v3353_v33, %v3352_v30  ;;  %v5448_v38 = vpack.c.bf16 %v3391_v37, %v3390_v11  ;;  %v308_v30 = vld [vmem:[%s5732_s14 + $0x2e] sm:$0xff]  ;;  %v309_v33 = vld [vmem:[%s5732_s14 + $0x36] sm:$0xff] }
 0x446   : > { %4674 = vmatmul.mubr.f32.gmra.mrb[38].mxu1 %v6406_v32  ;;  %v3370_v32 = vld [vmem:[%s7063_s1 + $0x700] sm:$0xff] }
 0x447   : > { %5395 = vmatpush3.bf16.msra.mxu1 %v5392_v41  ;;  %4708 = vmatprep.mubr.f32.mxu1 %v5645_v60  ;;  %v5408_v15 = vpack.c.bf16 %v3371_v8, %v3370_v32  ;;  %v3393_v41 = vld [vmem:[%s7063_s1 + $0x7b8] sm:$0xff]  ;;  %v311_v32 = vld [vmem:[%s5732_s14 + $0x46] sm:$0xff]  ;;  %v312_v8 = vld [vmem:[%s5732_s14 + $0x4e] sm:$0xff] }
 0x448   : > { %5397 = vmatprep.subr.bf16.mxu1 %v5396_v61 }
 0x44b   : > { %5399 = vmatpush3.bf16.msra.mxu1 %v5396_v61  ;;  %v305_v61 = vld [vmem:[%s5732_s14 + $0x16] sm:$0xff] }
 0x44c   : > { %5401 = vmatprep.subr.bf16.mxu1 %v5400_v1 }
 0x44f   : > { %5403 = vmatpush3.bf16.msra.mxu1 %v5400_v1  ;;  %v307_v1 = vld [vmem:[%s5732_s14 + $0x26] sm:$0xff] }
 0x450   : > { %5405 = vmatprep.subr.bf16.mxu1 %v5404_v3 }
 0x453   : > { %5407 = vmatpush3.bf16.msra.mxu1 %v5404_v3  ;;  %v310_v3 = vld [vmem:[%s5732_s14 + $0x3e] sm:$0xff] }
 0x454   : > { %5409 = vmatprep.subr.bf16.mxu1 %v5408_v15 }
 0x456   : > { %4709 = vmatmul.mubr.f32.vlgmr.msra.gmra.mrb[30].mxu1 %v5646_v14 }
 0x457   : > { %5411 = vmatpush3.bf16.msra.mxu1 %v5408_v15  ;;  %4711 = vmatprep.mubr.f32.mxu1 %v5647_v17  ;;  %v313_v15 = vld [vmem:[%s5732_s14 + $0x56] sm:$0xff] }
 0x458   : > { %5413 = vmatprep.subr.bf16.mxu1 %v5412_v10 }
 0x45a   : > { %4712 = vmatmul.mubr.f32.gmra.mrb[32].mxu1 %v5648_v42 }
 0x45b   : > { %5415 = vmatpush3.bf16.msra.mxu1 %v5412_v10  ;;  %4714 = vmatprep.mubr.f32.mxu1 %v5649_v45  ;;  %v7007_v10 = vld [vmem:[%s7066_s4] ss:$0 sm:$0xff] }
 0x45c   : > { %5417 = vmatprep.subr.bf16.mxu1 %v5416_v18 }
 0x45e   : > { %4715 = vmatmul.mubr.f32.gmra.mrb[34].mxu1 %v5650_v23 }
 0x45f   : > { %5419 = vmatpush3.bf16.msra.mxu1 %v5416_v18  ;;  %4717 = vmatprep.mubr.f32.mxu1 %v5651_v49 }
 0x460   : > { %5421 = vmatprep.subr.bf16.mxu1 %v5420_v22 }
 0x462   : > { %4718 = vmatmul.mubr.f32.gmra.mrb[36].mxu1 %v5652_v55 }
 0x463   : > { %5423 = vmatpush3.bf16.msra.mxu1 %v5420_v22  ;;  %4720 = vmatprep.mubr.f32.mxu1 %v5653_v6 }
 0x464   : > { %5425 = vmatprep.subr.bf16.mxu1 %v5424_v50 }
 0x466   : > { %4721 = vmatmul.mubr.f32.gmra.mrb[38].mxu1 %v5654_v9 }
 0x467   : > { %5427 = vmatpush3.bf16.msra.mxu1 %v5424_v50  ;;  %4755 = vmatprep.mubr.f32.mxu1 %v6670_v21  ;;  %v3387_v21 = vld [vmem:[%s7063_s1 + $0x788] sm:$0xff] }
 0x468   : > { %5429 = vmatprep.subr.bf16.mxu1 %v5428_v2  ;;  %v5440_v29 = vpack.c.bf16 %v3387_v21, %v3386_v19 }
 0x46b   : > { %5431 = vmatpush3.bf16.msra.mxu1 %v5428_v2 }
 0x46c   : > { %5433 = vmatprep.subr.bf16.mxu1 %v5432_v24 }
 0x46f   : > { %5435 = vmatpush3.bf16.msra.mxu1 %v5432_v24 }
 0x470   : > { %5437 = vmatprep.subr.bf16.mxu1 %v5436_v16 }
 0x473   : > { %5439 = vmatpush3.bf16.msra.mxu1 %v5436_v16 }
 0x474   : > { %5441 = vmatprep.subr.bf16.mxu1 %v5440_v29 }
 0x476   : > { %4756 = vmatmul.mubr.f32.vlgmr.msra.gmra.mrb[30].mxu1 %v6686_v4  ;;  %v5452_v4 = vpack.c.bf16 %v3393_v41, %v3392_v35 }
 0x477   : > { %5443 = vmatpush3.bf16.msra.mxu1 %v5440_v29  ;;  %4758 = vmatprep.mubr.f32.mxu1 %v6689_v39  ;;  %v3394_v39 = vld [vmem:[%s7063_s1 + $0x7c0] sm:$0xff] }
 0x478   : > { %5445 = vmatprep.subr.bf16.mxu1 %v5444_v26 }
 0x47a   : > { %4759 = vmatmul.mubr.f32.gmra.mrb[32].mxu1 %v6695_v43  ;;  %v5456_v43 = vpack.c.bf16 %v3395_v58, %v3394_v39 }
 0x47b   : > { %5447 = vmatpush3.bf16.msra.mxu1 %v5444_v26  ;;  %4761 = vmatprep.mubr.f32.mxu1 %v6699_v5  ;;  %v3396_v5 = vld [vmem:[%s7063_s1 + $0x7d0] sm:$0xff] }
 0x47c   : > { %5449 = vmatprep.subr.bf16.mxu1 %v5448_v38 }
 0x47e   : > { %4762 = vmatmul.mubr.f32.gmra.mrb[34].mxu1 %v6705_v48  ;;  %v5460_v48 = vpack.c.bf16 %v3397_v36, %v3396_v5 }
 0x47f   : > { %5451 = vmatpush3.bf16.msra.mxu1 %v5448_v38  ;;  %4764 = vmatprep.mubr.f32.mxu1 %v6709_v51  ;;  %v3398_v51 = vld [vmem:[%s7063_s1 + $0x7e0] sm:$0xff] }
 0x480   : > { %5453 = vmatprep.subr.bf16.mxu1 %v5452_v4 }
 0x482   : > { %4765 = vmatmul.mubr.f32.gmra.mrb[36].mxu1 %v6715_v40  ;;  %v5464_v40 = vpack.c.bf16 %v3399_v63, %v3398_v51 }
 0x483   : > { %5455 = vmatpush3.bf16.msra.mxu1 %v5452_v4  ;;  %4767 = vmatprep.mubr.f32.mxu1 %v6719_v7  ;;  %v3400_v7 = vld [vmem:[%s7063_s1 + $0x7f0] sm:$0xff] }
 0x484   : > { %5457 = vmatprep.subr.bf16.mxu1 %v5456_v43  ;;  %v5468_v60 = vpack.c.bf16 %v3401_v52, %v3400_v7 }
 0x486   : > { %4768 = vmatmul.mubr.f32.gmra.mrb[38].mxu1 %v6725_v44  ;;  %v306_v44 = vld [vmem:[%s5732_s14 + $0x1e] sm:$0xff] }
 0x487   : > { %5459 = vmatpush3.bf16.msra.mxu1 %v5456_v43  ;;  %4802 = vmatprep.mubr.f32.mxu1 %v305_v61 }
 0x488   : > { %5461 = vmatprep.subr.bf16.mxu1 %v5460_v48 }
 0x48b   : > { %5463 = vmatpush3.bf16.msra.mxu1 %v5460_v48 }
 0x48c   : > { %5465 = vmatprep.subr.bf16.mxu1 %v5464_v40 }
 0x48f   : > { %5467 = vmatpush3.bf16.msra.mxu1 %v5464_v40 }
 0x490   : > { %5469 = vmatprep.subr.bf16.mxu1 %v5468_v60 }
 0x493   : > { %5471 = vmatpush3.bf16.msra.mxu1 %v5468_v60 }
 0x496   : > { %4803 = vmatmul.mubr.f32.vlgmr.msra.gmra.mrb[30].mxu1 %v306_v44 }
 0x497   : > { %4805 = vmatprep.mubr.f32.mxu1 %v307_v1 }
 0x49a   : > { %4806 = vmatmul.mubr.f32.gmra.mrb[32].mxu1 %v308_v30 }
 0x49b   : > { %4808 = vmatprep.mubr.f32.mxu1 %v309_v33 }
 0x49e   : > { %4809 = vmatmul.mubr.f32.gmra.mrb[34].mxu1 %v310_v3 }
 0x49f   : > { %4811 = vmatprep.mubr.f32.mxu1 %v311_v32 }
 0x4a2   : > { %4812 = vmatmul.mubr.f32.gmra.mrb[36].mxu1 %v312_v8 }
 0x4a3   : > { %4814 = vmatprep.mubr.f32.mxu1 %v313_v15 }
 0x4a6   : > { %4815 = vmatmul.mubr.f32.gmra.mrb[38].mxu1 %v314_v62 }
 0x4e9   : > { %v4616_v56 = vpop.f32.mrb[20].mxu1 }
 0x4ea   : > { %v2352_v12 = vadd.f32 %v7007_v10, %v4616_v56  ;;  %v2346_v0 = vpop.f32.mrb[21].mxu1 }
 0x4eb   : > { %v2347_v14 = vadd.f32 %v7007_v10, %v2346_v0 }
 0x4ec   : > { %2396 = vst [vmem:[%s6427_s7 + $0x30] sm:$0xff] %v2352_v12 }
 0x4ed   : > { %2395 = vst [vmem:[%s6427_s7 + $0x10] sm:$0xff] %v2347_v14  ;;  %v4619_v17 = vpop.f32.mrb[22].mxu1 }
 0x4ee   : > { %v2362_v18 = vadd.f32 %v7007_v10, %v4619_v17  ;;  %v2356_v59 = vpop.f32.mrb[23].mxu1 }
 0x4ef   : > { %v2357_v20 = vadd.f32 %v7007_v10, %v2356_v59 }
 0x4f0   : > { %2398 = vst [vmem:[%s6427_s7 + $0x70] sm:$0xff] %v2362_v18 }
 0x4f1   : > { %2397 = vst [vmem:[%s6427_s7 + $0x50] sm:$0xff] %v2357_v20  ;;  %v4622_v42 = vpop.f32.mrb[24].mxu1 }
 0x4f2   : > { %v2372_v45 = vadd.f32 %v7007_v10, %v4622_v42  ;;  %v2366_v22 = vpop.f32.mrb[25].mxu1 }
 0x4f3   : > { %v2367_v46 = vadd.f32 %v7007_v10, %v2366_v22 }
 0x4f4   : > { %2400 = vst [vmem:[%s6427_s7 + $0xb0] sm:$0xff] %v2372_v45 }
 0x4f5   : > { %2399 = vst [vmem:[%s6427_s7 + $0x90] sm:$0xff] %v2367_v46  ;;  %v4625_v47 = vpop.f32.mrb[26].mxu1 }
 0x4f6   : > { %v2382_v23 = vadd.f32 %v7007_v10, %v4625_v47  ;;  %v2376_v49 = vpop.f32.mrb[27].mxu1 }
 0x4f7   : > { %v2377_v50 = vadd.f32 %v7007_v10, %v2376_v49 }
 0x4f8   : > { %2402 = vst [vmem:[%s6427_s7 + $0xf0] sm:$0xff] %v2382_v23 }
 0x4f9   : > { %2401 = vst [vmem:[%s6427_s7 + $0xd0] sm:$0xff] %v2377_v50  ;;  %v4628_v53 = vpop.f32.mrb[28].mxu1 }
 0x4fa   : > { %v2392_v54 = vadd.f32 %v7007_v10, %v4628_v53  ;;  %v2386_v55 = vpop.f32.mrb[29].mxu1 }
 0x4fb   : > { %v2387_v6 = vadd.f32 %v7007_v10, %v2386_v55 }
 0x4fc   : > { %2404 = vst [vmem:[%s6427_s7 + $0x130] sm:$0xff] %v2392_v54 }
 0x4fd   : > { %2403 = vst [vmem:[%s6427_s7 + $0x110] sm:$0xff] %v2387_v6 }
 0x569   : > { %v4804_v2 = vpop.f32.mrb[30].mxu1 }
 0x56a   : > { %v2954_v27 = vadd.f32 %v6766_v25, %v4804_v2  ;;  %v2894_v57 = vpop.f32.mrb[31].mxu1 }
 0x56b   : > { %v2953_v9 = vadd.f32 %v6766_v25, %v2894_v57 }
 0x56c   : > { %v2964_v28 = vmax.f32 %v2954_v27, 0.0 }
 0x56d   : > { %v2963_v24 = vmax.f32 %v2953_v9, 0.0  ;;  %v4807_v13 = vpop.f32.mrb[32].mxu1 }
 0x56e   : > { %v2956_v16 = vadd.f32 %v6766_v25, %v4807_v13  ;;  %v2904_v19 = vpop.f32.mrb[33].mxu1 }
 0x56f   : > { %v2955_v21 = vadd.f32 %v6766_v25, %v2904_v19  ;;  %4849 = vmatprep.mubr.f32.mxu0 %v2963_v24 }
 0x570   : > { %4850 = vmatmul.mubr.f32.vlgmr.msra.gmra.mrb[30].mxu0 %v2964_v28  ;;  %v2966_v34 = vmax.f32 %v2956_v16, 0.0 }
 0x571   : > { %v2965_v29 = vmax.f32 %v2955_v21, 0.0  ;;  %v4810_v31 = vpop.f32.mrb[34].mxu1 }
 0x572   : > { %v2958_v26 = vadd.f32 %v6766_v25, %v4810_v31  ;;  %v2914_v11 = vpop.f32.mrb[35].mxu1 }
 0x573   : > { %v2957_v37 = vadd.f32 %v6766_v25, %v2914_v11  ;;  %4852 = vmatprep.mubr.f32.mxu0 %v2965_v29 }
 0x574   : > { %4853 = vmatmul.mubr.f32.gmra.mrb[32].mxu0 %v2966_v34  ;;  %v2968_v41 = vmax.f32 %v2958_v26, 0.0 }
 0x575   : > { %v2967_v38 = vmax.f32 %v2957_v37, 0.0  ;;  %v4813_v35 = vpop.f32.mrb[36].mxu1 }
 0x576   : > { %v2960_v4 = vadd.f32 %v6766_v25, %v4813_v35  ;;  %v2924_v39 = vpop.f32.mrb[37].mxu1 }
 0x577   : > { %v2959_v58 = vadd.f32 %v6766_v25, %v2924_v39  ;;  %4855 = vmatprep.mubr.f32.mxu0 %v2967_v38 }
 0x578   : > { %4856 = vmatmul.mubr.f32.gmra.mrb[34].mxu0 %v2968_v41  ;;  %v2970_v36 = vmax.f32 %v2960_v4, 0.0 }
 0x579   : > { %v2969_v43 = vmax.f32 %v2959_v58, 0.0  ;;  %v4816_v5 = vpop.f32.mrb[38].mxu1 }
 0x57a   : > { %v2962_v48 = vadd.f32 %v6766_v25, %v4816_v5  ;;  %v2934_v61 = vpop.f32.mrb[39].mxu1 }
 0x57b   : > { %v2961_v51 = vadd.f32 %v6766_v25, %v2934_v61  ;;  %4858 = vmatprep.mubr.f32.mxu0 %v2969_v43 }
 0x57c   : > { %4859 = vmatmul.mubr.f32.gmra.mrb[36].mxu0 %v2970_v36  ;;  %v2972_v40 = vmax.f32 %v2962_v48, 0.0 }
 0x57d   : > { %v2971_v63 = vmax.f32 %v2961_v51, 0.0 }
 0x57f   : > { %4861 = vmatprep.mubr.f32.mxu0 %v2971_v63 }
 0x580   : > { %4862 = vmatmul.mubr.f32.gmra.mrb[38].mxu0 %v2972_v40 }
 0x643   : > { %v4851_v7 = vpop.f32.mrb[30].mxu0 }
 0x644   : > { %v3045_v52 = vadd.f32 %v7007_v10, %v4851_v7  ;;  %v3039_v60 = vpop.f32.mrb[31].mxu0 }
 0x645   : > { %v3040_v44 = vadd.f32 %v7007_v10, %v3039_v60 }
 0x646   : > { %3089 = vst [vmem:[%s6427_s7 + $0x38] sm:$0xff] %v3045_v52 }
 0x647   : > { %3088 = vst [vmem:[%s6427_s7 + $0x18] sm:$0xff] %v3040_v44  ;;  %v4854_v1 = vpop.f32.mrb[32].mxu0 }
 0x648   : > { %v3055_v25 = vadd.f32 %v7007_v10, %v4854_v1  ;;  %v3049_v30 = vpop.f32.mrb[33].mxu0 }
 0x649   : > { %v3050_v33 = vadd.f32 %v7007_v10, %v3049_v30 }
 0x64a   : > { %3091 = vst [vmem:[%s6427_s7 + $0x78] sm:$0xff] %v3055_v25 }
 0x64b   : > { %3090 = vst [vmem:[%s6427_s7 + $0x58] sm:$0xff] %v3050_v33  ;;  %v4857_v3 = vpop.f32.mrb[34].mxu0 }
 0x64c   : > { %v3065_v32 = vadd.f32 %v7007_v10, %v4857_v3  ;;  %v3059_v8 = vpop.f32.mrb[35].mxu0 }
 0x64d   : > { %v3060_v15 = vadd.f32 %v7007_v10, %v3059_v8 }
 0x64e   : > { %3093 = vst [vmem:[%s6427_s7 + $0xb8] sm:$0xff] %v3065_v32 }
 0x64f   : > { %3092 = vst [vmem:[%s6427_s7 + $0x98] sm:$0xff] %v3060_v15  ;;  %v4860_v62 = vpop.f32.mrb[36].mxu0 }
 0x650   : > { %v3075_v56 = vadd.f32 %v7007_v10, %v4860_v62  ;;  %v3069_v12 = vpop.f32.mrb[37].mxu0 }
 0x651   : > { %v3070_v0 = vadd.f32 %v7007_v10, %v3069_v12 }
 0x652   : > { %3095 = vst [vmem:[%s6427_s7 + $0xf8] sm:$0xff] %v3075_v56 }
 0x653   : > { %3094 = vst [vmem:[%s6427_s7 + $0xd8] sm:$0xff] %v3070_v0  ;;  %v4863_v14 = vpop.f32.mrb[38].mxu0 }
 0x654   : > { %v3085_v17 = vadd.f32 %v7007_v10, %v4863_v14  ;;  %v3079_v18 = vpop.f32.mrb[39].mxu0 }
 0x655   : > { %v3080_v59 = vadd.f32 %v7007_v10, %v3079_v18 }
 0x656   : > { %3097 = vst [vmem:[%s6427_s7 + $0x138] sm:$0xff] %v3085_v17 }
 0x657   : > { %3096 = vst [vmem:[%s6427_s7 + $0x118] sm:$0xff] %v3080_v59 }
 0x658 PF: > { %s15_s18 = sadd.s32 1, %s5662_s18  }
 0x659   : > { %p12_p4 = scmp.ge.s32.totalorder %s15_s18, 4  }
 0x65b   :  { %14 = sbr.rel (!%p12_p4) target bundleno = 1 (0x1), region = 85 }

</bundles_post_ra>
